<compile_context>
chip_gen: v7x
topology: tpu7x:2x2x1
jax: 0.10.0
libtpu: 0.0.40
codegen_flags: <defaults>
</compile_context>

<pallas_src>
import functools

import jax
import jax.numpy as jnp
import numpy as np
from jax.experimental import pallas as pl
from jax.experimental.pallas import tpu as pltpu


LANES = 128  # default packed head-output width (lane-dense)


# ----------------------------------------------------------------------------
# Fused forward kernel
# ----------------------------------------------------------------------------
def _make_kernel(latent):
    L = latent

    def kernel(x_ref, w1, a1, w2, a2, w3, a3, w4, a4, wh, bh, eps_ref, o_ref):

        def conv_block(x, w_ref, a_ref):
            # x: (H, B, W*C_in) f32 value, spatial rows in natural order.
            h, b, k = x.shape
            oh = h // 2
            n_out = w_ref.shape[2]
            # Even/odd row split = pure vreg relabelling (8-aligned f32 tiles):
            xp = x.reshape(oh, 2 * b, k)
            even = xp[:, :b, :]                    # input rows 2*m      (ki = 1)
            odd = xp[:, b:, :]                     # input rows 2*m + 1  (ki = 2)
            top = jnp.concatenate(                 # input rows 2*m - 1  (ki = 0)
                [jnp.zeros((1, b, k), x.dtype), odd[:-1]], axis=0)

            acc = jnp.zeros((oh * b, n_out), jnp.float32)
            for ki, tap in enumerate((top, even, odd)):
                lhs = tap.reshape(oh * b, k).astype(jnp.bfloat16)
                acc = acc + jnp.dot(lhs, w_ref[ki],
                                    preferred_element_type=jnp.float32)

            aff = a_ref[...]
            y = acc + aff[0:1, :]                              # conv bias
            y = jnp.where(y > 0, y, 0.2 * y)                   # LeakyReLU(0.2)
            # TODO(synk): Dropout2d(0.25) is identity in eval mode; training-mode
            # channel dropout is not modeled here.
            y = y * aff[1:2, :] + aff[2:3, :]                  # folded eval-BN
            return y.reshape(oh, b, n_out)                     # keep f32

        h = conv_block(x_ref[...].astype(jnp.float32), w1, a1)  # (16, B, 256)
        h = conv_block(h, w2, a2)                               # ( 8, B, 256)
        h = conv_block(h, w3, a3)                               # ( 4, B, 256)
        h = conv_block(h, w4, a4)                               # ( 2, B, 256)

        ds, bt, _ = h.shape
        lanes = o_ref.shape[1]
        acc = jnp.zeros((bt, lanes), jnp.float32)
        for i in range(ds):          # spatial row i is a contiguous slice: no selh matmul
            acc = acc + jnp.dot(h[i].astype(jnp.bfloat16), wh[i],
                                preferred_element_type=jnp.float32)
        acc = acc + bh[...]          # packed [adv | mu | logvar | 0] bias

        # Epilogue: full-width lane-masked assembly (no narrow concats/stores).
        sig = 1.0 / (1.0 + jnp.exp(-acc))                      # exact sigmoid
        mu_at_z = jnp.roll(acc, 2 * L, axis=1)                 # mu lanes -> z lanes
        lv_at_z = jnp.roll(acc, L, axis=1)                     # logvar lanes -> z lanes
        z_full = eps_ref[...] * jnp.exp(0.5 * lv_at_z) + mu_at_z   # reparameterize
        lane = jax.lax.broadcasted_iota(jnp.int32, (bt, lanes), 1)
        out = jnp.where(lane == 0, sig, acc)
        out = jnp.where((lane >= 1 + 2 * L) & (lane < 1 + 3 * L), z_full, out)
        o_ref[...] = out             # lane-dense slab [validity | mu | logvar | z | 0]

    return kernel


# ----------------------------------------------------------------------------
# Forward pass wrapper (matches Discriminator.forward semantics)
# ----------------------------------------------------------------------------
@functools.partial(jax.jit, static_argnames=("role", "b_tile"))
def discriminator_forward(kparams, img, c, eps, role="generator", b_tile=8):
    del c                                                     # unused by reference
    n, ch, hh, ww = img.shape
    latent = eps.shape[1]
    lanes = kparams["b_head"].shape[1]

    # Pad batch to a multiple of the per-grid-step tile (removes the previous
    # "params specialized to a fixed batch" hazard).
    n_pad = (-n) % b_tile
    if n_pad:
        img = jnp.pad(img, ((0, n_pad), (0, 0), (0, 0), (0, 0)))
        eps = jnp.pad(eps, ((0, n_pad), (0, 0)))
    nb = n + n_pad

    # Channels-last, spatial-row-major layout: x[h, n, w*C + c] = img[n, c, h, w].
    x = jnp.transpose(img, (2, 0, 3, 1)).reshape(hh, nb, ww * ch).astype(jnp.bfloat16)
    # eps pre-positioned at the z output lanes so the kernel writes full-width.
    eps_slab = jnp.pad(eps.astype(jnp.float32),
                       ((0, 0), (1 + 2 * latent, lanes - 1 - 3 * latent)))

    in_specs = [pl.BlockSpec((hh, b_tile, ww * ch), lambda b: (0, b, 0))]
    args = [x]
    for blk in kparams["layers"]:
        # Constant index_maps => weights stay VMEM-resident across grid steps.
        in_specs.append(pl.BlockSpec(blk["w"].shape, lambda b: (0, 0, 0)))
        in_specs.append(pl.BlockSpec(blk["aff"].shape, lambda b: (0, 0)))
        args += [blk["w"], blk["aff"]]
    in_specs += [pl.BlockSpec(kparams["w_head"].shape, lambda b: (0, 0, 0)),
                 pl.BlockSpec(kparams["b_head"].shape, lambda b: (0, 0)),
                 pl.BlockSpec((b_tile, lanes), lambda b: (b, 0))]
    args += [kparams["w_head"], kparams["b_head"], eps_slab]

    packed = pl.pallas_call(
        _make_kernel(latent),
        out_shape=jax.ShapeDtypeStruct((nb, lanes), jnp.float32),
        grid=(nb // b_tile,),
        in_specs=in_specs,
        out_specs=pl.BlockSpec((b_tile, lanes), lambda b: (b, 0)),
        compiler_params=pltpu.CompilerParams(
            dimension_semantics=("parallel",),          # v7x: split over 2 TCs
            vmem_limit_bytes=32 * 1024 * 1024),          # sized for v7x (64 MiB phys)
    )(*args)

    validity = packed[:n, 0:1]
    if role == "discriminator":
        return validity
    mu = packed[:n, 1:1 + latent]
    log_var = packed[:n, 1 + latent:1 + 2 * latent]
    z = packed[:n, 1 + 2 * latent:1 + 3 * latent]
    return validity, z, mu, log_var


# ----------------------------------------------------------------------------
# Parameters: synthetic PyTorch-layout params + one-time kernel-layout prep
# ----------------------------------------------------------------------------
def init_params(key, img_size=32, latent_dim=16, channels=3):
    """Synthetic parameters in the original PyTorch layouts."""
    chans = [channels, 16, 32, 64, 128]
    use_bn = [False, True, True, True]
    bn_eps = 0.8                     # nn.BatchNorm2d(out_filters, 0.8) -> eps=0.8
    blocks = []
    for i in range(4):
        key, k1, k2 = jax.random.split(key, 3)
        ic, oc = chans[i], chans[i + 1]
        w = 0.1 * jax.random.normal(k1, (oc, ic, 3, 3), jnp.float32)
        b = 0.05 * jax.random.normal(k2, (oc,), jnp.float32)
        if use_bn[i]:
            gamma = jnp.ones((oc,), jnp.float32)
            beta = jnp.zeros((oc,), jnp.float32)
            r_mean = jnp.zeros((oc,), jnp.float32)
            r_var = jnp.ones((oc,), jnp.float32)
            scale = gamma / jnp.sqrt(r_var + bn_eps)   # eval-mode BN folded
            shift = beta - r_mean * scale
        else:
            scale = jnp.ones((oc,), jnp.float32)
            shift = jnp.zeros((oc,), jnp.float32)
        blocks.append(dict(w=w, b=b, scale=scale, shift=shift))

    ds = img_size // 2 ** 4
    feat = 128 * ds * ds
    key, ka, kb, kc, kd, ke, kf = jax.random.split(key, 7)
    return dict(
        blocks=blocks,
        w_adv=0.05 * jax.random.normal(ka, (1, feat), jnp.float32),
        b_adv=0.05 * jax.random.normal(kb, (1,), jnp.float32),
        w_mu=0.05 * jax.random.normal(kc, (latent_dim, feat), jnp.float32),
        b_mu=0.05 * jax.random.normal(kd, (latent_dim,), jnp.float32),
        w_var=0.05 * jax.random.normal(ke, (latent_dim, feat), jnp.float32),
        b_var=0.05 * jax.random.normal(kf, (latent_dim,), jnp.float32),
    )


def _build_band(w_conv, w_in):
    """Scatter (OC, C, 3, 3) conv weights into 3 banded (W*C, OW*OC) matrices.
    The band encodes the kj taps, stride-2 horizontal downsample and L/R pad."""
    w_conv = np.asarray(w_conv)
    oc, c, _, _ = w_conv.shape
    ow = w_in // 2
    band = np.zeros((3, w_in * c, ow * oc), np.float32)
    for ki in range(3):
        for o in range(ow):
            for kj in range(3):
                iw = 2 * o + kj - 1
                if 0 <= iw < w_in:                 # out-of-range taps = zero pad
                    band[ki, iw * c:(iw + 1) * c, o * oc:(o + 1) * oc] = \
                        w_conv[:, :, ki, kj].T
    return band


def _build_head(tp, ds, oc, latent, lanes):
    """Pack adv/mu/var Linear weights (PyTorch NCHW-flatten order) into one
    lane-dense (ds, ds*oc, lanes) matrix consumed in channels-last order."""
    w_adv = np.asarray(tp["w_adv"])
    w_mu = np.asarray(tp["w_mu"])
    w_var = np.asarray(tp["w_var"])
    wh = np.zeros((ds, ds * oc, lanes), np.float32)
    for i in range(ds):
        for j in range(ds):
            for cc in range(oc):
                f = cc * (ds * ds) + i * ds + j    # PyTorch out.view(B, -1) index
                row = j * oc + cc                  # channels-last lane index
                wh[i, row, 0] = w_adv[0, f]
                wh[i, row, 1:1 + latent] = w_mu[:, f]
                wh[i, row, 1 + latent:1 + 2 * latent] = w_var[:, f]
    bh = np.zeros((1, lanes), np.float32)
    bh[0, 0] = np.asarray(tp["b_adv"])[0]
    bh[0, 1:1 + latent] = np.asarray(tp["b_mu"])
    bh[0, 1 + latent:1 + 2 * latent] = np.asarray(tp["b_var"])
    return wh, bh


def prepare_params(tparams, img_size, latent_dim, out_lanes=None):
    """One-time conversion of PyTorch-layout params into kernel operands.
    All operands are batch-independent (usable for any batch size)."""
    if out_lanes is None:
        out_lanes = max(LANES, -(-(1 + 3 * latent_dim) // 128) * 128)
    assert img_size % 16 == 0 and 1 + 3 * latent_dim <= out_lanes
    layers = []
    h = img_size
    for blk in tparams["blocks"]:
        ow = h // 2
        band = _build_band(blk["w"], h)
        aff = np.stack([np.tile(np.asarray(blk["b"]), ow),
                        np.tile(np.asarray(blk["scale"]), ow),
                        np.tile(np.asarray(blk["shift"]), ow)])
        layers.append(dict(w=jnp.asarray(band, jnp.bfloat16),
                           aff=jnp.asarray(aff, jnp.float32)))
        h = ow

    oc4 = tparams["blocks"][-1]["w"].shape[0]
    wh, bh = _build_head(tparams, h, oc4, latent_dim, out_lanes)
    return dict(layers=layers,
                w_head=jnp.asarray(wh, jnp.bfloat16),
                b_head=jnp.asarray(bh, jnp.float32))


# ----------------------------------------------------------------------------
# Pure-JAX f32 reference (same eval-mode semantics) for a sanity check
# ----------------------------------------------------------------------------
def _reference_forward(tp, img, eps):
    x = img
    for blk in tp["blocks"]:
        x = jax.lax.conv_general_dilated(
            x, blk["w"], window_strides=(2, 2), padding=((1, 1), (1, 1)),
            dimension_numbers=("NCHW", "OIHW", "NCHW"))
        x = x + blk["b"][None, :, None, None]
        x = jnp.where(x > 0, x, 0.2 * x)
        x = x * blk["scale"][None, :, None, None] + blk["shift"][None, :, None, None]
    flat = x.reshape(x.shape[0], -1)
    validity = jax.nn.sigmoid(flat @ tp["w_adv"].T + tp["b_adv"])
    mu = flat @ tp["w_mu"].T + tp["b_mu"]
    log_var = flat @ tp["w_var"].T + tp["b_var"]
    z = eps * jnp.exp(0.5 * log_var) + mu
    return validity, z, mu, log_var


if __name__ == "__main__":
    key = jax.random.PRNGKey(0)
    k_params, k_img, k_eps = jax.random.split(key, 3)

    IMG_SIZE, CHANNELS, LATENT, BATCH = 32, 3, 16, 16
    tparams = init_params(k_params, img_size=IMG_SIZE, latent_dim=LATENT,
                          channels=CHANNELS)
    kparams = prepare_params(tparams, IMG_SIZE, LATENT)

    img = jax.random.normal(k_img, (BATCH, CHANNELS, IMG_SIZE, IMG_SIZE), jnp.float32)
    c = None                       # unused by the reference forward
    # torch.randn_like(std) replaced by an explicit, deterministic eps input.
    eps = jax.random.normal(k_eps, (BATCH, LATENT), jnp.float32)

    # role == 'discriminator'
    validity = discriminator_forward(kparams, img, c, eps, role="discriminator")
    # role != 'discriminator' (encoder / generator path)
    validity2, z, mu, log_var = discriminator_forward(kparams, img, c, eps,
                                                      role="generator")
    jax.block_until_ready((validity, validity2, z, mu, log_var))

    assert validity.shape == (BATCH, 1)
    assert z.shape == mu.shape == log_var.shape == (BATCH, LATENT)

    # Sanity check vs. pure-JAX f32 reference (loose tol: bf16 MXU operands).
    rv, rz, rmu, rlv = _reference_forward(tparams, img, eps)
    for got, want in ((validity2, rv), (z, rz), (mu, rmu), (log_var, rlv)):
        np.testing.assert_allclose(np.asarray(got), np.asarray(want),
                                   rtol=8e-2, atol=8e-2)

    print("KERNEL_OK")
</pallas_src>

<mosaic_0001>
module attributes {stable_mosaic.version = 11 : i64} {
  func.func @kernel(%arg0: i32, %arg1: memref<32x8x96xbf16, #tpu.memory_space<vmem>>, %arg2: memref<3x96x256xbf16, #tpu.memory_space<vmem>>, %arg3: memref<3x256xf32, #tpu.memory_space<vmem>>, %arg4: memref<3x256x256xbf16, #tpu.memory_space<vmem>>, %arg5: memref<3x256xf32, #tpu.memory_space<vmem>>, %arg6: memref<3x256x256xbf16, #tpu.memory_space<vmem>>, %arg7: memref<3x256xf32, #tpu.memory_space<vmem>>, %arg8: memref<3x256x256xbf16, #tpu.memory_space<vmem>>, %arg9: memref<3x256xf32, #tpu.memory_space<vmem>>, %arg10: memref<2x256x128xbf16, #tpu.memory_space<vmem>>, %arg11: memref<1x128xf32, #tpu.memory_space<vmem>>, %arg12: memref<8x128xf32, #tpu.memory_space<vmem>>, %arg13: memref<8x128xf32, #tpu.memory_space<vmem>>) attributes {dimension_semantics = [#tpu.dimension_semantics<parallel>], iteration_bounds = array<i64: 2>, scalar_prefetch = 0 : i64, scratch_operands = 0 : i64, tpu.core_type = #tpu.core_type<tc>, window_params = [{transform_indices = @transform_0, window_bounds = array<i64: 32, 8, 96>}, {pipeline_mode = #tpu.pipeline_mode<synchronous>, transform_indices = @transform_1, window_bounds = array<i64: 3, 96, 256>}, {pipeline_mode = #tpu.pipeline_mode<synchronous>, transform_indices = @transform_2, window_bounds = array<i64: 3, 256>}, {pipeline_mode = #tpu.pipeline_mode<synchronous>, transform_indices = @transform_3, window_bounds = array<i64: 3, 256, 256>}, {pipeline_mode = #tpu.pipeline_mode<synchronous>, transform_indices = @transform_4, window_bounds = array<i64: 3, 256>}, {pipeline_mode = #tpu.pipeline_mode<synchronous>, transform_indices = @transform_5, window_bounds = array<i64: 3, 256, 256>}, {pipeline_mode = #tpu.pipeline_mode<synchronous>, transform_indices = @transform_6, window_bounds = array<i64: 3, 256>}, {pipeline_mode = #tpu.pipeline_mode<synchronous>, transform_indices = @transform_7, window_bounds = array<i64: 3, 256, 256>}, {pipeline_mode = #tpu.pipeline_mode<synchronous>, transform_indices = @transform_8, window_bounds = array<i64: 3, 256>}, {pipeline_mode = #tpu.pipeline_mode<synchronous>, transform_indices = @transform_9, window_bounds = array<i64: 2, 256, 128>}, {pipeline_mode = #tpu.pipeline_mode<synchronous>, transform_indices = @transform_10, window_bounds = array<i64: 1, 128>}, {transform_indices = @transform_11, window_bounds = array<i64: 8, 128>}, {transform_indices = @transform_12, window_bounds = array<i64: 8, 128>}]} {
    %c0 = arith.constant 0 : index
    %c0_0 = arith.constant 0 : index
    %c0_1 = arith.constant 0 : index
    %0 = vector.load %arg1[%c0, %c0_0, %c0_1] : memref<32x8x96xbf16, #tpu.memory_space<vmem>>, vector<32x8x96xbf16>
    %1 = arith.extf %0 : vector<32x8x96xbf16> to vector<32x8x96xf32>
    %2 = vector.shape_cast %1 : vector<32x8x96xf32> to vector<16x16x96xf32>
    %3 = vector.extract_strided_slice %2 {offsets = [0, 0, 0], sizes = [16, 8, 96], strides = [1, 1, 1]} : vector<16x16x96xf32> to vector<16x8x96xf32>
    %4 = vector.extract_strided_slice %2 {offsets = [0, 8, 0], sizes = [16, 8, 96], strides = [1, 1, 1]} : vector<16x16x96xf32> to vector<16x8x96xf32>
    %cst = arith.constant 0.000000e+00 : f32
    %5 = vector.broadcast %cst : f32 to vector<1x8x96xf32>
    %6 = vector.extract_strided_slice %4 {offsets = [0, 0, 0], sizes = [15, 8, 96], strides = [1, 1, 1]} : vector<16x8x96xf32> to vector<15x8x96xf32>
    %7 = tpu.concatenate %5, %6 in 0 : vector<1x8x96xf32>, vector<15x8x96xf32> -> vector<16x8x96xf32>
    %cst_2 = arith.constant 0.000000e+00 : f32
    %8 = vector.broadcast %cst_2 : f32 to vector<128x256xf32>
    %9 = vector.shape_cast %7 : vector<16x8x96xf32> to vector<128x96xf32>
    %10 = arith.truncf %9 : vector<128x96xf32> to vector<128x96xbf16>
    %c0_3 = arith.constant 0 : index
    %c0_4 = arith.constant 0 : index
    %c0_5 = arith.constant 0 : index
    %11 = vector.load %arg2[%c0_3, %c0_4, %c0_5] : memref<3x96x256xbf16, #tpu.memory_space<vmem>>, vector<1x96x256xbf16>
    %12 = vector.shape_cast %11 : vector<1x96x256xbf16> to vector<96x256xbf16>
    %cst_6 = arith.constant dense<0.000000e+00> : vector<128x256xf32>
    %13 = tpu.matmul %10, %12, %cst_6 {dimension_numbers = #tpu.dot_dimension_numbers<[1], [0], [0], [1], [0, 0, 1, 1], [], []>} : vector<128x96xbf16>, vector<96x256xbf16>, vector<128x256xf32> -> vector<128x256xf32>
    %14 = arith.addf %8, %13 : vector<128x256xf32>
    %15 = vector.shape_cast %3 : vector<16x8x96xf32> to vector<128x96xf32>
    %16 = arith.truncf %15 : vector<128x96xf32> to vector<128x96xbf16>
    %c1 = arith.constant 1 : index
    %c0_7 = arith.constant 0 : index
    %c0_8 = arith.constant 0 : index
    %17 = vector.load %arg2[%c1, %c0_7, %c0_8] : memref<3x96x256xbf16, #tpu.memory_space<vmem>>, vector<1x96x256xbf16>
    %18 = vector.shape_cast %17 : vector<1x96x256xbf16> to vector<96x256xbf16>
    %cst_9 = arith.constant dense<0.000000e+00> : vector<128x256xf32>
    %19 = tpu.matmul %16, %18, %cst_9 {dimension_numbers = #tpu.dot_dimension_numbers<[1], [0], [0], [1], [0, 0, 1, 1], [], []>} : vector<128x96xbf16>, vector<96x256xbf16>, vector<128x256xf32> -> vector<128x256xf32>
    %20 = arith.addf %14, %19 : vector<128x256xf32>
    %21 = vector.shape_cast %4 : vector<16x8x96xf32> to vector<128x96xf32>
    %22 = arith.truncf %21 : vector<128x96xf32> to vector<128x96xbf16>
    %c2 = arith.constant 2 : index
    %c0_10 = arith.constant 0 : index
    %c0_11 = arith.constant 0 : index
    %23 = vector.load %arg2[%c2, %c0_10, %c0_11] : memref<3x96x256xbf16, #tpu.memory_space<vmem>>, vector<1x96x256xbf16>
    %24 = vector.shape_cast %23 : vector<1x96x256xbf16> to vector<96x256xbf16>
    %cst_12 = arith.constant dense<0.000000e+00> : vector<128x256xf32>
    %25 = tpu.matmul %22, %24, %cst_12 {dimension_numbers = #tpu.dot_dimension_numbers<[1], [0], [0], [1], [0, 0, 1, 1], [], []>} : vector<128x96xbf16>, vector<96x256xbf16>, vector<128x256xf32> -> vector<128x256xf32>
    %26 = arith.addf %20, %25 : vector<128x256xf32>
    %c0_13 = arith.constant 0 : index
    %c0_14 = arith.constant 0 : index
    %27 = vector.load %arg3[%c0_13, %c0_14] : memref<3x256xf32, #tpu.memory_space<vmem>>, vector<3x256xf32>
    %28 = vector.extract_strided_slice %27 {offsets = [0, 0], sizes = [1, 256], strides = [1, 1]} : vector<3x256xf32> to vector<1x256xf32>
    %29 = vector.broadcast %28 : vector<1x256xf32> to vector<128x256xf32>
    %30 = arith.addf %26, %29 : vector<128x256xf32>
    %cst_15 = arith.constant 0.000000e+00 : f32
    %31 = vector.broadcast %cst_15 : f32 to vector<128x256xf32>
    %32 = arith.cmpf ogt, %30, %31 : vector<128x256xf32>
    %cst_16 = arith.constant 2.000000e-01 : f32
    %33 = vector.broadcast %cst_16 : f32 to vector<128x256xf32>
    %34 = arith.mulf %33, %30 : vector<128x256xf32>
    %35 = arith.select %32, %30, %34 : vector<128x256xi1>, vector<128x256xf32>
    %36 = vector.extract_strided_slice %27 {offsets = [1, 0], sizes = [1, 256], strides = [1, 1]} : vector<3x256xf32> to vector<1x256xf32>
    %37 = vector.broadcast %36 : vector<1x256xf32> to vector<128x256xf32>
    %38 = arith.mulf %35, %37 : vector<128x256xf32>
    %39 = vector.extract_strided_slice %27 {offsets = [2, 0], sizes = [1, 256], strides = [1, 1]} : vector<3x256xf32> to vector<1x256xf32>
    %40 = vector.broadcast %39 : vector<1x256xf32> to vector<128x256xf32>
    %41 = arith.addf %38, %40 : vector<128x256xf32>
    %42 = vector.shape_cast %41 : vector<128x256xf32> to vector<16x8x256xf32>
    %43 = vector.shape_cast %42 : vector<16x8x256xf32> to vector<8x16x256xf32>
    %44 = vector.extract_strided_slice %43 {offsets = [0, 0, 0], sizes = [8, 8, 256], strides = [1, 1, 1]} : vector<8x16x256xf32> to vector<8x8x256xf32>
    %45 = vector.extract_strided_slice %43 {offsets = [0, 8, 0], sizes = [8, 8, 256], strides = [1, 1, 1]} : vector<8x16x256xf32> to vector<8x8x256xf32>
    %cst_17 = arith.constant 0.000000e+00 : f32
    %46 = vector.broadcast %cst_17 : f32 to vector<1x8x256xf32>
    %47 = vector.extract_strided_slice %45 {offsets = [0, 0, 0], sizes = [7, 8, 256], strides = [1, 1, 1]} : vector<8x8x256xf32> to vector<7x8x256xf32>
    %48 = tpu.concatenate %46, %47 in 0 : vector<1x8x256xf32>, vector<7x8x256xf32> -> vector<8x8x256xf32>
    %cst_18 = arith.constant 0.000000e+00 : f32
    %49 = vector.broadcast %cst_18 : f32 to vector<64x256xf32>
    %50 = vector.shape_cast %48 : vector<8x8x256xf32> to vector<64x256xf32>
    %51 = arith.truncf %50 : vector<64x256xf32> to vector<64x256xbf16>
    %c0_19 = arith.constant 0 : index
    %c0_20 = arith.constant 0 : index
    %c0_21 = arith.constant 0 : index
    %52 = vector.load %arg4[%c0_19, %c0_20, %c0_21] : memref<3x256x256xbf16, #tpu.memory_space<vmem>>, vector<1x256x256xbf16>
    %53 = vector.shape_cast %52 : vector<1x256x256xbf16> to vector<256x256xbf16>
    %cst_22 = arith.constant dense<0.000000e+00> : vector<64x256xf32>
    %54 = tpu.matmul %51, %53, %cst_22 {dimension_numbers = #tpu.dot_dimension_numbers<[1], [0], [0], [1], [0, 0, 1, 1], [], []>} : vector<64x256xbf16>, vector<256x256xbf16>, vector<64x256xf32> -> vector<64x256xf32>
    %55 = arith.addf %49, %54 : vector<64x256xf32>
    %56 = vector.shape_cast %44 : vector<8x8x256xf32> to vector<64x256xf32>
    %57 = arith.truncf %56 : vector<64x256xf32> to vector<64x256xbf16>
    %c1_23 = arith.constant 1 : index
    %c0_24 = arith.constant 0 : index
    %c0_25 = arith.constant 0 : index
    %58 = vector.load %arg4[%c1_23, %c0_24, %c0_25] : memref<3x256x256xbf16, #tpu.memory_space<vmem>>, vector<1x256x256xbf16>
    %59 = vector.shape_cast %58 : vector<1x256x256xbf16> to vector<256x256xbf16>
    %cst_26 = arith.constant dense<0.000000e+00> : vector<64x256xf32>
    %60 = tpu.matmul %57, %59, %cst_26 {dimension_numbers = #tpu.dot_dimension_numbers<[1], [0], [0], [1], [0, 0, 1, 1], [], []>} : vector<64x256xbf16>, vector<256x256xbf16>, vector<64x256xf32> -> vector<64x256xf32>
    %61 = arith.addf %55, %60 : vector<64x256xf32>
    %62 = vector.shape_cast %45 : vector<8x8x256xf32> to vector<64x256xf32>
    %63 = arith.truncf %62 : vector<64x256xf32> to vector<64x256xbf16>
    %c2_27 = arith.constant 2 : index
    %c0_28 = arith.constant 0 : index
    %c0_29 = arith.constant 0 : index
    %64 = vector.load %arg4[%c2_27, %c0_28, %c0_29] : memref<3x256x256xbf16, #tpu.memory_space<vmem>>, vector<1x256x256xbf16>
    %65 = vector.shape_cast %64 : vector<1x256x256xbf16> to vector<256x256xbf16>
    %cst_30 = arith.constant dense<0.000000e+00> : vector<64x256xf32>
    %66 = tpu.matmul %63, %65, %cst_30 {dimension_numbers = #tpu.dot_dimension_numbers<[1], [0], [0], [1], [0, 0, 1, 1], [], []>} : vector<64x256xbf16>, vector<256x256xbf16>, vector<64x256xf32> -> vector<64x256xf32>
    %67 = arith.addf %61, %66 : vector<64x256xf32>
    %c0_31 = arith.constant 0 : index
    %c0_32 = arith.constant 0 : index
    %68 = vector.load %arg5[%c0_31, %c0_32] : memref<3x256xf32, #tpu.memory_space<vmem>>, vector<3x256xf32>
    %69 = vector.extract_strided_slice %68 {offsets = [0, 0], sizes = [1, 256], strides = [1, 1]} : vector<3x256xf32> to vector<1x256xf32>
    %70 = vector.broadcast %69 : vector<1x256xf32> to vector<64x256xf32>
    %71 = arith.addf %67, %70 : vector<64x256xf32>
    %cst_33 = arith.constant 0.000000e+00 : f32
    %72 = vector.broadcast %cst_33 : f32 to vector<64x256xf32>
    %73 = arith.cmpf ogt, %71, %72 : vector<64x256xf32>
    %cst_34 = arith.constant 2.000000e-01 : f32
    %74 = vector.broadcast %cst_34 : f32 to vector<64x256xf32>
    %75 = arith.mulf %74, %71 : vector<64x256xf32>
    %76 = arith.select %73, %71, %75 : vector<64x256xi1>, vector<64x256xf32>
    %77 = vector.extract_strided_slice %68 {offsets = [1, 0], sizes = [1, 256], strides = [1, 1]} : vector<3x256xf32> to vector<1x256xf32>
    %78 = vector.broadcast %77 : vector<1x256xf32> to vector<64x256xf32>
    %79 = arith.mulf %76, %78 : vector<64x256xf32>
    %80 = vector.extract_strided_slice %68 {offsets = [2, 0], sizes = [1, 256], strides = [1, 1]} : vector<3x256xf32> to vector<1x256xf32>
    %81 = vector.broadcast %80 : vector<1x256xf32> to vector<64x256xf32>
    %82 = arith.addf %79, %81 : vector<64x256xf32>
    %83 = vector.shape_cast %82 : vector<64x256xf32> to vector<8x8x256xf32>
    %84 = vector.shape_cast %83 : vector<8x8x256xf32> to vector<4x16x256xf32>
    %85 = vector.extract_strided_slice %84 {offsets = [0, 0, 0], sizes = [4, 8, 256], strides = [1, 1, 1]} : vector<4x16x256xf32> to vector<4x8x256xf32>
    %86 = vector.extract_strided_slice %84 {offsets = [0, 8, 0], sizes = [4, 8, 256], strides = [1, 1, 1]} : vector<4x16x256xf32> to vector<4x8x256xf32>
    %cst_35 = arith.constant 0.000000e+00 : f32
    %87 = vector.broadcast %cst_35 : f32 to vector<1x8x256xf32>
    %88 = vector.extract_strided_slice %86 {offsets = [0, 0, 0], sizes = [3, 8, 256], strides = [1, 1, 1]} : vector<4x8x256xf32> to vector<3x8x256xf32>
    %89 = tpu.concatenate %87, %88 in 0 : vector<1x8x256xf32>, vector<3x8x256xf32> -> vector<4x8x256xf32>
    %cst_36 = arith.constant 0.000000e+00 : f32
    %90 = vector.broadcast %cst_36 : f32 to vector<32x256xf32>
    %91 = vector.shape_cast %89 : vector<4x8x256xf32> to vector<32x256xf32>
    %92 = arith.truncf %91 : vector<32x256xf32> to vector<32x256xbf16>
    %c0_37 = arith.constant 0 : index
    %c0_38 = arith.constant 0 : index
    %c0_39 = arith.constant 0 : index
    %93 = vector.load %arg6[%c0_37, %c0_38, %c0_39] : memref<3x256x256xbf16, #tpu.memory_space<vmem>>, vector<1x256x256xbf16>
    %94 = vector.shape_cast %93 : vector<1x256x256xbf16> to vector<256x256xbf16>
    %cst_40 = arith.constant dense<0.000000e+00> : vector<32x256xf32>
    %95 = tpu.matmul %92, %94, %cst_40 {dimension_numbers = #tpu.dot_dimension_numbers<[1], [0], [0], [1], [0, 0, 1, 1], [], []>} : vector<32x256xbf16>, vector<256x256xbf16>, vector<32x256xf32> -> vector<32x256xf32>
    %96 = arith.addf %90, %95 : vector<32x256xf32>
    %97 = vector.shape_cast %85 : vector<4x8x256xf32> to vector<32x256xf32>
    %98 = arith.truncf %97 : vector<32x256xf32> to vector<32x256xbf16>
    %c1_41 = arith.constant 1 : index
    %c0_42 = arith.constant 0 : index
    %c0_43 = arith.constant 0 : index
    %99 = vector.load %arg6[%c1_41, %c0_42, %c0_43] : memref<3x256x256xbf16, #tpu.memory_space<vmem>>, vector<1x256x256xbf16>
    %100 = vector.shape_cast %99 : vector<1x256x256xbf16> to vector<256x256xbf16>
    %cst_44 = arith.constant dense<0.000000e+00> : vector<32x256xf32>
    %101 = tpu.matmul %98, %100, %cst_44 {dimension_numbers = #tpu.dot_dimension_numbers<[1], [0], [0], [1], [0, 0, 1, 1], [], []>} : vector<32x256xbf16>, vector<256x256xbf16>, vector<32x256xf32> -> vector<32x256xf32>
    %102 = arith.addf %96, %101 : vector<32x256xf32>
    %103 = vector.shape_cast %86 : vector<4x8x256xf32> to vector<32x256xf32>
    %104 = arith.truncf %103 : vector<32x256xf32> to vector<32x256xbf16>
    %c2_45 = arith.constant 2 : index
    %c0_46 = arith.constant 0 : index
    %c0_47 = arith.constant 0 : index
    %105 = vector.load %arg6[%c2_45, %c0_46, %c0_47] : memref<3x256x256xbf16, #tpu.memory_space<vmem>>, vector<1x256x256xbf16>
    %106 = vector.shape_cast %105 : vector<1x256x256xbf16> to vector<256x256xbf16>
    %cst_48 = arith.constant dense<0.000000e+00> : vector<32x256xf32>
    %107 = tpu.matmul %104, %106, %cst_48 {dimension_numbers = #tpu.dot_dimension_numbers<[1], [0], [0], [1], [0, 0, 1, 1], [], []>} : vector<32x256xbf16>, vector<256x256xbf16>, vector<32x256xf32> -> vector<32x256xf32>
    %108 = arith.addf %102, %107 : vector<32x256xf32>
    %c0_49 = arith.constant 0 : index
    %c0_50 = arith.constant 0 : index
    %109 = vector.load %arg7[%c0_49, %c0_50] : memref<3x256xf32, #tpu.memory_space<vmem>>, vector<3x256xf32>
    %110 = vector.extract_strided_slice %109 {offsets = [0, 0], sizes = [1, 256], strides = [1, 1]} : vector<3x256xf32> to vector<1x256xf32>
    %111 = vector.broadcast %110 : vector<1x256xf32> to vector<32x256xf32>
    %112 = arith.addf %108, %111 : vector<32x256xf32>
    %cst_51 = arith.constant 0.000000e+00 : f32
    %113 = vector.broadcast %cst_51 : f32 to vector<32x256xf32>
    %114 = arith.cmpf ogt, %112, %113 : vector<32x256xf32>
    %cst_52 = arith.constant 2.000000e-01 : f32
    %115 = vector.broadcast %cst_52 : f32 to vector<32x256xf32>
    %116 = arith.mulf %115, %112 : vector<32x256xf32>
    %117 = arith.select %114, %112, %116 : vector<32x256xi1>, vector<32x256xf32>
    %118 = vector.extract_strided_slice %109 {offsets = [1, 0], sizes = [1, 256], strides = [1, 1]} : vector<3x256xf32> to vector<1x256xf32>
    %119 = vector.broadcast %118 : vector<1x256xf32> to vector<32x256xf32>
    %120 = arith.mulf %117, %119 : vector<32x256xf32>
    %121 = vector.extract_strided_slice %109 {offsets = [2, 0], sizes = [1, 256], strides = [1, 1]} : vector<3x256xf32> to vector<1x256xf32>
    %122 = vector.broadcast %121 : vector<1x256xf32> to vector<32x256xf32>
    %123 = arith.addf %120, %122 : vector<32x256xf32>
    %124 = vector.shape_cast %123 : vector<32x256xf32> to vector<4x8x256xf32>
    %125 = vector.shape_cast %124 : vector<4x8x256xf32> to vector<2x16x256xf32>
    %126 = vector.extract_strided_slice %125 {offsets = [0, 0, 0], sizes = [2, 8, 256], strides = [1, 1, 1]} : vector<2x16x256xf32> to vector<2x8x256xf32>
    %127 = vector.extract_strided_slice %125 {offsets = [0, 8, 0], sizes = [2, 8, 256], strides = [1, 1, 1]} : vector<2x16x256xf32> to vector<2x8x256xf32>
    %cst_53 = arith.constant 0.000000e+00 : f32
    %128 = vector.broadcast %cst_53 : f32 to vector<1x8x256xf32>
    %129 = vector.extract_strided_slice %127 {offsets = [0, 0, 0], sizes = [1, 8, 256], strides = [1, 1, 1]} : vector<2x8x256xf32> to vector<1x8x256xf32>
    %130 = tpu.concatenate %128, %129 in 0 : vector<1x8x256xf32>, vector<1x8x256xf32> -> vector<2x8x256xf32>
    %cst_54 = arith.constant 0.000000e+00 : f32
    %131 = vector.broadcast %cst_54 : f32 to vector<16x256xf32>
    %132 = vector.shape_cast %130 : vector<2x8x256xf32> to vector<16x256xf32>
    %133 = arith.truncf %132 : vector<16x256xf32> to vector<16x256xbf16>
    %c0_55 = arith.constant 0 : index
    %c0_56 = arith.constant 0 : index
    %c0_57 = arith.constant 0 : index
    %134 = vector.load %arg8[%c0_55, %c0_56, %c0_57] : memref<3x256x256xbf16, #tpu.memory_space<vmem>>, vector<1x256x256xbf16>
    %135 = vector.shape_cast %134 : vector<1x256x256xbf16> to vector<256x256xbf16>
    %cst_58 = arith.constant dense<0.000000e+00> : vector<16x256xf32>
    %136 = tpu.matmul %133, %135, %cst_58 {dimension_numbers = #tpu.dot_dimension_numbers<[1], [0], [0], [1], [0, 0, 1, 1], [], []>} : vector<16x256xbf16>, vector<256x256xbf16>, vector<16x256xf32> -> vector<16x256xf32>
    %137 = arith.addf %131, %136 : vector<16x256xf32>
    %138 = vector.shape_cast %126 : vector<2x8x256xf32> to vector<16x256xf32>
    %139 = arith.truncf %138 : vector<16x256xf32> to vector<16x256xbf16>
    %c1_59 = arith.constant 1 : index
    %c0_60 = arith.constant 0 : index
    %c0_61 = arith.constant 0 : index
    %140 = vector.load %arg8[%c1_59, %c0_60, %c0_61] : memref<3x256x256xbf16, #tpu.memory_space<vmem>>, vector<1x256x256xbf16>
    %141 = vector.shape_cast %140 : vector<1x256x256xbf16> to vector<256x256xbf16>
    %cst_62 = arith.constant dense<0.000000e+00> : vector<16x256xf32>
    %142 = tpu.matmul %139, %141, %cst_62 {dimension_numbers = #tpu.dot_dimension_numbers<[1], [0], [0], [1], [0, 0, 1, 1], [], []>} : vector<16x256xbf16>, vector<256x256xbf16>, vector<16x256xf32> -> vector<16x256xf32>
    %143 = arith.addf %137, %142 : vector<16x256xf32>
    %144 = vector.shape_cast %127 : vector<2x8x256xf32> to vector<16x256xf32>
    %145 = arith.truncf %144 : vector<16x256xf32> to vector<16x256xbf16>
    %c2_63 = arith.constant 2 : index
    %c0_64 = arith.constant 0 : index
    %c0_65 = arith.constant 0 : index
    %146 = vector.load %arg8[%c2_63, %c0_64, %c0_65] : memref<3x256x256xbf16, #tpu.memory_space<vmem>>, vector<1x256x256xbf16>
    %147 = vector.shape_cast %146 : vector<1x256x256xbf16> to vector<256x256xbf16>
    %cst_66 = arith.constant dense<0.000000e+00> : vector<16x256xf32>
    %148 = tpu.matmul %145, %147, %cst_66 {dimension_numbers = #tpu.dot_dimension_numbers<[1], [0], [0], [1], [0, 0, 1, 1], [], []>} : vector<16x256xbf16>, vector<256x256xbf16>, vector<16x256xf32> -> vector<16x256xf32>
    %149 = arith.addf %143, %148 : vector<16x256xf32>
    %c0_67 = arith.constant 0 : index
    %c0_68 = arith.constant 0 : index
    %150 = vector.load %arg9[%c0_67, %c0_68] : memref<3x256xf32, #tpu.memory_space<vmem>>, vector<3x256xf32>
    %151 = vector.extract_strided_slice %150 {offsets = [0, 0], sizes = [1, 256], strides = [1, 1]} : vector<3x256xf32> to vector<1x256xf32>
    %152 = vector.broadcast %151 : vector<1x256xf32> to vector<16x256xf32>
    %153 = arith.addf %149, %152 : vector<16x256xf32>
    %cst_69 = arith.constant 0.000000e+00 : f32
    %154 = vector.broadcast %cst_69 : f32 to vector<16x256xf32>
    %155 = arith.cmpf ogt, %153, %154 : vector<16x256xf32>
    %cst_70 = arith.constant 2.000000e-01 : f32
    %156 = vector.broadcast %cst_70 : f32 to vector<16x256xf32>
    %157 = arith.mulf %156, %153 : vector<16x256xf32>
    %158 = arith.select %155, %153, %157 : vector<16x256xi1>, vector<16x256xf32>
    %159 = vector.extract_strided_slice %150 {offsets = [1, 0], sizes = [1, 256], strides = [1, 1]} : vector<3x256xf32> to vector<1x256xf32>
    %160 = vector.broadcast %159 : vector<1x256xf32> to vector<16x256xf32>
    %161 = arith.mulf %158, %160 : vector<16x256xf32>
    %162 = vector.extract_strided_slice %150 {offsets = [2, 0], sizes = [1, 256], strides = [1, 1]} : vector<3x256xf32> to vector<1x256xf32>
    %163 = vector.broadcast %162 : vector<1x256xf32> to vector<16x256xf32>
    %164 = arith.addf %161, %163 : vector<16x256xf32>
    %165 = vector.shape_cast %164 : vector<16x256xf32> to vector<2x8x256xf32>
    %cst_71 = arith.constant 0.000000e+00 : f32
    %166 = vector.broadcast %cst_71 : f32 to vector<8x128xf32>
    %167 = vector.extract_strided_slice %165 {offsets = [0, 0, 0], sizes = [1, 8, 256], strides = [1, 1, 1]} : vector<2x8x256xf32> to vector<1x8x256xf32>
    %168 = vector.shape_cast %167 : vector<1x8x256xf32> to vector<8x256xf32>
    %169 = arith.truncf %168 : vector<8x256xf32> to vector<8x256xbf16>
    %c0_72 = arith.constant 0 : index
    %c0_73 = arith.constant 0 : index
    %c0_74 = arith.constant 0 : index
    %170 = vector.load %arg10[%c0_72, %c0_73, %c0_74] : memref<2x256x128xbf16, #tpu.memory_space<vmem>>, vector<1x256x128xbf16>
    %171 = vector.shape_cast %170 : vector<1x256x128xbf16> to vector<256x128xbf16>
    %cst_75 = arith.constant dense<0.000000e+00> : vector<8x128xf32>
    %172 = tpu.matmul %169, %171, %cst_75 {dimension_numbers = #tpu.dot_dimension_numbers<[1], [0], [0], [1], [0, 0, 1, 1], [], []>} : vector<8x256xbf16>, vector<256x128xbf16>, vector<8x128xf32> -> vector<8x128xf32>
    %173 = arith.addf %166, %172 : vector<8x128xf32>
    %174 = vector.extract_strided_slice %165 {offsets = [1, 0, 0], sizes = [1, 8, 256], strides = [1, 1, 1]} : vector<2x8x256xf32> to vector<1x8x256xf32>
    %175 = vector.shape_cast %174 : vector<1x8x256xf32> to vector<8x256xf32>
    %176 = arith.truncf %175 : vector<8x256xf32> to vector<8x256xbf16>
    %c1_76 = arith.constant 1 : index
    %c0_77 = arith.constant 0 : index
    %c0_78 = arith.constant 0 : index
    %177 = vector.load %arg10[%c1_76, %c0_77, %c0_78] : memref<2x256x128xbf16, #tpu.memory_space<vmem>>, vector<1x256x128xbf16>
    %178 = vector.shape_cast %177 : vector<1x256x128xbf16> to vector<256x128xbf16>
    %cst_79 = arith.constant dense<0.000000e+00> : vector<8x128xf32>
    %179 = tpu.matmul %176, %178, %cst_79 {dimension_numbers = #tpu.dot_dimension_numbers<[1], [0], [0], [1], [0, 0, 1, 1], [], []>} : vector<8x256xbf16>, vector<256x128xbf16>, vector<8x128xf32> -> vector<8x128xf32>
    %180 = arith.addf %173, %179 : vector<8x128xf32>
    %c0_80 = arith.constant 0 : index
    %c0_81 = arith.constant 0 : index
    %181 = vector.load %arg11[%c0_80, %c0_81] : memref<1x128xf32, #tpu.memory_space<vmem>>, vector<1x128xf32>
    %182 = vector.broadcast %181 : vector<1x128xf32> to vector<8x128xf32>
    %183 = arith.addf %180, %182 : vector<8x128xf32>
    %cst_82 = arith.constant 0.000000e+00 : f32
    %184 = vector.broadcast %cst_82 : f32 to vector<8x128xf32>
    %185 = arith.subf %184, %183 : vector<8x128xf32>
    %186 = math.exp %185 : vector<8x128xf32>
    %cst_83 = arith.constant 1.000000e+00 : f32
    %187 = vector.broadcast %cst_83 : f32 to vector<8x128xf32>
    %188 = arith.addf %187, %186 : vector<8x128xf32>
    %cst_84 = arith.constant 1.000000e+00 : f32
    %189 = vector.broadcast %cst_84 : f32 to vector<8x128xf32>
    %190 = arith.divf %189, %188 : vector<8x128xf32>
    %191 = vector.extract_strided_slice %183 {offsets = [0, 96], sizes = [8, 32], strides = [1, 1]} : vector<8x128xf32> to vector<8x32xf32>
    %192 = vector.extract_strided_slice %183 {offsets = [0, 0], sizes = [8, 96], strides = [1, 1]} : vector<8x128xf32> to vector<8x96xf32>
    %193 = tpu.concatenate %191, %192 in 1 : vector<8x32xf32>, vector<8x96xf32> -> vector<8x128xf32>
    %194 = vector.extract_strided_slice %183 {offsets = [0, 112], sizes = [8, 16], strides = [1, 1]} : vector<8x128xf32> to vector<8x16xf32>
    %195 = vector.extract_strided_slice %183 {offsets = [0, 0], sizes = [8, 112], strides = [1, 1]} : vector<8x128xf32> to vector<8x112xf32>
    %196 = tpu.concatenate %194, %195 in 1 : vector<8x16xf32>, vector<8x112xf32> -> vector<8x128xf32>
    %c0_85 = arith.constant 0 : index
    %c0_86 = arith.constant 0 : index
    %197 = vector.load %arg12[%c0_85, %c0_86] : memref<8x128xf32, #tpu.memory_space<vmem>>, vector<8x128xf32>
    %cst_87 = arith.constant 5.000000e-01 : f32
    %198 = vector.broadcast %cst_87 : f32 to vector<8x128xf32>
    %199 = arith.mulf %198, %196 : vector<8x128xf32>
    %200 = math.exp %199 : vector<8x128xf32>
    %201 = arith.mulf %197, %200 : vector<8x128xf32>
    %202 = arith.addf %201, %193 : vector<8x128xf32>
    %203 = tpu.iota {dimensions = array<i32: 1>} : vector<8x128xi32>
    %c0_i32 = arith.constant 0 : i32
    %204 = vector.broadcast %c0_i32 : i32 to vector<8x128xi32>
    %205 = arith.cmpi eq, %203, %204 : vector<8x128xi32>
    %206 = arith.select %205, %190, %183 : vector<8x128xi1>, vector<8x128xf32>
    %c33_i32 = arith.constant 33 : i32
    %207 = vector.broadcast %c33_i32 : i32 to vector<8x128xi32>
    %208 = arith.cmpi sge, %203, %207 : vector<8x128xi32>
    %c49_i32 = arith.constant 49 : i32
    %209 = vector.broadcast %c49_i32 : i32 to vector<8x128xi32>
    %210 = arith.cmpi slt, %203, %209 : vector<8x128xi32>
    %211 = arith.andi %208, %210 : vector<8x128xi1>
    %212 = arith.select %211, %202, %206 : vector<8x128xi1>, vector<8x128xf32>
    %c0_88 = arith.constant 0 : index
    %c0_89 = arith.constant 0 : index
    %213 = vector.load %arg13[%c0_88, %c0_89] : memref<8x128xf32, #tpu.memory_space<vmem>>, vector<8x128xf32>
    tpu.vector_store %arg13[%c0_88, %c0_89], %212 {strides = array<i32>} : memref<8x128xf32, #tpu.memory_space<vmem>>, vector<8x128xf32>,
    return
  }
  func.func @transform_0(%arg0: i32) -> (i32, i32, i32) {
    %c0_i32 = arith.constant 0 : i32
    %c0_i32_0 = arith.constant 0 : i32
    %c0_i32_1 = arith.constant 0 : i32
    return %c0_i32, %arg0, %c0_i32_0 : i32, i32, i32
  }
  func.func @transform_1(%arg0: i32) -> (i32, i32, i32) {
    %c0_i32 = arith.constant 0 : i32
    %c0_i32_0 = arith.constant 0 : i32
    %c0_i32_1 = arith.constant 0 : i32
    %c0_i32_2 = arith.constant 0 : i32
    return %c0_i32, %c0_i32_0, %c0_i32_1 : i32, i32, i32
  }
  func.func @transform_2(%arg0: i32) -> (i32, i32) {
    %c0_i32 = arith.constant 0 : i32
    %c0_i32_0 = arith.constant 0 : i32
    %c0_i32_1 = arith.constant 0 : i32
    return %c0_i32, %c0_i32_0 : i32, i32
  }
  func.func @transform_3(%arg0: i32) -> (i32, i32, i32) {
    %c0_i32 = arith.constant 0 : i32
    %c0_i32_0 = arith.constant 0 : i32
    %c0_i32_1 = arith.constant 0 : i32
    %c0_i32_2 = arith.constant 0 : i32
    return %c0_i32, %c0_i32_0, %c0_i32_1 : i32, i32, i32
  }
  func.func @transform_4(%arg0: i32) -> (i32, i32) {
    %c0_i32 = arith.constant 0 : i32
    %c0_i32_0 = arith.constant 0 : i32
    %c0_i32_1 = arith.constant 0 : i32
    return %c0_i32, %c0_i32_0 : i32, i32
  }
  func.func @transform_5(%arg0: i32) -> (i32, i32, i32) {
    %c0_i32 = arith.constant 0 : i32
    %c0_i32_0 = arith.constant 0 : i32
    %c0_i32_1 = arith.constant 0 : i32
    %c0_i32_2 = arith.constant 0 : i32
    return %c0_i32, %c0_i32_0, %c0_i32_1 : i32, i32, i32
  }
  func.func @transform_6(%arg0: i32) -> (i32, i32) {
    %c0_i32 = arith.constant 0 : i32
    %c0_i32_0 = arith.constant 0 : i32
    %c0_i32_1 = arith.constant 0 : i32
    return %c0_i32, %c0_i32_0 : i32, i32
  }
  func.func @transform_7(%arg0: i32) -> (i32, i32, i32) {
    %c0_i32 = arith.constant 0 : i32
    %c0_i32_0 = arith.constant 0 : i32
    %c0_i32_1 = arith.constant 0 : i32
    %c0_i32_2 = arith.constant 0 : i32
    return %c0_i32, %c0_i32_0, %c0_i32_1 : i32, i32, i32
  }
  func.func @transform_8(%arg0: i32) -> (i32, i32) {
    %c0_i32 = arith.constant 0 : i32
    %c0_i32_0 = arith.constant 0 : i32
    %c0_i32_1 = arith.constant 0 : i32
    return %c0_i32, %c0_i32_0 : i32, i32
  }
  func.func @transform_9(%arg0: i32) -> (i32, i32, i32) {
    %c0_i32 = arith.constant 0 : i32
    %c0_i32_0 = arith.constant 0 : i32
    %c0_i32_1 = arith.constant 0 : i32
    %c0_i32_2 = arith.constant 0 : i32
    return %c0_i32, %c0_i32_0, %c0_i32_1 : i32, i32, i32
  }
  func.func @transform_10(%arg0: i32) -> (i32, i32) {
    %c0_i32 = arith.constant 0 : i32
    %c0_i32_0 = arith.constant 0 : i32
    %c0_i32_1 = arith.constant 0 : i32
    return %c0_i32, %c0_i32_0 : i32, i32
  }
  func.func @transform_11(%arg0: i32) -> (i32, i32) {
    %c0_i32 = arith.constant 0 : i32
    %c0_i32_0 = arith.constant 0 : i32
    return %arg0, %c0_i32 : i32, i32
  }
  func.func @transform_12(%arg0: i32) -> (i32, i32) {
    %c0_i32 = arith.constant 0 : i32
    %c0_i32_0 = arith.constant 0 : i32
    return %arg0, %c0_i32 : i32, i32
  }
}

</mosaic_0001>

<bundles_post_ra>
// kernel: discriminator_forward.1
= control target key start
LH: loop header
LB: loop body
LE: loop exit
PB: predicated region body
PF: predicated region fallthrough
CT: control target
= control target key end

     0   :  { %s6184_s21 = smov 0   ;;  %s6186_s22 = smov 0   ;;  %s7900_s0 = inlined_call_operand.vmem [shape: bf16[32,16,96], index: 0, kind: input, shape index: {}]   ;;  %s7901_s1 = inlined_call_operand.vmem [shape: bf16[3,96,256], index: 1, kind: input, shape index: {}]   ;;  %s7902_s2 = inlined_call_operand.vmem [shape: f32[3,256], index: 2, kind: input, shape index: {}]   ;;  %s7903_s3 = inlined_call_operand.vmem [shape: bf16[3,256,256], index: 3, kind: input, shape index: {}]   ;;  %s7904_s4 = inlined_call_operand.vmem [shape: f32[3,256], index: 4, kind: input, shape index: {}]   ;;  %s7905_s5 = inlined_call_operand.vmem [shape: bf16[3,256,256], index: 5, kind: input, shape index: {}]   ;;  %s7906_s6 = inlined_call_operand.vmem [shape: f32[3,256], index: 6, kind: input, shape index: {}]   ;;  %s7907_s7 = inlined_call_operand.vmem [shape: bf16[3,256,256], index: 7, kind: input, shape index: {}]   ;;  %s7908_s8 = inlined_call_operand.vmem [shape: f32[3,256], index: 8, kind: input, shape index: {}]   ;;  %s7909_s9 = inlined_call_operand.vmem [shape: bf16[2,256,128], index: 9, kind: input, shape index: {}]   ;;  %s7910_s10 = inlined_call_operand.vmem [shape: f32[1,128], index: 10, kind: input, shape index: {}]   ;;  %s7911_s11 = inlined_call_operand.vmem [shape: f32[16,128], index: 11, kind: input, shape index: {}]   ;;  %s7912_s12 = inlined_call_operand.vmem [shape: f32[16,128], index: 12, kind: output, shape index: {}]  }
   0x1   :  { %s6188_s23 = smov 0  }
   0x2 LB: > { %s4688_s24 = sadd.s32 4294967295, %s6113_s23   ;;  %s6201_s25 = sadd.s32 1, %s6113_s23   ;;  %s6113_s23 = sphi %s6188_s23, %s7915_s23   ;;  %s6109_s22 = sphi %s6186_s22, %s7914_s22   ;;  %s6105_s21 = sphi %s6184_s21, %s7913_s21  }
   0x3   : > { %s26_s26 = ssub.s32 %s6113_s23, %s6201_s25  ;;  %s29_s27 = sadd.s32 1, %s6109_s22 }
   0x4   : > { %p27_p0 = scmp.eq.s32.totalorder %s26_s26, 0  ;;  %p36_p1 = scmp.ne.s32.totalorder %s6109_s22, %s6105_s21 }
   0x5   : > { %p37_p2 = scmp.eq.s32.totalorder %s6113_s23, 0  ;;  %p4691_p4 = scmp.ge.s32.totalorder %s6113_s23, 2 }
   0x6   : > { %s6210_s28 = scalar_select %p27_p0, %s6109_s22, %s29_s27  }
   0x7   : > { %p38_p3 = por %p37_p2, %p36_p1  ;;  %354 = sbr.rel (%p4691_p4) target bundleno = 39 (0x27), region = 56 }
   0xe   : > { %357 = sbr.rel (!%p38_p3) target bundleno = 39 (0x27), region = 60  ;;  %s359_s29 = sand.u32 (%p38_p3), 1, %s6109_s22  }
   0xf   : > { %s4693_s30 = sshll.u32 (%p38_p3), %s6113_s23, 2  ;;  %s4692_s13 = sshll.u32 (%p38_p3), %s359_s29, 7 }
  0x10   : > { %s6218_s16 = scalar_lea.vmem (%p38_p3), %s7900_s0, %s4693_s30  ;;  %s6222_s17 = scalar_lea.vmem (%p38_p3), [#allocation2], %s4692_s13 }
  0x11   : > { %v379_v0 = vld [vmem:[%s6218_s16] sm:$0xf] (%p38_p3)  ;;  %v381_v1 = vld [vmem:[%s6218_s16 + $0x8] sm:$0xf] (%p38_p3)  ;;  %v383_v2 = vld [vmem:[%s6218_s16 + $0x10] sm:$0xf] (%p38_p3) }
  0x12   : > { %380 = vst [vmem:[%s6222_s17] sm:$0xf] (%p38_p3), %v379_v0  ;;  %382 = vst [vmem:[%s6222_s17 + $0x4] sm:$0xf] (%p38_p3), %v381_v1  ;;  %v385_v3 = vld [vmem:[%s6218_s16 + $0x18] sm:$0xf] (%p38_p3) }
  0x13   : > { %v387_v4 = vld [vmem:[%s6218_s16 + $0x20] sm:$0xf] (%p38_p3)  ;;  %384 = vst [vmem:[%s6222_s17 + $0x8] sm:$0xf] (%p38_p3), %v383_v2  ;;  %386 = vst [vmem:[%s6222_s17 + $0xc] sm:$0xf] (%p38_p3), %v385_v3 }
  0x14   : > { %388 = vst [vmem:[%s6222_s17 + $0x10] sm:$0xf] (%p38_p3), %v387_v4  ;;  %v389_v5 = vld [vmem:[%s6218_s16 + $0x28] sm:$0xf] (%p38_p3)  ;;  %v391_v6 = vld [vmem:[%s6218_s16 + $0x30] sm:$0xf] (%p38_p3) }
  0x15   : > { %v393_v7 = vld [vmem:[%s6218_s16 + $0x38] sm:$0xf]  ;;  %390 = vst [vmem:[%s6222_s17 + $0x14] sm:$0xf] %v389_v5  ;;  %392 = vst [vmem:[%s6222_s17 + $0x18] sm:$0xf] %v391_v6 }
  0x16   : > { %394 = vst [vmem:[%s6222_s17 + $0x1c] sm:$0xf] %v393_v7  ;;  %v395_v8 = vld [vmem:[%s6218_s16 + $0x40] sm:$0xf]  ;;  %v397_v9 = vld [vmem:[%s6218_s16 + $0x48] sm:$0xf] }
  0x17   : > { %v399_v10 = vld [vmem:[%s6218_s16 + $0x50] sm:$0xf]  ;;  %396 = vst [vmem:[%s6222_s17 + $0x20] sm:$0xf] %v395_v8  ;;  %398 = vst [vmem:[%s6222_s17 + $0x24] sm:$0xf] %v397_v9 }
  0x18   : > { %400 = vst [vmem:[%s6222_s17 + $0x28] sm:$0xf] %v399_v10  ;;  %v401_v11 = vld [vmem:[%s6218_s16 + $0x58] sm:$0xf]  ;;  %v403_v12 = vld [vmem:[%s6218_s16 + $0x60] sm:$0xf] }
  0x19   : > { %v405_v13 = vld [vmem:[%s6218_s16 + $0x68] sm:$0xf]  ;;  %402 = vst [vmem:[%s6222_s17 + $0x2c] sm:$0xf] %v401_v11  ;;  %404 = vst [vmem:[%s6222_s17 + $0x30] sm:$0xf] %v403_v12 }
  0x1a   : > { %406 = vst [vmem:[%s6222_s17 + $0x34] sm:$0xf] %v405_v13  ;;  %v407_v14 = vld [vmem:[%s6218_s16 + $0x70] sm:$0xf]  ;;  %v409_v15 = vld [vmem:[%s6218_s16 + $0x78] sm:$0xf] }
  0x1b   : > { %v411_v16 = vld [vmem:[%s6218_s16 + $0x80] sm:$0xf]  ;;  %408 = vst [vmem:[%s6222_s17 + $0x38] sm:$0xf] %v407_v14  ;;  %410 = vst [vmem:[%s6222_s17 + $0x3c] sm:$0xf] %v409_v15 }
  0x1c   : > { %412 = vst [vmem:[%s6222_s17 + $0x40] sm:$0xf] %v411_v16  ;;  %v413_v17 = vld [vmem:[%s6218_s16 + $0x88] sm:$0xf]  ;;  %v415_v18 = vld [vmem:[%s6218_s16 + $0x90] sm:$0xf] }
  0x1d   : > { %v417_v19 = vld [vmem:[%s6218_s16 + $0x98] sm:$0xf]  ;;  %414 = vst [vmem:[%s6222_s17 + $0x44] sm:$0xf] %v413_v17  ;;  %416 = vst [vmem:[%s6222_s17 + $0x48] sm:$0xf] %v415_v18 }
  0x1e   : > { %418 = vst [vmem:[%s6222_s17 + $0x4c] sm:$0xf] %v417_v19  ;;  %v419_v20 = vld [vmem:[%s6218_s16 + $0xa0] sm:$0xf]  ;;  %v421_v21 = vld [vmem:[%s6218_s16 + $0xa8] sm:$0xf] }
  0x1f   : > { %v423_v22 = vld [vmem:[%s6218_s16 + $0xb0] sm:$0xf]  ;;  %420 = vst [vmem:[%s6222_s17 + $0x50] sm:$0xf] %v419_v20  ;;  %422 = vst [vmem:[%s6222_s17 + $0x54] sm:$0xf] %v421_v21 }
  0x20   : > { %424 = vst [vmem:[%s6222_s17 + $0x58] sm:$0xf] %v423_v22  ;;  %v425_v23 = vld [vmem:[%s6218_s16 + $0xb8] sm:$0xf]  ;;  %v427_v24 = vld [vmem:[%s6218_s16 + $0xc0] sm:$0xf] }
  0x21   : > { %v429_v25 = vld [vmem:[%s6218_s16 + $0xc8] sm:$0xf]  ;;  %426 = vst [vmem:[%s6222_s17 + $0x5c] sm:$0xf] %v425_v23  ;;  %428 = vst [vmem:[%s6222_s17 + $0x60] sm:$0xf] %v427_v24 }
  0x22   : > { %430 = vst [vmem:[%s6222_s17 + $0x64] sm:$0xf] %v429_v25  ;;  %v431_v26 = vld [vmem:[%s6218_s16 + $0xd0] sm:$0xf]  ;;  %v433_v27 = vld [vmem:[%s6218_s16 + $0xd8] sm:$0xf] }
  0x23   : > { %v435_v28 = vld [vmem:[%s6218_s16 + $0xe0] sm:$0xf]  ;;  %432 = vst [vmem:[%s6222_s17 + $0x68] sm:$0xf] %v431_v26  ;;  %434 = vst [vmem:[%s6222_s17 + $0x6c] sm:$0xf] %v433_v27 }
  0x24   : > { %436 = vst [vmem:[%s6222_s17 + $0x70] sm:$0xf] %v435_v28  ;;  %v437_v29 = vld [vmem:[%s6218_s16 + $0xe8] sm:$0xf]  ;;  %v439_v30 = vld [vmem:[%s6218_s16 + $0xf0] sm:$0xf] }
  0x25   : > { %v441_v31 = vld [vmem:[%s6218_s16 + $0xf8] sm:$0xf]  ;;  %438 = vst [vmem:[%s6222_s17 + $0x74] sm:$0xf] %v437_v29  ;;  %440 = vst [vmem:[%s6222_s17 + $0x78] sm:$0xf] %v439_v30 }
  0x26   : > { %442 = vst [vmem:[%s6222_s17 + $0x7c] sm:$0xf] %v441_v31 }
  0x27 PF: > { %p4694_p5 = scmp.ge.s32.totalorder %s6113_s23, 1  ;;  %p535_p6 = scmp.lt.s32.totalorder %s6113_s23, 3 }
  0x29   : > { %p536_p7 = pnand %p4694_p5, %p535_p6 }
  0x2a   : > { %v5544_v32 = vld [vmem:[%s7901_s1 + $0x64] ss:$8 sps:$4 sm:$0xff] (!%p536_p7)   ;;  %v5546_v33 = vld [vmem:[%s7901_s1 + $0x60] ss:$8 sps:$4 sm:$0xff] (!%p536_p7)   ;;  %v6115_v34 = vmov (!%p536_p7), 0   ;;  %s542_s27 = sand.u32 (!%p536_p7), 1, %s6105_s21  }
  0x2b   : > { %539 = sbr.rel (%p536_p7) target bundleno = 1892 (0x764), region = 105  ;;  %817 = vmatprep.mubr.bf16.mxu0 (!%p536_p7), %v6115_v34  ;;  %785 = vmatprep.subr.bf16.mxu0 (!%p536_p7), %v5544_v32  ;;  %v5547_v35 = vld [vmem:[%s7901_s1 + $0x74] ss:$8 sps:$4 sm:$0xff] (!%p536_p7)   ;;  %v5549_v36 = vld [vmem:[%s7901_s1 + $0x70] ss:$8 sps:$4 sm:$0xff] (!%p536_p7)   ;;  %s4695_s17 = sshll.u32 (!%p536_p7), %s542_s27, 7 }
  0x2c   : > { %786 = vmatpush1.bf16.msra.mxu0 (!%p536_p7), %v5546_v33  ;;  %v5550_v37 = vld [vmem:[%s7901_s1 + $0x84] ss:$8 sps:$4 sm:$0xff] (!%p536_p7)   ;;  %v5552_v38 = vld [vmem:[%s7901_s1 + $0x80] ss:$8 sps:$4 sm:$0xff] (!%p536_p7)   ;;  %v5553_v39 = vld [vmem:[%s7901_s1 + $0x94] ss:$8 sps:$4 sm:$0xff] (!%p536_p7)  }
  0x2d   : > { %787 = vmatprep.subr.bf16.mxu0 (!%p536_p7), %v5547_v35  ;;  %s6311_s26 = scalar_lea.vmem (!%p536_p7), [#allocation2], %s4695_s17  ;;  %v5555_v40 = vld [vmem:[%s7901_s1 + $0x90] ss:$8 sps:$4 sm:$0xff] (!%p536_p7)   ;;  %v5556_v41 = vld [vmem:[%s7901_s1 + $0xa4] ss:$8 sps:$4 sm:$0xff] (!%p536_p7)   ;;  %vm760_vm0 = vcmask (!%p536_p7), 785408  }
  0x2e   : > { %v5558_v42 = vld [vmem:[%s7901_s1 + $0xa0] ss:$8 sps:$4 sm:$0xff] (!%p536_p7)   ;;  %v5559_v43 = vld [vmem:[%s7901_s1 + $0xb4] ss:$8 sps:$4 sm:$0xff] (!%p536_p7)   ;;  %v5561_v44 = vld [vmem:[%s7901_s1 + $0xb0] ss:$8 sps:$4 sm:$0xff] (!%p536_p7)  }
  0x2f   : > { %v5565_v45 = vld [vmem:[%s7901_s1 + $0x4] ss:$8 sps:$4 sm:$0xff] (!%p536_p7)   ;;  %v5562_v46 = vld [vmem:[%s6311_s26] ss:$8 sps:$4 sm:$0xff] (!%p536_p7)   ;;  %v5569_v48 = vld [vmem:[%s7901_s1 + $0x14] ss:$8 sps:$4 sm:$0xff] (!%p536_p7)  }
  0x30   : > { %788 = vmatpush1.bf16.msra.mxu0 (!%p536_p7), %v5549_v36  ;;  %v5563_v47 = vld [vmem:[%s7901_s1] ss:$8 sps:$4 sm:$0xff] (!%p536_p7)   ;;  %v5567_v49 = vld [vmem:[%s7901_s1 + $0x10] ss:$8 sps:$4 sm:$0xff] (!%p536_p7)   ;;  %v5573_v50 = vld [vmem:[%s7901_s1 + $0x24] ss:$8 sps:$4 sm:$0xff] (!%p536_p7)  }
  0x31   : > { %789 = vmatprep.subr.bf16.mxu0 (!%p536_p7), %v5550_v37  ;;  %v5566_v51 = vld [vmem:[%s6311_s26 + $0x10] ss:$8 sps:$4 sm:$0xff] (!%p536_p7)   ;;  %v5571_v52 = vld [vmem:[%s7901_s1 + $0x20] ss:$8 sps:$4 sm:$0xff] (!%p536_p7)   ;;  %v5578_v53 = vld [vmem:[%s7901_s1 + $0x34] ss:$8 sps:$4 sm:$0xff] (!%p536_p7)  }
  0x32   : > { %v5576_v54 = vld [vmem:[%s7901_s1 + $0x30] ss:$8 sps:$4 sm:$0xff]   ;;  %v5570_v55 = vld [vmem:[%s6311_s26 + $0x20] ss:$8 sps:$4 sm:$0xff]   ;;  %v5582_v56 = vld [vmem:[%s7901_s1 + $0x44] ss:$8 sps:$4 sm:$0xff]  }
  0x33   : > { %v5580_v57 = vld [vmem:[%s7901_s1 + $0x40] ss:$8 sps:$4 sm:$0xff]   ;;  %v5586_v58 = vld [vmem:[%s7901_s1 + $0x54] ss:$8 sps:$4 sm:$0xff]   ;;  %v5584_v59 = vld [vmem:[%s7901_s1 + $0x50] ss:$8 sps:$4 sm:$0xff]  }
  0x34   : > { %790 = vmatpush1.bf16.msra.mxu0 %v5552_v38  ;;  %v5590_v60 = vld [vmem:[%s7901_s1 + $0xc4] ss:$8 sps:$4 sm:$0xff]   ;;  %v5574_v61 = vld [vmem:[%s6311_s26 + $0x30] ss:$8 sps:$4 sm:$0xff]   ;;  %v5575_v62 = vld [vmem:[%s6311_s26 + $0x40] ss:$8 sps:$4 sm:$0xff]  }
  0x35   : > { %791 = vmatprep.subr.bf16.mxu0 %v5553_v39  ;;  %v5579_v63 = vld [vmem:[%s6311_s26 + $0x50] ss:$8 sps:$4 sm:$0xff]   ;;  %v5583_v0 = vld [vmem:[%s6311_s26 + $0x60] ss:$8 sps:$4 sm:$0xff]   ;;  %v6390_v2 = vld [vmem:[%s6311_s26 + $0x4] sm:$0xf] }
  0x36   : > { %v5587_v1 = vld [vmem:[%s6311_s26 + $0x70] ss:$8 sps:$4 sm:$0xff]   ;;  %v628_v3 = vunpack.c.l.bf16 %v6390_v2  ;;  %v5621_v4 = vld [vmem:[%s7903_s3 + $0x104] ss:$8 sps:$4 sm:$0xff]   ;;  %v5623_v5 = vld [vmem:[%s7903_s3 + $0x100] ss:$8 sps:$4 sm:$0xff]  }
  0x37   : > { %v5624_v6 = vld [vmem:[%s7903_s3 + $0x114] ss:$8 sps:$4 sm:$0xff]   ;;  %1834 = vmatprep.subr.bf16.mxu1 %v5621_v4  ;;  %v5626_v7 = vld [vmem:[%s7903_s3 + $0x110] ss:$8 sps:$4 sm:$0xff]   ;;  %v6116_v8 = vmov 0.0   ;;  %s6118_s27 = smov 32  }
  0x38   : > { %792 = vmatpush1.bf16.msra.mxu0 %v5555_v40  ;;  %1835 = vmatpush1.bf16.msra.mxu1 %v5623_v5  ;;  %v659_v9 = vpack.c.bf16 %v628_v3, %v6116_v8  ;;  %v5627_v10 = vld [vmem:[%s7903_s3 + $0x124] ss:$8 sps:$4 sm:$0xff]   ;;  %v5588_v11 = vld [vmem:[%s7901_s1 + $0xc0] ss:$8 sps:$4 sm:$0xff]   ;;  %v5595_v12 = vld [vmem:[%s7901_s1 + $0xd4] ss:$8 sps:$4 sm:$0xff]  }
  0x39   : > { %793 = vmatprep.subr.bf16.mxu0 %v5556_v41  ;;  %1836 = vmatprep.subr.bf16.mxu1 %v5624_v6  ;;  %v5629_v13 = vld [vmem:[%s7903_s3 + $0x120] ss:$8 sps:$4 sm:$0xff]   ;;  %v6421_v14 = vld [vmem:[%s6311_s26 + $0xc] sm:$0xf]  ;;  %v6424_v15 = vld [vmem:[%s6311_s26 + $0x14] sm:$0xf] }
  0x3a   : > { %v5593_v16 = vld [vmem:[%s7901_s1 + $0xd0] ss:$8 sps:$4 sm:$0xff]   ;;  %v5630_v17 = vld [vmem:[%s7903_s3 + $0x134] ss:$8 sps:$4 sm:$0xff]   ;;  %v5599_v18 = vld [vmem:[%s7901_s1 + $0xe4] ss:$8 sps:$4 sm:$0xff]   ;;  %v4698_v22 = vcombine.low %v6421_v14, %v6424_v15 }
  0x3b   : > { %v5632_v19 = vld [vmem:[%s7903_s3 + $0x130] ss:$8 sps:$4 sm:$0xff]   ;;  %v5633_v20 = vld [vmem:[%s7903_s3 + $0x144] ss:$8 sps:$4 sm:$0xff]   ;;  %v5597_v21 = vld [vmem:[%s7901_s1 + $0xe0] ss:$8 sps:$4 sm:$0xff]  }
  0x3c   : > { %794 = vmatpush1.bf16.msra.mxu0 %v5558_v42  ;;  %1837 = vmatpush1.bf16.msra.mxu1 %v5626_v7  ;;  %v5604_v23 = vld [vmem:[%s7901_s1 + $0xf4] ss:$8 sps:$4 sm:$0xff]   ;;  %v5635_v24 = vld [vmem:[%s7903_s3 + $0x140] ss:$8 sps:$4 sm:$0xff]   ;;  %v6461_v27 = vld [vmem:[%s6311_s26 + $0x24] sm:$0xf] }
  0x3d   : > { %795 = vmatprep.subr.bf16.mxu0 %v5559_v43  ;;  %1838 = vmatprep.subr.bf16.mxu1 %v5627_v10  ;;  %v5636_v25 = vld [vmem:[%s7903_s3 + $0x154] ss:$8 sps:$4 sm:$0xff]   ;;  %v5602_v28 = vld [vmem:[%s7901_s1 + $0xf0] ss:$8 sps:$4 sm:$0xff]   ;;  %v5608_v29 = vld [vmem:[%s7901_s1 + $0x104] ss:$8 sps:$4 sm:$0xff]  }
  0x3e   : > { %v6458_v26 = vld [vmem:[%s6311_s26 + $0x1c] sm:$0xf]  ;;  %v5638_v30 = vld [vmem:[%s7903_s3 + $0x150] ss:$8 sps:$4 sm:$0xff]   ;;  %v5639_v31 = vld [vmem:[%s7903_s3 + $0x164] ss:$8 sps:$4 sm:$0xff]  }
  0x3f   : > { %v5606_v32 = vld [vmem:[%s7901_s1 + $0x100] ss:$8 sps:$4 sm:$0xff]   ;;  %v4699_v33 = vcombine.low %v6458_v26, %v6461_v27  ;;  %v5612_v35 = vld [vmem:[%s7901_s1 + $0x114] ss:$8 sps:$4 sm:$0xff]   ;;  %v606_v38 = vld [vmem:[%s6311_s26 + $0x2c] sm:$0xf] }
  0x40   : > { %796 = vmatpush1.bf16.msra.mxu0 %v5561_v44  ;;  %1839 = vmatpush1.bf16.msra.mxu1 %v5629_v13  ;;  %v5641_v36 = vld [vmem:[%s7903_s3 + $0x160] ss:$8 sps:$4 sm:$0xff]   ;;  %v5642_v37 = vld [vmem:[%s7903_s3 + $0x174] ss:$8 sps:$4 sm:$0xff]   ;;  %v5610_v40 = vld [vmem:[%s7901_s1 + $0x110] ss:$8 sps:$4 sm:$0xff]  }
  0x41   : > { %982 = vmatprep.subr.bf16.mxu0 %v5565_v45  ;;  %1840 = vmatprep.subr.bf16.mxu1 %v5630_v17  ;;  %v608_v39 = vld [vmem:[%s6311_s26 + $0x34] sm:$0xf]  ;;  %v5644_v41 = vld [vmem:[%s7903_s3 + $0x170] ss:$8 sps:$4 sm:$0xff]   ;;  %v5645_v42 = vld [vmem:[%s7903_s3 + $0x184] ss:$8 sps:$4 sm:$0xff]   ;;  %v1347_v17 = vlaneseq }
  0x42   : > { %v4700_v43 = vcombine.low %v606_v38, %v608_v39  ;;  %v5647_v44 = vld [vmem:[%s7903_s3 + $0x180] ss:$8 sps:$4 sm:$0xff]   ;;  %v5648_v45 = vld [vmem:[%s7903_s3 + $0x194] ss:$8 sps:$4 sm:$0xff]   ;;  %v5656_v7 = vld [vmem:[%s7903_s3 + $0x1b0] ss:$8 sps:$4 sm:$0xff]  }
  0x43   : > { %4737 = vmatmul.mubr.msk.bf16.vlgmr.msra.gmra.mrb[0].mxu0 %vm760_vm0, %v5562_v46  ;;  %v610_v46 = vld [vmem:[%s6311_s26 + $0x3c] sm:$0xf]  ;;  %v5665_v13 = vld [vmem:[%s7903_s3 + $0x1e0] ss:$8 sps:$4 sm:$0xff]   ;;  %p586_p8 = scmp.lt.s32.totalorder %s4688_s24, 1 }
  0x44   : > { %983 = vmatpush1.bf16.msra.mxu0 %v5563_v47  ;;  %827 = vmatprep.mubr.bf16.mxu0 %v6115_v34  ;;  %v612_v47 = vld [vmem:[%s6311_s26 + $0x44] sm:$0xf]  ;;  %v626_v4 = vld [vmem:[%s6311_s26 + $0x7c] sm:$0xf] }
  0x45   : > { %984 = vmatprep.subr.bf16.mxu0 %v5569_v48  ;;  %1841 = vmatpush1.bf16.msra.mxu1 %v5632_v19  ;;  %v5650_v48 = vld [vmem:[%s7903_s3 + $0x190] ss:$8 sps:$4 sm:$0xff]   ;;  %v5654_v6 = vld [vmem:[%s7903_s3 + $0x1b4] ss:$8 sps:$4 sm:$0xff]   ;;  %s7917_s24 = smov (!%p586_p8, %s4688_s24), 1 }
  0x46   : > { %1842 = vmatprep.subr.bf16.mxu1 %v5633_v20  ;;  %v5660_v10 = vld [vmem:[%s7903_s3 + $0x1d4] ss:$8 sps:$4 sm:$0xff]   ;;  %v1345_v20 = vld [vmem:[%s7902_s2] sm:$0x77]  ;;  %s4696_s13 = sshll.u32 %s7917_s24, 3 }
  0x47   : > { %s589_s16 = scalar_lea.vmem %s7911_s11, %s4696_s13  ;;  %s593_s18 = scalar_lea.vmem %s7912_s12, %s4696_s13 }
  0x48   : > { %985 = vmatpush1.bf16.msra.mxu0 %v5567_v49  ;;  %v5651_v49 = vld [vmem:[%s7903_s3 + $0x1a4] ss:$8 sps:$4 sm:$0xff]  }
  0x49   : > { %986 = vmatprep.subr.bf16.mxu0 %v5573_v50  ;;  %1843 = vmatpush1.bf16.msra.mxu1 %v5635_v24  ;;  %v4701_v50 = vcombine.low %v610_v46, %v612_v47 }
  0x4a   : > { %1844 = vmatprep.subr.bf16.mxu1 %v5636_v25 }
  0x4b   : > { %4738 = vmatmul.mubr.msk.bf16.gmra.mrb[4].mxu0 %vm760_vm0, %v5566_v51  ;;  %v5653_v51 = vld [vmem:[%s7903_s3 + $0x1a0] ss:$8 sps:$4 sm:$0xff]  }
  0x4c   : > { %837 = vmatprep.mubr.bf16.mxu0 %v6115_v34  ;;  %987 = vmatpush1.bf16.msra.mxu0 %v5571_v52  ;;  %v614_v52 = vld [vmem:[%s6311_s26 + $0x4c] sm:$0xf] }
  0x4d   : > { %988 = vmatprep.subr.bf16.mxu0 %v5578_v53  ;;  %1845 = vmatpush1.bf16.msra.mxu1 %v5638_v30  ;;  %v616_v53 = vld [vmem:[%s6311_s26 + $0x54] sm:$0xf] }
  0x4e   : > { %1846 = vmatprep.subr.bf16.mxu1 %v5639_v31 }
  0x50   : > { %989 = vmatpush1.bf16.msra.mxu0 %v5576_v54  ;;  %v4702_v54 = vcombine.low %v614_v52, %v616_v53 }
  0x51   : > { %990 = vmatprep.subr.bf16.mxu0 %v5582_v56  ;;  %1847 = vmatpush1.bf16.msra.mxu1 %v5641_v36  ;;  %v620_v56 = vld [vmem:[%s6311_s26 + $0x64] sm:$0xf] }
  0x52   : > { %1848 = vmatprep.subr.bf16.mxu1 %v5642_v37 }
  0x53   : > { %4739 = vmatmul.mubr.msk.bf16.gmra.mrb[8].mxu0 %vm760_vm0, %v5570_v55  ;;  %v618_v55 = vld [vmem:[%s6311_s26 + $0x5c] sm:$0xf] }
  0x54   : > { %847 = vmatprep.mubr.bf16.mxu0 %v6115_v34  ;;  %991 = vmatpush1.bf16.msra.mxu0 %v5580_v57  ;;  %v4703_v57 = vcombine.low %v618_v55, %v620_v56 }
  0x55   : > { %992 = vmatprep.subr.bf16.mxu0 %v5586_v58  ;;  %1849 = vmatpush1.bf16.msra.mxu1 %v5644_v41  ;;  %v622_v58 = vld [vmem:[%s6311_s26 + $0x6c] sm:$0xf] }
  0x56   : > { %1850 = vmatprep.subr.bf16.mxu1 %v5645_v42  ;;  %v4771_v3 = vcombine.low %v620_v56, %v622_v58 }
  0x58   : > { %993 = vmatpush1.bf16.msra.mxu0 %v5584_v59  ;;  %v624_v59 = vld [vmem:[%s6311_s26 + $0x74] sm:$0xf]  ;;  %s6117_s26 = smov 16  }
  0x59   : > { %1200 = vmatprep.subr.bf16.mxu0 %v5590_v60  ;;  %1851 = vmatpush1.bf16.msra.mxu1 %v5647_v44  ;;  %v4704_v60 = vcombine.low %v622_v58, %v624_v59  ;;  %v4772_v5 = vcombine.low %v624_v59, %v626_v4 }
  0x5a   : > { %1852 = vmatprep.subr.bf16.mxu1 %v5648_v45 }
  0x5b   : > { %4740 = vmatmul.mubr.msk.bf16.gmra.mrb[12].mxu0 %vm760_vm0, %v5574_v61  ;;  %v4765_v61 = vcombine.low %v6390_v2, %v6421_v14  ;;  %v4770_v2 = vcombine.low %v616_v53, %v618_v55  ;;  %v5666_v14 = vld [vmem:[%s7903_s3 + $0x1f4] ss:$8 sps:$4 sm:$0xff]  }
  0x5c   : > { %857 = vmatprep.mubr.bf16.mxu0 %v6115_v34 }
  0x5d   : > { %1853 = vmatpush1.bf16.msra.mxu1 %v5650_v48 }
  0x5e   : > { %1854 = vmatprep.subr.bf16.mxu1 %v5651_v49 }
  0x61   : > { %1855 = vmatpush1.bf16.msra.mxu1 %v5653_v51 }
  0x62   : > { %1856 = vmatprep.subr.bf16.mxu1 %v5654_v6 }
  0x63   : > { %4741 = vmatmul.mubr.msk.bf16.gmra.mrb[16].mxu0 %vm760_vm0, %v5575_v62  ;;  %v4766_v62 = vcombine.low %v6424_v15, %v6458_v26  ;;  %v5668_v15 = vld [vmem:[%s7903_s3 + $0x1f0] ss:$8 sps:$4 sm:$0xff]  }
  0x64   : > { %867 = vmatprep.mubr.bf16.mxu0 %v6115_v34 }
  0x65   : > { %1857 = vmatpush1.bf16.msra.mxu1 %v5656_v7 }
  0x6b   : > { %4742 = vmatmul.mubr.msk.bf16.gmra.mrb[20].mxu0 %vm760_vm0, %v5579_v63  ;;  %v4767_v63 = vcombine.low %v6461_v27, %v606_v38 }
  0x6c   : > { %877 = vmatprep.mubr.bf16.mxu0 %v6115_v34 }
  0x73   : > { %4743 = vmatmul.mubr.msk.bf16.gmra.mrb[24].mxu0 %vm760_vm0, %v5583_v0  ;;  %v4768_v0 = vcombine.low %v608_v39, %v610_v46 }
  0x74   : > { %887 = vmatprep.mubr.bf16.mxu0 %v6115_v34 }
  0x7b   : > { %4744 = vmatmul.mubr.msk.bf16.gmra.mrb[28].mxu0 %vm760_vm0, %v5587_v1  ;;  %v4769_v1 = vcombine.low %v612_v47, %v614_v52 }
  0x7c   : > { %1014 = vmatprep.mubr.bf16.mxu0 %v6115_v34 }
  0x83   : > { %4757 = vmatmul.mubr.msk.bf16.vlgmr.msra.gmra.mrb[0].mxu0 %vm760_vm0, %v659_v9  ;;  %v5657_v9 = vld [vmem:[%s7903_s3 + $0x1c4] ss:$8 sps:$4 sm:$0xff]  }
  0x84   : > { %1201 = vmatpush1.bf16.msra.mxu0 %v5588_v11  ;;  %1024 = vmatprep.mubr.bf16.mxu0 %v6115_v34  ;;  %v5662_v11 = vld [vmem:[%s7903_s3 + $0x1d0] ss:$8 sps:$4 sm:$0xff]  }
  0x85   : > { %1202 = vmatprep.subr.bf16.mxu0 %v5595_v12  ;;  %1858 = vmatprep.subr.bf16.mxu1 %v5657_v9  ;;  %v5663_v12 = vld [vmem:[%s7903_s3 + $0x1e4] ss:$8 sps:$4 sm:$0xff]  }
  0x88   : > { %1203 = vmatpush1.bf16.msra.mxu0 %v5593_v16  ;;  %v5671_v16 = vld [vmem:[%s7903_s3 + $0x4] ss:$8 sps:$4 sm:$0xff]  }
  0x89   : > { %1204 = vmatprep.subr.bf16.mxu0 %v5599_v18  ;;  %v1348_v18 = vshrl.u32 %v1347_v17, 7 }
  0x8b   : > { %4758 = vmatmul.mubr.msk.bf16.gmra.mrb[4].mxu0 %vm760_vm0, %v4698_v22  ;;  %v6592_v19 = vsub.s32 0, %v1348_v18  ;;  %v6604_v25 = vsub.s32 1, %v1348_v18  ;;  %v6616_v36 = vsub.s32 6, %v1348_v18 }
  0x8c   : > { %1034 = vmatprep.mubr.bf16.mxu0 %v6115_v34  ;;  %1205 = vmatpush1.bf16.msra.mxu0 %v5597_v21  ;;  %v6597_v21 = vsub.s32 4, %v1348_v18 }
  0x8d   : > { %1206 = vmatprep.subr.bf16.mxu0 %v5604_v23  ;;  %v1350_v22 = vrot.slane %v1345_v20, %v6592_v19  ;;  %v1550_v46 = vrot.slane %v1345_v20, %v6616_v36 }
  0x8e   : > { %v1354_v23 = vrot.slane %v1345_v20, %v6597_v21 }
  0x8f   : > { %v6602_v24 = vrot.slane %v1350_v22, %v6592_v19 }
  0x90   : > { %1207 = vmatpush1.bf16.msra.mxu0 %v5602_v28  ;;  %v6607_v26 = vrot.slane %v1354_v23, %v6592_v19  ;;  %v6609_v28 = vsub.s32 2, %v1348_v18 }
  0x91   : > { %1208 = vmatprep.subr.bf16.mxu0 %v5608_v29  ;;  %v6611_v29 = vsub.s32 5, %v1348_v18 }
  0x93   : > { %4759 = vmatmul.mubr.msk.bf16.gmra.mrb[8].mxu0 %vm760_vm0, %v4699_v33  ;;  %v1500_v41 = vrot.slane %v1345_v20, %v6611_v29 }
  0x94   : > { %1044 = vmatprep.mubr.bf16.mxu0 %v6115_v34  ;;  %1209 = vmatpush1.bf16.msra.mxu0 %v5606_v32  ;;  %v1496_v32 = vrot.slane %v1345_v20, %v6604_v25 }
  0x95   : > { %1210 = vmatprep.subr.bf16.mxu0 %v5612_v35  ;;  %v6631_v51 = vrot.slane %v1500_v41, %v6604_v25  ;;  %v5669_v41 = vld [vmem:[%s7903_s3] ss:$8 sps:$4 sm:$0xff]  }
  0x96   : > { %v6623_v45 = vrot.slane %v1496_v32, %v6604_v25 }
  0x98   : > { %1211 = vmatpush1.bf16.msra.mxu0 %v5610_v40  ;;  %v1546_v40 = vrot.slane %v1345_v20, %v6609_v28 }
  0x9b   : > { %4760 = vmatmul.mubr.msk.bf16.gmra.mrb[12].mxu0 %vm760_vm0, %v4700_v43 }
  0x9c   : > { %1054 = vmatprep.mubr.bf16.mxu0 %v6115_v34 }
  0xa3   : > { %4761 = vmatmul.mubr.msk.bf16.gmra.mrb[16].mxu0 %vm760_vm0, %v4701_v50  ;;  %v6628_v50 = vrot.slane %v1546_v40, %v6609_v28 }
  0xa4   : > { %1064 = vmatprep.mubr.bf16.mxu0 %v6115_v34 }
  0xab   : > { %4762 = vmatmul.mubr.msk.bf16.gmra.mrb[20].mxu0 %vm760_vm0, %v4702_v54 }
  0xac   : > { %1074 = vmatprep.mubr.bf16.mxu0 %v6115_v34 }
  0xb3   : > { %4763 = vmatmul.mubr.msk.bf16.gmra.mrb[24].mxu0 %vm760_vm0, %v4703_v57 }
  0xb4   : > { %1084 = vmatprep.mubr.bf16.mxu0 %v6115_v34 }
  0xbb   : > { %4764 = vmatmul.mubr.msk.bf16.gmra.mrb[28].mxu0 %vm760_vm0, %v4704_v60  ;;  %v6639_v60 = vrot.slane %v1550_v46, %v6609_v28 }
  0xbc   : > { %1232 = vmatprep.mubr.bf16.mxu0 %v6115_v34 }
  0xc3   : > { %4797 = vmatmul.mubr.msk.bf16.vlgmr.msra.gmra.mrb[0].mxu0 %vm760_vm0, %v4765_v61 }
  0xc4   : > { %1242 = vmatprep.mubr.bf16.mxu0 %v6115_v34 }
  0xcb   : > { %4798 = vmatmul.mubr.msk.bf16.gmra.mrb[4].mxu0 %vm760_vm0, %v4766_v62 }
  0xcc   : > { %1252 = vmatprep.mubr.bf16.mxu0 %v6115_v34 }
  0xd3   : > { %4799 = vmatmul.mubr.msk.bf16.gmra.mrb[8].mxu0 %vm760_vm0, %v4767_v63 }
  0xd4   : > { %1262 = vmatprep.mubr.bf16.mxu0 %v6115_v34 }
  0xdb   : > { %4800 = vmatmul.mubr.msk.bf16.gmra.mrb[12].mxu0 %vm760_vm0, %v4768_v0 }
  0xdc   : > { %1272 = vmatprep.mubr.bf16.mxu0 %v6115_v34 }
  0xe3   : > { %4801 = vmatmul.mubr.msk.bf16.gmra.mrb[16].mxu0 %vm760_vm0, %v4769_v1 }
  0xe4   : > { %1282 = vmatprep.mubr.bf16.mxu0 %v6115_v34 }
  0xeb   : > { %4802 = vmatmul.mubr.msk.bf16.gmra.mrb[20].mxu0 %vm760_vm0, %v4770_v2 }
  0xec   : > { %1292 = vmatprep.mubr.bf16.mxu0 %v6115_v34 }
  0xf3   : > { %4803 = vmatmul.mubr.msk.bf16.gmra.mrb[24].mxu0 %vm760_vm0, %v4771_v3 }
  0xf4   : > { %1302 = vmatprep.mubr.bf16.mxu0 %v6115_v34  ;;  %v5659_v34 = vld [vmem:[%s7903_s3 + $0x1c0] ss:$8 sps:$4 sm:$0xff]  }
  0xf5   : > { %1859 = vmatpush1.bf16.msra.mxu1 %v5659_v34 }
  0xf6   : > { %1860 = vmatprep.subr.bf16.mxu1 %v5660_v10 }
  0xf9   : > { %1861 = vmatpush1.bf16.msra.mxu1 %v5662_v11 }
  0xfa   : > { %1862 = vmatprep.subr.bf16.mxu1 %v5663_v12 }
  0xfb   : > { %4804 = vmatmul.mubr.msk.bf16.gmra.mrb[28].mxu0 %vm760_vm0, %v4772_v5 }
  0xfd   : > { %1863 = vmatpush1.bf16.msra.mxu1 %v5665_v13 }
  0xfe   : > { %1864 = vmatprep.subr.bf16.mxu1 %v5666_v14 }
 0x101   : > { %1865 = vmatpush1.bf16.msra.mxu1 %v5668_v15 }
 0x102   : > { %2067 = vmatprep.subr.bf16.mxu1 %v5671_v16 }
 0x196   : > { %v1234_v27 = vpop.f32.mrb[0].mxu0 }
 0x197   : > { %v1365_v30 = vadd.f32 %v6602_v24, %v1234_v27  ;;  %v1236_v31 = vpop.f32.mrb[1].mxu0 }
 0x198   : > { %v1366_v33 = vadd.f32 %v6607_v26, %v1236_v31  ;;  %v1238_v35 = vpop.f32.mrb[2].mxu0 }
 0x199   : > { %v1367_v37 = vadd.f32 %v6602_v24, %v1238_v35  ;;  %v1240_v38 = vpop.f32.mrb[3].mxu0  ;;  %vm1397_vm1 = vcmp.gt.f32.partialorder %v1365_v30, 0.0  ;;  %v1429_v39 = vmul.f32 0.2, %v1365_v30 }
 0x19a   : > { %v1430_v42 = vmul.f32 0.2, %v1366_v33  ;;  %v1368_v44 = vadd.f32 %v6607_v26, %v1240_v38  ;;  %vm1398_vm3 = vcmp.gt.f32.partialorder %v1366_v33, 0.0 }
 0x19b   : > { %vm1399_vm2 = vcmp.gt.f32.partialorder %v1367_v37, 0.0  ;;  %v1431_v43 = vmul.f32 0.2, %v1367_v37  ;;  %v1461_v48 = vsel %vm1397_vm1, %v1365_v30, %v1429_v39 }
 0x19c   : > { %v1432_v53 = vmul.f32 0.2, %v1368_v44  ;;  %v1462_v56 = vsel %vm1398_vm3, %v1366_v33, %v1430_v42  ;;  %vm1400_vm4 = vcmp.gt.f32.partialorder %v1368_v44, 0.0  ;;  %v1511_v61 = vmul.f32 %v6623_v45, %v1461_v48 }
 0x19d   : > { %v1463_v47 = vsel %vm1399_vm2, %v1367_v37, %v1431_v43  ;;  %v1512_v3 = vmul.f32 %v6631_v51, %v1462_v56  ;;  %v5672_v56 = vld [vmem:[%s7903_s3 + $0x10] ss:$8 sps:$4 sm:$0xff]  }
 0x19e   : > { %v1513_v49 = vmul.f32 %v6623_v45, %v1463_v47  ;;  %v1244_v52 = vpop.f32.mrb[4].mxu0  ;;  %v1464_v4 = vsel %vm1400_vm4, %v1368_v44, %v1432_v53  ;;  %v1561_v12 = vadd.f32 %v6628_v50, %v1511_v61  ;;  %v5674_v44 = vld [vmem:[%s7903_s3 + $0x14] ss:$8 sps:$4 sm:$0xff]  }
 0x19f   : > { %v1369_v54 = vadd.f32 %v6602_v24, %v1244_v52  ;;  %v1246_v55 = vpop.f32.mrb[5].mxu0  ;;  %v1514_v13 = vmul.f32 %v6631_v51, %v1464_v4  ;;  %v1562_v27 = vadd.f32 %v6639_v60, %v1512_v3 }
 0x1a0   : > { %v6635_v57 = vadd.f32 %v6628_v50, %v1513_v49  ;;  %v1370_v58 = vadd.f32 %v6607_v26, %v1246_v55  ;;  %v1248_v59 = vpop.f32.mrb[6].mxu0 }
 0x1a1   : > { %vm1401_vm5 = vcmp.gt.f32.partialorder %v1369_v54, 0.0  ;;  %v1433_v62 = vmul.f32 0.2, %v1369_v54  ;;  %v1371_v63 = vadd.f32 %v6602_v24, %v1248_v59  ;;  %v1250_v0 = vpop.f32.mrb[7].mxu0  ;;  %v6671_v48 = vadd.f32 %v6639_v60, %v1514_v13 }
 0x1a2   : > { %vm1402_vm6 = vcmp.gt.f32.partialorder %v1370_v58, 0.0  ;;  %v1434_v1 = vmul.f32 0.2, %v1370_v58  ;;  %v1372_v2 = vadd.f32 %v6607_v26, %v1250_v0 }
 0x1a3   : > { %v1465_v5 = vsel %vm1401_vm5, %v1369_v54, %v1433_v62  ;;  %vm1403_vm7 = vcmp.gt.f32.partialorder %v1371_v63, 0.0  ;;  %v1435_v6 = vmul.f32 0.2, %v1371_v63 }
 0x1a4   : > { %v1515_v7 = vmul.f32 %v6623_v45, %v1465_v5  ;;  %vm1404_vm8 = vcmp.gt.f32.partialorder %v1372_v2, 0.0  ;;  %v1436_v9 = vmul.f32 0.2, %v1372_v2  ;;  %v1466_v34 = vsel %vm1402_vm6, %v1370_v58, %v1434_v1 }
 0x1a5   : > { %v1467_v10 = vsel %vm1403_vm7, %v1371_v63, %v1435_v6  ;;  %v1516_v11 = vmul.f32 %v6631_v51, %v1466_v34  ;;  %v5677_v63 = vld [vmem:[%s7903_s3 + $0x24] ss:$8 sps:$4 sm:$0xff]  }
 0x1a6   : > { %v1517_v14 = vmul.f32 %v6623_v45, %v1467_v10  ;;  %v1468_v15 = vsel %vm1404_vm8, %v1372_v2, %v1436_v9  ;;  %v1254_v16 = vpop.f32.mrb[8].mxu0  ;;  %v1565_v18 = vadd.f32 %v6628_v50, %v1515_v7 }
 0x1a7   : > { %v1518_v20 = vmul.f32 %v6631_v51, %v1468_v15  ;;  %v1373_v22 = vadd.f32 %v6602_v24, %v1254_v16  ;;  %v1256_v23 = vpop.f32.mrb[9].mxu0  ;;  %v1566_v30 = vadd.f32 %v6639_v60, %v1516_v11  ;;  %v5675_v11 = vld [vmem:[%s7903_s3 + $0x20] ss:$8 sps:$4 sm:$0xff]   ;;  %v5680_v15 = vld [vmem:[%s7903_s3 + $0x34] ss:$8 sps:$4 sm:$0xff]  }
 0x1a8   : > { %v1374_v31 = vadd.f32 %v6607_v26, %v1256_v23  ;;  %v1258_v32 = vpop.f32.mrb[10].mxu0  ;;  %v1633_v33 = vpack.c.bf16 %v1565_v18, %v1561_v12  ;;  %v6657_v35 = vadd.f32 %v6628_v50, %v1517_v14 }
 0x1a9   : > { %vm1405_vm9 = vcmp.gt.f32.partialorder %v1373_v22, 0.0  ;;  %v1437_v37 = vmul.f32 0.2, %v1373_v22  ;;  %v1375_v38 = vadd.f32 %v6602_v24, %v1258_v32  ;;  %v1260_v39 = vpop.f32.mrb[11].mxu0  ;;  %v1634_v40 = vpack.c.bf16 %v1566_v30, %v1562_v27 }
 0x1aa   : > { %vm1406_vm10 = vcmp.gt.f32.partialorder %v1374_v31, 0.0  ;;  %v1438_v42 = vmul.f32 0.2, %v1374_v31  ;;  %v1376_v43 = vadd.f32 %v6607_v26, %v1260_v39  ;;  %v6668_v46 = vadd.f32 %v6639_v60, %v1518_v20 }
 0x1ab   : > { %vm1407_vm11 = vcmp.gt.f32.partialorder %v1375_v38, 0.0  ;;  %v1439_v47 = vmul.f32 0.2, %v1375_v38  ;;  %1866 = vmatprep.mubr.bf16.mxu1 %v1634_v40  ;;  %v2140_v49 = vpack.c.bf16 %v6657_v35, %v6635_v57  ;;  %v1469_v53 = vsel %vm1405_vm9, %v1373_v22, %v1437_v37  ;;  %v5683_v40 = vld [vmem:[%s7903_s3 + $0x44] ss:$8 sps:$4 sm:$0xff]  }
 0x1ac   : > { %vm1408_vm12 = vcmp.gt.f32.partialorder %v1376_v43, 0.0  ;;  %v1440_v52 = vmul.f32 0.2, %v1376_v43  ;;  %1867 = vmatmul.mubr.bf16.vlgmr.msra.gmra.mrb[0].mxu1 %v1633_v33  ;;  %v1470_v54 = vsel %vm1406_vm10, %v1374_v31, %v1438_v42  ;;  %v2141_v58 = vpack.c.bf16 %v6668_v46, %v6671_v48  ;;  %v5678_v33 = vld [vmem:[%s7903_s3 + $0x30] ss:$8 sps:$4 sm:$0xff]  }
 0x1ad   : > { %v1471_v55 = vsel %vm1407_vm11, %v1375_v38, %v1439_v47  ;;  %2068 = vmatpush1.bf16.msra.mxu1 %v5669_v41  ;;  %v1519_v3 = vmul.f32 %v6623_v45, %v1469_v53  ;;  %v1520_v4 = vmul.f32 %v6631_v51, %v1470_v54 }
 0x1ae   : > { %v1521_v59 = vmul.f32 %v6623_v45, %v1471_v55  ;;  %v1472_v61 = vsel %vm1408_vm12, %v1376_v43, %v1440_v52  ;;  %v1264_v62 = vpop.f32.mrb[12].mxu0  ;;  %2069 = vmatprep.subr.bf16.mxu1 %v5674_v44 }
 0x1af   : > { %v1522_v0 = vmul.f32 %v6631_v51, %v1472_v61  ;;  %v1377_v1 = vadd.f32 %v6602_v24, %v1264_v62  ;;  %v1266_v2 = vpop.f32.mrb[13].mxu0  ;;  %v1569_v41 = vadd.f32 %v6628_v50, %v1519_v3  ;;  %v1570_v52 = vadd.f32 %v6639_v60, %v1520_v4  ;;  %v5686_v4 = vld [vmem:[%s7903_s3 + $0x54] ss:$8 sps:$4 sm:$0xff]  }
 0x1b0   : > { %v1378_v5 = vadd.f32 %v6607_v26, %v1266_v2  ;;  %v1268_v6 = vpop.f32.mrb[14].mxu0  ;;  %v6691_v7 = vadd.f32 %v6628_v50, %v1521_v59 }
 0x1b1   : > { %vm1409_vm13 = vcmp.gt.f32.partialorder %v1377_v1, 0.0  ;;  %v1441_v9 = vmul.f32 0.2, %v1377_v1  ;;  %v1379_v34 = vadd.f32 %v6602_v24, %v1268_v6  ;;  %2070 = vmatpush1.bf16.msra.mxu1 %v5672_v56  ;;  %v1270_v10 = vpop.f32.mrb[15].mxu0  ;;  %v6698_v12 = vadd.f32 %v6639_v60, %v1522_v0 }
 0x1b2   : > { %vm1410_vm14 = vcmp.gt.f32.partialorder %v1378_v5, 0.0  ;;  %v1442_v13 = vmul.f32 0.2, %v1378_v5  ;;  %v1380_v14 = vadd.f32 %v6607_v26, %v1270_v10  ;;  %2071 = vmatprep.subr.bf16.mxu1 %v5677_v63  ;;  %v1595_v16 = vpack.c.bf16 %v6691_v7, %v6657_v35  ;;  %v5798_v35 = vld [vmem:[%s7905_s5 + $0x1b0] ss:$8 sps:$4 sm:$0xff]  }
 0x1b3   : > { %v1473_v18 = vsel %vm1409_vm13, %v1377_v1, %v1441_v9  ;;  %vm1411_vm15 = vcmp.gt.f32.partialorder %v1379_v34, 0.0  ;;  %v1443_v20 = vmul.f32 0.2, %v1379_v34  ;;  %v1596_v22 = vpack.c.bf16 %v6698_v12, %v6668_v46  ;;  %v5681_v1 = vld [vmem:[%s7903_s3 + $0x40] ss:$8 sps:$4 sm:$0xff]  }
 0x1b4   : > { %v1523_v23 = vmul.f32 %v6623_v45, %v1473_v18  ;;  %v1474_v27 = vsel %vm1410_vm14, %v1378_v5, %v1442_v13  ;;  %vm1412_vm0 = vcmp.gt.f32.partialorder %v1380_v14, 0.0  ;;  %v1444_v30 = vmul.f32 0.2, %v1380_v14  ;;  %v5746_v46 = vld [vmem:[%s7903_s3 + $0x294] ss:$8 sps:$4 sm:$0xff]  }
 0x1b5   : > { %v1524_v31 = vmul.f32 %v6631_v51, %v1474_v27  ;;  %v1475_v32 = vsel %vm1411_vm15, %v1379_v34, %v1443_v20  ;;  %2072 = vmatpush1.bf16.msra.mxu1 %v5675_v11  ;;  %v5689_v27 = vld [vmem:[%s7903_s3 + $0x64] ss:$8 sps:$4 sm:$0xff]  }
 0x1b6   : > { %v1525_v37 = vmul.f32 %v6623_v45, %v1475_v32  ;;  %v1476_v38 = vsel %vm1412_vm0, %v1380_v14, %v1444_v30  ;;  %v1274_v39 = vpop.f32.mrb[16].mxu0  ;;  %2073 = vmatprep.subr.bf16.mxu1 %v5680_v15  ;;  %v1573_v42 = vadd.f32 %v6628_v50, %v1523_v23  ;;  %v5684_v14 = vld [vmem:[%s7903_s3 + $0x50] ss:$8 sps:$4 sm:$0xff]  }
 0x1b7   : > { %v1526_v43 = vmul.f32 %v6631_v51, %v1476_v38  ;;  %v1381_v44 = vadd.f32 %v6602_v24, %v1274_v39  ;;  %v1276_v47 = vpop.f32.mrb[17].mxu0  ;;  %v1574_v53 = vadd.f32 %v6639_v60, %v1524_v31 }
 0x1b8   : > { %v1382_v54 = vadd.f32 %v6607_v26, %v1276_v47  ;;  %v1278_v55 = vpop.f32.mrb[18].mxu0  ;;  %v1635_v56 = vpack.c.bf16 %v1573_v42, %v1569_v41  ;;  %v6725_v59 = vadd.f32 %v6628_v50, %v1525_v37 }
 0x1b9   : > { %vm1413_vm1 = vcmp.gt.f32.partialorder %v1381_v44, 0.0  ;;  %v1445_v61 = vmul.f32 0.2, %v1381_v44  ;;  %v1383_v62 = vadd.f32 %v6602_v24, %v1278_v55  ;;  %2074 = vmatpush1.bf16.msra.mxu1 %v5678_v33  ;;  %v1280_v63 = vpop.f32.mrb[19].mxu0  ;;  %v1636_v0 = vpack.c.bf16 %v1574_v53, %v1570_v52 }
 0x1ba   : > { %vm1414_vm2 = vcmp.gt.f32.partialorder %v1382_v54, 0.0  ;;  %v1446_v2 = vmul.f32 0.2, %v1382_v54  ;;  %v1384_v3 = vadd.f32 %v6607_v26, %v1280_v63  ;;  %2075 = vmatprep.subr.bf16.mxu1 %v5683_v40  ;;  %v6736_v5 = vadd.f32 %v6639_v60, %v1526_v43 }
 0x1bb   : > { %vm1415_vm3 = vcmp.gt.f32.partialorder %v1383_v62, 0.0  ;;  %v1447_v6 = vmul.f32 0.2, %v1383_v62  ;;  %1876 = vmatprep.mubr.bf16.mxu1 %v1636_v0  ;;  %v2142_v9 = vpack.c.bf16 %v6725_v59, %v6691_v7  ;;  %v1477_v10 = vsel %vm1413_vm1, %v1381_v44, %v1445_v61  ;;  %v5687_v44 = vld [vmem:[%s7903_s3 + $0x60] ss:$8 sps:$4 sm:$0xff]  }
 0x1bc   : > { %vm1416_vm4 = vcmp.gt.f32.partialorder %v1384_v3, 0.0  ;;  %v1448_v34 = vmul.f32 0.2, %v1384_v3  ;;  %1877 = vmatmul.mubr.bf16.gmra.mrb[4].mxu1 %v1635_v56  ;;  %v1478_v11 = vsel %vm1414_vm2, %v1382_v54, %v1446_v2  ;;  %v2143_v15 = vpack.c.bf16 %v6736_v5, %v6698_v12  ;;  %v5692_v54 = vld [vmem:[%s7903_s3 + $0x74] ss:$8 sps:$4 sm:$0xff]  }
 0x1bd   : > { %v1479_v13 = vsel %vm1415_vm3, %v1383_v62, %v1447_v6  ;;  %2076 = vmatpush1.bf16.msra.mxu1 %v5681_v1  ;;  %v1527_v33 = vmul.f32 %v6623_v45, %v1477_v10  ;;  %v1528_v37 = vmul.f32 %v6631_v51, %v1478_v11  ;;  %v5765_v2 = vld [vmem:[%s7905_s5 + $0x100] ss:$8 sps:$4 sm:$0xff]   ;;  %v5690_v6 = vld [vmem:[%s7903_s3 + $0x70] ss:$8 sps:$4 sm:$0xff]   ;;  %v5770_v10 = vld [vmem:[%s7905_s5 + $0x114] ss:$8 sps:$4 sm:$0xff]  }
 0x1be   : > { %v1529_v18 = vmul.f32 %v6623_v45, %v1479_v13  ;;  %v1480_v20 = vsel %vm1416_vm4, %v1384_v3, %v1448_v34  ;;  %v1284_v23 = vpop.f32.mrb[20].mxu0  ;;  %2077 = vmatprep.subr.bf16.mxu1 %v5686_v4  ;;  %v5767_v34 = vld [vmem:[%s7905_s5 + $0x104] ss:$8 sps:$4 sm:$0xff]   ;;  %v5801_v7 = vld [vmem:[%s7905_s5 + $0x1c0] ss:$8 sps:$4 sm:$0xff]  }
 0x1bf   : > { %v1530_v30 = vmul.f32 %v6631_v51, %v1480_v20  ;;  %v1385_v31 = vadd.f32 %v6602_v24, %v1284_v23  ;;  %v1286_v32 = vpop.f32.mrb[21].mxu0  ;;  %v1577_v20 = vadd.f32 %v6628_v50, %v1527_v33  ;;  %2815 = vmatprep.subr.bf16.mxu0 %v5767_v34  ;;  %v5771_v34 = vld [vmem:[%s7905_s5 + $0x120] ss:$8 sps:$4 sm:$0xff]   ;;  %v5806_v12 = vld [vmem:[%s7905_s5 + $0x1d4] ss:$8 sps:$4 sm:$0xff]  }
 0x1c0   : > { %v1386_v38 = vadd.f32 %v6607_v26, %v1286_v32  ;;  %v1288_v39 = vpop.f32.mrb[22].mxu0  ;;  %v6756_v40 = vadd.f32 %v6628_v50, %v1529_v18  ;;  %v5695_v18 = vld [vmem:[%s7903_s3 + $0x84] ss:$8 sps:$4 sm:$0xff]   ;;  %v1578_v32 = vadd.f32 %v6639_v60, %v1528_v37  ;;  %2816 = vmatpush1.bf16.msra.mxu0 %v5765_v2 }
 0x1c1   : > { %vm1417_vm5 = vcmp.gt.f32.partialorder %v1385_v31, 0.0  ;;  %v1449_v41 = vmul.f32 0.2, %v1385_v31  ;;  %v1387_v42 = vadd.f32 %v6602_v24, %v1288_v39  ;;  %2078 = vmatpush1.bf16.msra.mxu1 %v5684_v14  ;;  %v1290_v43 = vpop.f32.mrb[23].mxu0  ;;  %v6763_v47 = vadd.f32 %v6639_v60, %v1530_v30  ;;  %2817 = vmatprep.subr.bf16.mxu0 %v5770_v10 }
 0x1c2   : > { %vm1418_vm6 = vcmp.gt.f32.partialorder %v1386_v38, 0.0  ;;  %v1450_v52 = vmul.f32 0.2, %v1386_v38  ;;  %v1388_v53 = vadd.f32 %v6607_v26, %v1290_v43  ;;  %2079 = vmatprep.subr.bf16.mxu1 %v5689_v27  ;;  %v1597_v55 = vpack.c.bf16 %v6756_v40, %v6725_v59  ;;  %v5804_v59 = vld [vmem:[%s7905_s5 + $0x1d0] ss:$8 sps:$4 sm:$0xff]  }
 0x1c3   : > { %v1481_v56 = vsel %vm1417_vm5, %v1385_v31, %v1449_v41  ;;  %vm1419_vm7 = vcmp.gt.f32.partialorder %v1387_v42, 0.0  ;;  %v1451_v61 = vmul.f32 0.2, %v1387_v42  ;;  %v1598_v62 = vpack.c.bf16 %v6763_v47, %v6736_v5  ;;  %v5809_v5 = vld [vmem:[%s7905_s5 + $0x1e4] ss:$8 sps:$4 sm:$0xff]  }
 0x1c4   : > { %v1531_v63 = vmul.f32 %v6623_v45, %v1481_v56  ;;  %v1482_v0 = vsel %vm1418_vm6, %v1386_v38, %v1450_v52  ;;  %vm1420_vm8 = vcmp.gt.f32.partialorder %v1388_v53, 0.0  ;;  %v1452_v1 = vmul.f32 0.2, %v1388_v53  ;;  %v5773_v56 = vld [vmem:[%s7905_s5 + $0x124] ss:$8 sps:$4 sm:$0xff]  }
 0x1c5   : > { %v1532_v3 = vmul.f32 %v6631_v51, %v1482_v0  ;;  %v1483_v4 = vsel %vm1419_vm7, %v1387_v42, %v1451_v61  ;;  %2080 = vmatpush1.bf16.msra.mxu1 %v5687_v44  ;;  %v5693_v42 = vld [vmem:[%s7903_s3 + $0x80] ss:$8 sps:$4 sm:$0xff]   ;;  %v5768_v44 = vld [vmem:[%s7905_s5 + $0x110] ss:$8 sps:$4 sm:$0xff]   ;;  %v5698_v0 = vld [vmem:[%s7903_s3 + $0x94] ss:$8 sps:$4 sm:$0xff]  }
 0x1c6   : > { %v1533_v11 = vmul.f32 %v6623_v45, %v1483_v4  ;;  %v1484_v13 = vsel %vm1420_vm8, %v1388_v53, %v1452_v1  ;;  %v1294_v14 = vpop.f32.mrb[24].mxu0  ;;  %2081 = vmatprep.subr.bf16.mxu1 %v5692_v54  ;;  %v1581_v23 = vadd.f32 %v6628_v50, %v1531_v63  ;;  %2818 = vmatpush1.bf16.msra.mxu0 %v5768_v44  ;;  %v5699_v44 = vld [vmem:[%s7903_s3 + $0xa0] ss:$8 sps:$4 sm:$0xff]  }
 0x1c7   : > { %v1534_v27 = vmul.f32 %v6631_v51, %v1484_v13  ;;  %v1389_v30 = vadd.f32 %v6602_v24, %v1294_v14  ;;  %v1296_v31 = vpop.f32.mrb[25].mxu0  ;;  %v1582_v38 = vadd.f32 %v6639_v60, %v1532_v3  ;;  %v5696_v13 = vld [vmem:[%s7903_s3 + $0x90] ss:$8 sps:$4 sm:$0xff]   ;;  %2819 = vmatprep.subr.bf16.mxu0 %v5773_v56 }
 0x1c8   : > { %v1390_v39 = vadd.f32 %v6607_v26, %v1296_v31  ;;  %v1298_v41 = vpop.f32.mrb[26].mxu0  ;;  %v1637_v33 = vpack.c.bf16 %v1581_v23, %v1577_v20  ;;  %v6802_v43 = vadd.f32 %v6628_v50, %v1533_v11 }
 0x1c9   : > { %vm1421_vm9 = vcmp.gt.f32.partialorder %v1389_v30, 0.0  ;;  %v1453_v37 = vmul.f32 0.2, %v1389_v30  ;;  %v1391_v52 = vadd.f32 %v6602_v24, %v1298_v41  ;;  %2082 = vmatpush1.bf16.msra.mxu1 %v5690_v6  ;;  %v1300_v53 = vpop.f32.mrb[27].mxu0  ;;  %v1638_v54 = vpack.c.bf16 %v1582_v38, %v1578_v32 }
 0x1ca   : > { %vm1422_vm10 = vcmp.gt.f32.partialorder %v1390_v39, 0.0  ;;  %v1454_v61 = vmul.f32 0.2, %v1390_v39  ;;  %v1392_v63 = vadd.f32 %v6607_v26, %v1300_v53  ;;  %2083 = vmatprep.subr.bf16.mxu1 %v5695_v18  ;;  %v6816_v1 = vadd.f32 %v6639_v60, %v1534_v27  ;;  %v5776_v18 = vld [vmem:[%s7905_s5 + $0x134] ss:$8 sps:$4 sm:$0xff]   ;;  %2820 = vmatpush1.bf16.msra.mxu0 %v5771_v34 }
 0x1cb   : > { %vm1423_vm11 = vcmp.gt.f32.partialorder %v1391_v52, 0.0  ;;  %v1455_v2 = vmul.f32 0.2, %v1391_v52  ;;  %1886 = vmatprep.mubr.bf16.mxu1 %v1638_v54  ;;  %v2144_v3 = vpack.c.bf16 %v6802_v43, %v6756_v40  ;;  %v1485_v4 = vsel %vm1421_vm9, %v1389_v30, %v1453_v37  ;;  %v5701_v30 = vld [vmem:[%s7903_s3 + $0xa4] ss:$8 sps:$4 sm:$0xff]   ;;  %2821 = vmatprep.subr.bf16.mxu0 %v5776_v18 }
 0x1cc   : > { %vm1424_vm12 = vcmp.gt.f32.partialorder %v1392_v63, 0.0  ;;  %v1456_v6 = vmul.f32 0.2, %v1392_v63  ;;  %1887 = vmatmul.mubr.bf16.gmra.mrb[8].mxu1 %v1637_v33  ;;  %v1486_v10 = vsel %vm1422_vm10, %v1390_v39, %v1454_v61  ;;  %v2145_v14 = vpack.c.bf16 %v6816_v1, %v6763_v47  ;;  %v5810_v40 = vld [vmem:[%s7905_s5 + $0x1f0] ss:$8 sps:$4 sm:$0xff]  }
 0x1cd   : > { %v1487_v11 = vsel %vm1423_vm11, %v1391_v52, %v1455_v2  ;;  %2084 = vmatpush1.bf16.msra.mxu1 %v5693_v42  ;;  %v1535_v39 = vmul.f32 %v6623_v45, %v1485_v4  ;;  %v1536_v41 = vmul.f32 %v6631_v51, %v1486_v10  ;;  %v5774_v52 = vld [vmem:[%s7905_s5 + $0x130] ss:$8 sps:$4 sm:$0xff]   ;;  %v5704_v4 = vld [vmem:[%s7903_s3 + $0xb4] ss:$8 sps:$4 sm:$0xff]   ;;  %v5815_v47 = vld [vmem:[%s7905_s5 + $0x4] ss:$8 sps:$4 sm:$0xff]  }
 0x1ce   : > { %v1537_v20 = vmul.f32 %v6623_v45, %v1487_v11  ;;  %v1488_v23 = vsel %vm1424_vm12, %v1392_v63, %v1456_v6  ;;  %v1304_v27 = vpop.f32.mrb[28].mxu0  ;;  %2085 = vmatprep.subr.bf16.mxu1 %v5698_v0  ;;  %v5779_v63 = vld [vmem:[%s7905_s5 + $0x144] ss:$8 sps:$4 sm:$0xff]   ;;  %2822 = vmatpush1.bf16.msra.mxu0 %v5774_v52 }
 0x1cf   : > { %v1538_v31 = vmul.f32 %v6631_v51, %v1488_v23  ;;  %v1393_v32 = vadd.f32 %v6602_v24, %v1304_v27  ;;  %v1306_v38 = vpop.f32.mrb[29].mxu0  ;;  %v5702_v27 = vld [vmem:[%s7903_s3 + $0xb0] ss:$8 sps:$4 sm:$0xff]   ;;  %2823 = vmatprep.subr.bf16.mxu0 %v5779_v63  ;;  %v1586_v52 = vadd.f32 %v6639_v60, %v1536_v41 }
 0x1d0   : > { %v1394_v42 = vadd.f32 %v6607_v26, %v1306_v38  ;;  %v1308_v33 = vpop.f32.mrb[30].mxu0  ;;  %v6846_v37 = vadd.f32 %v6628_v50, %v1537_v20  ;;  %v5707_v38 = vld [vmem:[%s7903_s3 + $0xc4] ss:$8 sps:$4 sm:$0xff]  }
 0x1d1   : > { %vm1425_vm13 = vcmp.gt.f32.partialorder %v1393_v32, 0.0  ;;  %v1457_v53 = vmul.f32 0.2, %v1393_v32  ;;  %v1395_v54 = vadd.f32 %v6602_v24, %v1308_v33  ;;  %2086 = vmatpush1.bf16.msra.mxu1 %v5696_v13  ;;  %v1310_v56 = vpop.f32.mrb[31].mxu0  ;;  %v6853_v61 = vadd.f32 %v6639_v60, %v1538_v31 }
 0x1d2   : > { %vm1426_vm14 = vcmp.gt.f32.partialorder %v1394_v42, 0.0  ;;  %v1458_v0 = vmul.f32 0.2, %v1394_v42  ;;  %v1396_v2 = vadd.f32 %v6607_v26, %v1310_v56  ;;  %2087 = vmatprep.subr.bf16.mxu1 %v5701_v30  ;;  %v1599_v24 = vpack.c.bf16 %v6846_v37, %v6802_v43  ;;  %v5777_v26 = vld [vmem:[%s7905_s5 + $0x140] ss:$8 sps:$4 sm:$0xff]  }
 0x1d3   : > { %v1489_v6 = vsel %vm1425_vm13, %v1393_v32, %v1457_v53  ;;  %vm1427_vm15 = vcmp.gt.f32.partialorder %v1395_v54, 0.0  ;;  %v1459_v34 = vmul.f32 0.2, %v1395_v54  ;;  %v1600_v10 = vpack.c.bf16 %v6853_v61, %v6816_v1  ;;  %v5782_v30 = vld [vmem:[%s7905_s5 + $0x154] ss:$8 sps:$4 sm:$0xff]   ;;  %2824 = vmatpush1.bf16.msra.mxu0 %v5777_v26 }
 0x1d4   : > { %v1539_v11 = vmul.f32 %v6623_v45, %v1489_v6  ;;  %v1490_v13 = vsel %vm1426_vm14, %v1394_v42, %v1458_v0  ;;  %vm1428_vm0 = vcmp.gt.f32.partialorder %v1396_v2, 0.0  ;;  %v1460_v18 = vmul.f32 0.2, %v1396_v2  ;;  %2825 = vmatprep.subr.bf16.mxu0 %v5782_v30  ;;  %v5785_v0 = vld [vmem:[%s7905_s5 + $0x164] ss:$8 sps:$4 sm:$0xff]  }
 0x1d5   : > { %v1540_v20 = vmul.f32 %v6631_v51, %v1490_v13  ;;  %v1491_v23 = vsel %vm1427_vm15, %v1395_v54, %v1459_v34  ;;  %2088 = vmatpush1.bf16.msra.mxu1 %v5699_v44  ;;  %v1585_v42 = vadd.f32 %v6628_v50, %v1535_v39  ;;  %v5705_v39 = vld [vmem:[%s7903_s3 + $0xc0] ss:$8 sps:$4 sm:$0xff]   ;;  %v5708_v6 = vld [vmem:[%s7903_s3 + $0xd0] ss:$8 sps:$4 sm:$0xff]   ;;  %v5788_v34 = vld [vmem:[%s7905_s5 + $0x174] ss:$8 sps:$4 sm:$0xff]  }
 0x1d6   : > { %v1541_v31 = vmul.f32 %v6623_v45, %v1491_v23  ;;  %v1492_v32 = vsel %vm1428_vm0, %v1396_v2, %v1460_v18  ;;  %2089 = vmatprep.subr.bf16.mxu1 %v5704_v4  ;;  %v1589_v33 = vadd.f32 %v6628_v50, %v1539_v11  ;;  %v5780_v45 = vld [vmem:[%s7905_s5 + $0x150] ss:$8 sps:$4 sm:$0xff]   ;;  %v1594_v2 = vpack.c.bf16 %v6671_v48, %v6116_v8  ;;  %v5783_v4 = vld [vmem:[%s7905_s5 + $0x160] ss:$8 sps:$4 sm:$0xff]   ;;  %v5713_v11 = vld [vmem:[%s7903_s3 + $0xe4] ss:$8 sps:$4 sm:$0xff]  }
 0x1d7   : > { %v1542_v44 = vmul.f32 %v6631_v51, %v1492_v32  ;;  %v1590_v53 = vadd.f32 %v6639_v60, %v1540_v20  ;;  %2826 = vmatpush1.bf16.msra.mxu0 %v5780_v45  ;;  %v5786_v13 = vld [vmem:[%s7905_s5 + $0x170] ss:$8 sps:$4 sm:$0xff]   ;;  %v5711_v18 = vld [vmem:[%s7903_s3 + $0xe0] ss:$8 sps:$4 sm:$0xff]   ;;  %v5791_v26 = vld [vmem:[%s7905_s5 + $0x184] ss:$8 sps:$4 sm:$0xff]  }
 0x1d8   : > { %v1639_v54 = vpack.c.bf16 %v1589_v33, %v1585_v42  ;;  %v6887_v56 = vadd.f32 %v6628_v50, %v1541_v31  ;;  %v5710_v50 = vld [vmem:[%s7903_s3 + $0xd4] ss:$8 sps:$4 sm:$0xff]   ;;  %2827 = vmatprep.subr.bf16.mxu0 %v5785_v0  ;;  %v5789_v23 = vld [vmem:[%s7905_s5 + $0x180] ss:$8 sps:$4 sm:$0xff]   ;;  %v5719_v31 = vld [vmem:[%s7903_s3 + $0x204] ss:$8 sps:$4 sm:$0xff]   ;;  %v1593_v42 = vpack.c.bf16 %v6635_v57, %v6116_v8 }
 0x1d9   : > { %2090 = vmatpush1.bf16.msra.mxu1 %v5702_v27  ;;  %v1640_v63 = vpack.c.bf16 %v1590_v53, %v1586_v52  ;;  %v6896_v51 = vadd.f32 %v6639_v60, %v1542_v44  ;;  %v5716_v20 = vld [vmem:[%s7903_s3 + $0xf4] ss:$8 sps:$4 sm:$0xff]   ;;  %v5714_v27 = vld [vmem:[%s7903_s3 + $0xf0] ss:$8 sps:$4 sm:$0xff]   ;;  %v5797_v44 = vld [vmem:[%s7905_s5 + $0x1a4] ss:$8 sps:$4 sm:$0xff]  }
 0x1da   : > { %2091 = vmatprep.subr.bf16.mxu1 %v5707_v38  ;;  %v2146_v41 = vpack.c.bf16 %v6887_v56, %v6846_v37  ;;  %v5794_v30 = vld [vmem:[%s7905_s5 + $0x194] ss:$8 sps:$4 sm:$0xff]   ;;  %v5792_v32 = vld [vmem:[%s7905_s5 + $0x190] ss:$8 sps:$4 sm:$0xff]   ;;  %v5717_v38 = vld [vmem:[%s7903_s3 + $0x200] ss:$8 sps:$4 sm:$0xff]  }
 0x1db   : > { %1896 = vmatprep.mubr.bf16.mxu1 %v1640_v63  ;;  %v2147_v60 = vpack.c.bf16 %v6896_v51, %v6853_v61  ;;  %2828 = vmatpush1.bf16.msra.mxu0 %v5783_v4  ;;  %v5722_v33 = vld [vmem:[%s7903_s3 + $0x214] ss:$8 sps:$4 sm:$0xff]   ;;  %v5795_v52 = vld [vmem:[%s7905_s5 + $0x1a0] ss:$8 sps:$4 sm:$0xff]   ;;  %v5720_v53 = vld [vmem:[%s7903_s3 + $0x210] ss:$8 sps:$4 sm:$0xff]  }
 0x1dc   : > { %1897 = vmatmul.mubr.bf16.gmra.mrb[12].mxu1 %v1639_v54  ;;  %2829 = vmatprep.subr.bf16.mxu0 %v5788_v34  ;;  %v5725_v54 = vld [vmem:[%s7903_s3 + $0x224] ss:$8 sps:$4 sm:$0xff]   ;;  %v5723_v45 = vld [vmem:[%s7903_s3 + $0x220] ss:$8 sps:$4 sm:$0xff]   ;;  %v5726_v63 = vld [vmem:[%s7903_s3 + $0x230] ss:$8 sps:$4 sm:$0xff]  }
 0x1dd   : > { %2092 = vmatpush1.bf16.msra.mxu1 %v5705_v39  ;;  %2099 = vmatprep.mubr.bf16.mxu1 %v1594_v2  ;;  %v5731_v39 = vld [vmem:[%s7903_s3 + $0x244] ss:$8 sps:$4 sm:$0xff]   ;;  %v5735_v2 = vld [vmem:[%s7903_s3 + $0x260] ss:$8 sps:$4 sm:$0xff]   ;;  %v5744_v48 = vld [vmem:[%s7903_s3 + $0x290] ss:$8 sps:$4 sm:$0xff]  }
 0x1de   : > { %2093 = vmatprep.subr.bf16.mxu1 %v5710_v50  ;;  %v5729_v50 = vld [vmem:[%s7903_s3 + $0x240] ss:$8 sps:$4 sm:$0xff]   ;;  %v5737_v0 = vld [vmem:[%s7903_s3 + $0x264] ss:$8 sps:$4 sm:$0xff]   ;;  %v5752_v34 = vld [vmem:[%s7903_s3 + $0x2b4] ss:$8 sps:$4 sm:$0xff]  }
 0x1df   : > { %2830 = vmatpush1.bf16.msra.mxu0 %v5786_v13  ;;  %v5743_v4 = vld [vmem:[%s7903_s3 + $0x284] ss:$8 sps:$4 sm:$0xff]   ;;  %v5800_v57 = vld [vmem:[%s7905_s5 + $0x1b4] ss:$8 sps:$4 sm:$0xff]  }
 0x1e0   : > { %2831 = vmatprep.subr.bf16.mxu0 %v5791_v26  ;;  %v5755_v13 = vld [vmem:[%s7903_s3 + $0x2c4] ss:$8 sps:$4 sm:$0xff]   ;;  %v5758_v26 = vld [vmem:[%s7903_s3 + $0x2d4] ss:$8 sps:$4 sm:$0xff]  }
 0x1e1   : > { %2094 = vmatpush1.bf16.msra.mxu1 %v5708_v6  ;;  %v5741_v6 = vld [vmem:[%s7903_s3 + $0x280] ss:$8 sps:$4 sm:$0xff]  }
 0x1e2   : > { %2095 = vmatprep.subr.bf16.mxu1 %v5713_v11  ;;  %v5750_v11 = vld [vmem:[%s7903_s3 + $0x2b0] ss:$8 sps:$4 sm:$0xff]   ;;  %v2430_v43 = vld [vmem:[%s7904_s4] sm:$0x77] }
 0x1e3   : > { %2832 = vmatpush1.bf16.msra.mxu0 %v5789_v23  ;;  %v5761_v23 = vld [vmem:[%s7903_s3 + $0x2e4] ss:$8 sps:$4 sm:$0xff]   ;;  %v2435_v1 = vrot.slane %v2430_v43, %v6592_v19 }
 0x1e4   : > { %2833 = vmatprep.subr.bf16.mxu0 %v5794_v30  ;;  %v5764_v30 = vld [vmem:[%s7903_s3 + $0x2f4] ss:$8 sps:$4 sm:$0xff]  }
 0x1e5   : > { %2096 = vmatpush1.bf16.msra.mxu1 %v5711_v18  ;;  %v5753_v18 = vld [vmem:[%s7903_s3 + $0x2c0] ss:$8 sps:$4 sm:$0xff]  }
 0x1e6   : > { %2097 = vmatprep.subr.bf16.mxu1 %v5716_v20  ;;  %v5756_v20 = vld [vmem:[%s7903_s3 + $0x2d0] ss:$8 sps:$4 sm:$0xff]  }
 0x1e7   : > { %2834 = vmatpush1.bf16.msra.mxu0 %v5792_v32 }
 0x1e8   : > { %2835 = vmatprep.subr.bf16.mxu0 %v5797_v44  ;;  %v2551_v44 = vrot.slane %v2430_v43, %v6609_v28 }
 0x1e9   : > { %2098 = vmatpush1.bf16.msra.mxu1 %v5714_v27  ;;  %v5759_v27 = vld [vmem:[%s7903_s3 + $0x2e0] ss:$8 sps:$4 sm:$0xff]  }
 0x1ea   : > { %2341 = vmatprep.subr.bf16.mxu1 %v5719_v31  ;;  %v5762_v31 = vld [vmem:[%s7903_s3 + $0x2f0] ss:$8 sps:$4 sm:$0xff]  }
 0x1eb   : > { %2836 = vmatpush1.bf16.msra.mxu0 %v5795_v52  ;;  %v2521_v52 = vrot.slane %v2430_v43, %v6611_v29 }
 0x1ec   : > { %2100 = vmatmul.mubr.bf16.vlgmr.msra.gmra.mrb[0].mxu1 %v1593_v42  ;;  %2837 = vmatprep.subr.bf16.mxu0 %v5800_v57 }
 0x1ed   : > { %2109 = vmatprep.mubr.bf16.mxu1 %v1596_v22  ;;  %2342 = vmatpush1.bf16.msra.mxu1 %v5717_v38  ;;  %v5728_v22 = vld [vmem:[%s7903_s3 + $0x234] ss:$8 sps:$4 sm:$0xff]  }
 0x1ee   : > { %2343 = vmatprep.subr.bf16.mxu1 %v5722_v33 }
 0x1ef   : > { %2838 = vmatpush1.bf16.msra.mxu0 %v5798_v35 }
 0x1f1   : > { %2344 = vmatpush1.bf16.msra.mxu1 %v5720_v53 }
 0x1f2   : > { %2345 = vmatprep.subr.bf16.mxu1 %v5725_v54 }
 0x1f4   : > { %2110 = vmatmul.mubr.bf16.gmra.mrb[4].mxu1 %v1595_v16  ;;  %v5734_v16 = vld [vmem:[%s7903_s3 + $0x254] ss:$8 sps:$4 sm:$0xff]  }
 0x1f5   : > { %2119 = vmatprep.mubr.bf16.mxu1 %v1598_v62  ;;  %2346 = vmatpush1.bf16.msra.mxu1 %v5723_v45  ;;  %v5732_v62 = vld [vmem:[%s7903_s3 + $0x250] ss:$8 sps:$4 sm:$0xff]  }
 0x1f6   : > { %2347 = vmatprep.subr.bf16.mxu1 %v5728_v22 }
 0x1f9   : > { %2348 = vmatpush1.bf16.msra.mxu1 %v5726_v63  ;;  %v2555_v63 = vrot.slane %v2430_v43, %v6616_v36 }
 0x1fa   : > { %2349 = vmatprep.subr.bf16.mxu1 %v5731_v39 }
 0x1fc   : > { %2120 = vmatmul.mubr.bf16.gmra.mrb[8].mxu1 %v1597_v55  ;;  %v5740_v55 = vld [vmem:[%s7903_s3 + $0x274] ss:$8 sps:$4 sm:$0xff]  }
 0x1fd   : > { %2129 = vmatprep.mubr.bf16.mxu1 %v1600_v10  ;;  %2350 = vmatpush1.bf16.msra.mxu1 %v5729_v50  ;;  %v5738_v10 = vld [vmem:[%s7903_s3 + $0x270] ss:$8 sps:$4 sm:$0xff]  }
 0x1fe   : > { %2351 = vmatprep.subr.bf16.mxu1 %v5734_v16  ;;  %v7148_v16 = vrot.slane %v2551_v44, %v6609_v28 }
 0x201   : > { %2352 = vmatpush1.bf16.msra.mxu1 %v5732_v62  ;;  %v7151_v62 = vrot.slane %v2521_v52, %v6604_v25  ;;  %v5813_v52 = vld [vmem:[%s7905_s5] ss:$8 sps:$4 sm:$0xff]  }
 0x202   : > { %2353 = vmatprep.subr.bf16.mxu1 %v5737_v0 }
 0x204   : > { %2130 = vmatmul.mubr.bf16.gmra.mrb[12].mxu1 %v1599_v24  ;;  %v5747_v24 = vld [vmem:[%s7903_s3 + $0x2a0] ss:$8 sps:$4 sm:$0xff]  }
 0x205   : > { %2354 = vmatpush1.bf16.msra.mxu1 %v5735_v2  ;;  %2373 = vmatprep.mubr.bf16.mxu1 %v2141_v58  ;;  %v5749_v58 = vld [vmem:[%s7903_s3 + $0x2a4] ss:$8 sps:$4 sm:$0xff]  }
 0x206   : > { %2355 = vmatprep.subr.bf16.mxu1 %v5740_v55 }
 0x209   : > { %2356 = vmatpush1.bf16.msra.mxu1 %v5738_v10 }
 0x20a   : > { %2357 = vmatprep.subr.bf16.mxu1 %v5743_v4 }
 0x20d   : > { %2358 = vmatpush1.bf16.msra.mxu1 %v5741_v6 }
 0x20e   : > { %2359 = vmatprep.subr.bf16.mxu1 %v5746_v46 }
 0x211   : > { %2360 = vmatpush1.bf16.msra.mxu1 %v5744_v48 }
 0x212   : > { %2361 = vmatprep.subr.bf16.mxu1 %v5749_v58 }
 0x215   : > { %2362 = vmatpush1.bf16.msra.mxu1 %v5747_v24  ;;  %v7160_v24 = vrot.slane %v2555_v63, %v6609_v28 }
 0x216   : > { %2363 = vmatprep.subr.bf16.mxu1 %v5752_v34 }
 0x219   : > { %2364 = vmatpush1.bf16.msra.mxu1 %v5750_v11 }
 0x21a   : > { %2365 = vmatprep.subr.bf16.mxu1 %v5755_v13 }
 0x21d   : > { %2366 = vmatpush1.bf16.msra.mxu1 %v5753_v18 }
 0x21e   : > { %2367 = vmatprep.subr.bf16.mxu1 %v5758_v26 }
 0x221   : > { %2368 = vmatpush1.bf16.msra.mxu1 %v5756_v20 }
 0x222   : > { %2369 = vmatprep.subr.bf16.mxu1 %v5761_v23 }
 0x225   : > { %2370 = vmatpush1.bf16.msra.mxu1 %v5759_v27 }
 0x226   : > { %2371 = vmatprep.subr.bf16.mxu1 %v5764_v30 }
 0x229   : > { %2372 = vmatpush1.bf16.msra.mxu1 %v5762_v31 }
 0x22c   : > { %2374 = vmatmul.mubr.bf16.vlgmr.msra.gmra.mrb[0].mxu1 %v2140_v49  ;;  %v5803_v49 = vld [vmem:[%s7905_s5 + $0x1c4] ss:$8 sps:$4 sm:$0xff]  }
 0x22d   : > { %2383 = vmatprep.mubr.bf16.mxu1 %v2143_v15  ;;  %2839 = vmatprep.subr.bf16.mxu0 %v5803_v49  ;;  %v5812_v15 = vld [vmem:[%s7905_s5 + $0x1f4] ss:$8 sps:$4 sm:$0xff]  }
 0x22e   : > { %2840 = vmatpush1.bf16.msra.mxu0 %v5801_v7 }
 0x22f   : > { %2841 = vmatprep.subr.bf16.mxu0 %v5806_v12 }
 0x232   : > { %2842 = vmatpush1.bf16.msra.mxu0 %v5804_v59 }
 0x233   : > { %2843 = vmatprep.subr.bf16.mxu0 %v5809_v5 }
 0x234   : > { %2384 = vmatmul.mubr.bf16.gmra.mrb[4].mxu1 %v2142_v9  ;;  %v5807_v9 = vld [vmem:[%s7905_s5 + $0x1e0] ss:$8 sps:$4 sm:$0xff]  }
 0x235   : > { %2393 = vmatprep.mubr.bf16.mxu1 %v2145_v14  ;;  %v7131_v14 = vrot.slane %v2435_v1, %v6592_v19 }
 0x236   : > { %2844 = vmatpush1.bf16.msra.mxu0 %v5807_v9 }
 0x237   : > { %2845 = vmatprep.subr.bf16.mxu0 %v5812_v15 }
 0x23a   : > { %2846 = vmatpush1.bf16.msra.mxu0 %v5810_v40 }
 0x23b   : > { %3028 = vmatprep.subr.bf16.mxu0 %v5815_v47 }
 0x23c   : > { %2394 = vmatmul.mubr.bf16.gmra.mrb[8].mxu1 %v2144_v3  ;;  %v2439_v3 = vrot.slane %v2430_v43, %v6597_v21 }
 0x23d   : > { %2403 = vmatprep.mubr.bf16.mxu1 %v2147_v60 }
 0x23e   : > { %v7134_v37 = vrot.slane %v2439_v3, %v6592_v19 }
 0x244   : > { %2404 = vmatmul.mubr.bf16.gmra.mrb[12].mxu1 %v2146_v41  ;;  %v2517_v41 = vrot.slane %v2430_v43, %v6604_v25 }
 0x246   : > { %v7144_v22 = vrot.slane %v2517_v41, %v6604_v25 }
 0x2ff   : > { %v2375_v61 = vpop.f32.mrb[0].mxu1 }
 0x300   : > { %v2450_v56 = vadd.f32 %v7131_v14, %v2375_v61  ;;  %v2377_v51 = vpop.f32.mrb[1].mxu1 }
 0x301   : > { %v2451_v60 = vadd.f32 %v7134_v37, %v2377_v51  ;;  %v2379_v32 = vpop.f32.mrb[2].mxu1 }
 0x302   : > { %v2452_v38 = vadd.f32 %v7131_v14, %v2379_v32  ;;  %v2381_v42 = vpop.f32.mrb[3].mxu1  ;;  %vm2466_vm1 = vcmp.gt.f32.partialorder %v2450_v56, 0.0  ;;  %v2482_v33 = vmul.f32 0.2, %v2450_v56 }
 0x303   : > { %v2483_v53 = vmul.f32 0.2, %v2451_v60  ;;  %v2453_v45 = vadd.f32 %v7134_v37, %v2381_v42  ;;  %vm2467_vm3 = vcmp.gt.f32.partialorder %v2451_v60, 0.0 }
 0x304   : > { %vm2468_vm2 = vcmp.gt.f32.partialorder %v2452_v38, 0.0  ;;  %v2484_v54 = vmul.f32 0.2, %v2452_v38  ;;  %v2498_v50 = vsel %vm2466_vm1, %v2450_v56, %v2482_v33 }
 0x305   : > { %v2499_v55 = vsel %vm2467_vm3, %v2451_v60, %v2483_v53  ;;  %v2485_v10 = vmul.f32 0.2, %v2453_v45  ;;  %vm2469_vm4 = vcmp.gt.f32.partialorder %v2453_v45, 0.0  ;;  %v2532_v34 = vmul.f32 %v7144_v22, %v2498_v50 }
 0x306   : > { %v2500_v39 = vsel %vm2468_vm2, %v2452_v38, %v2484_v54  ;;  %v2533_v26 = vmul.f32 %v7151_v62, %v2499_v55 }
 0x307   : > { %v2534_v0 = vmul.f32 %v7144_v22, %v2500_v39  ;;  %v2385_v2 = vpop.f32.mrb[4].mxu1  ;;  %v2501_v27 = vsel %vm2469_vm4, %v2453_v45, %v2485_v10  ;;  %v2566_v7 = vadd.f32 %v7148_v16, %v2532_v34  ;;  %v5818_v45 = vld [vmem:[%s7905_s5 + $0x14] ss:$8 sps:$4 sm:$0xff]  }
 0x308   : > { %v2454_v4 = vadd.f32 %v7131_v14, %v2385_v2  ;;  %v2387_v6 = vpop.f32.mrb[5].mxu1  ;;  %v2535_v5 = vmul.f32 %v7151_v62, %v2501_v27  ;;  %v2567_v61 = vadd.f32 %v7160_v24, %v2533_v26 }
 0x309   : > { %v7156_v46 = vadd.f32 %v7148_v16, %v2534_v0  ;;  %v2455_v48 = vadd.f32 %v7134_v37, %v2387_v6  ;;  %v2389_v58 = vpop.f32.mrb[6].mxu1  ;;  %v5816_v6 = vld [vmem:[%s7905_s5 + $0x10] ss:$8 sps:$4 sm:$0xff]  }
 0x30a   : > { %vm2470_vm5 = vcmp.gt.f32.partialorder %v2454_v4, 0.0  ;;  %v2486_v11 = vmul.f32 0.2, %v2454_v4  ;;  %v2456_v13 = vadd.f32 %v7131_v14, %v2389_v58  ;;  %v2391_v18 = vpop.f32.mrb[7].mxu1  ;;  %v7192_v50 = vadd.f32 %v7160_v24, %v2535_v5 }
 0x30b   : > { %vm2471_vm6 = vcmp.gt.f32.partialorder %v2455_v48, 0.0  ;;  %v2487_v20 = vmul.f32 0.2, %v2455_v48  ;;  %v2457_v23 = vadd.f32 %v7134_v37, %v2391_v18 }
 0x30c   : > { %v2502_v30 = vsel %vm2470_vm5, %v2454_v4, %v2486_v11  ;;  %vm2472_vm7 = vcmp.gt.f32.partialorder %v2456_v13, 0.0  ;;  %v2488_v31 = vmul.f32 0.2, %v2456_v13 }
 0x30d   : > { %v2536_v57 = vmul.f32 %v7144_v22, %v2502_v30  ;;  %v2503_v35 = vsel %vm2471_vm6, %v2455_v48, %v2487_v20  ;;  %vm2473_vm8 = vcmp.gt.f32.partialorder %v2457_v23, 0.0  ;;  %v2489_v49 = vmul.f32 0.2, %v2457_v23 }
 0x30e   : > { %v2537_v12 = vmul.f32 %v7151_v62, %v2503_v35  ;;  %v2504_v59 = vsel %vm2472_vm7, %v2456_v13, %v2488_v31  ;;  %v5821_v13 = vld [vmem:[%s7905_s5 + $0x24] ss:$8 sps:$4 sm:$0xff]  }
 0x30f   : > { %v2570_v9 = vadd.f32 %v7148_v16, %v2536_v57  ;;  %v2538_v15 = vmul.f32 %v7144_v22, %v2504_v59  ;;  %v2505_v40 = vsel %vm2473_vm8, %v2457_v23, %v2489_v49  ;;  %v2395_v47 = vpop.f32.mrb[8].mxu1 }
 0x310   : > { %v2539_v43 = vmul.f32 %v7151_v62, %v2505_v40  ;;  %v2458_v1 = vadd.f32 %v7131_v14, %v2395_v47  ;;  %v2397_v3 = vpop.f32.mrb[9].mxu1  ;;  %v2571_v56 = vadd.f32 %v7160_v24, %v2537_v12  ;;  %v5819_v12 = vld [vmem:[%s7905_s5 + $0x20] ss:$8 sps:$4 sm:$0xff]  }
 0x311   : > { %v2618_v51 = vpack.c.bf16 %v2570_v9, %v2566_v7  ;;  %v2459_v41 = vadd.f32 %v7134_v37, %v2397_v3  ;;  %v2399_v60 = vpop.f32.mrb[10].mxu1  ;;  %v7178_v32 = vadd.f32 %v7148_v16, %v2538_v15  ;;  %v5824_v15 = vld [vmem:[%s7905_s5 + $0x34] ss:$8 sps:$4 sm:$0xff]  }
 0x312   : > { %vm2474_vm9 = vcmp.gt.f32.partialorder %v2458_v1, 0.0  ;;  %v2490_v38 = vmul.f32 0.2, %v2458_v1  ;;  %v2460_v42 = vadd.f32 %v7131_v14, %v2399_v60  ;;  %v2401_v33 = vpop.f32.mrb[11].mxu1  ;;  %v2619_v44 = vpack.c.bf16 %v2571_v56, %v2567_v61  ;;  %v5911_v60 = vld [vmem:[%s7907_s7 + $0x104] ss:$8 sps:$4 sm:$0xff]  }
 0x313   : > { %vm2475_vm10 = vcmp.gt.f32.partialorder %v2459_v41, 0.0  ;;  %v2491_v53 = vmul.f32 0.2, %v2459_v41  ;;  %v2461_v54 = vadd.f32 %v7134_v37, %v2401_v33  ;;  %v7189_v63 = vadd.f32 %v7160_v24, %v2539_v43  ;;  %3672 = vmatprep.subr.bf16.mxu1 %v5911_v60  ;;  %v5846_v60 = vld [vmem:[%s7905_s5 + $0xb0] ss:$8 sps:$4 sm:$0xff]  }
 0x314   : > { %vm2476_vm11 = vcmp.gt.f32.partialorder %v2460_v42, 0.0  ;;  %v2492_v39 = vmul.f32 0.2, %v2460_v42  ;;  %2847 = vmatprep.mubr.bf16.mxu0 %v2619_v44  ;;  %v3081_v0 = vpack.c.bf16 %v7178_v32, %v7156_v46  ;;  %v2506_v55 = vsel %vm2474_vm9, %v2458_v1, %v2490_v38  ;;  %v5914_v38 = vld [vmem:[%s7907_s7 + $0x114] ss:$8 sps:$4 sm:$0xff]  }
 0x315   : > { %vm2477_vm12 = vcmp.gt.f32.partialorder %v2461_v54, 0.0  ;;  %v2493_v2 = vmul.f32 0.2, %v2461_v54  ;;  %2848 = vmatmul.mubr.bf16.vlgmr.msra.gmra.mrb[32].mxu0 %v2618_v51  ;;  %v2507_v10 = vsel %vm2475_vm10, %v2459_v41, %v2491_v53  ;;  %v3082_v48 = vpack.c.bf16 %v7189_v63, %v7192_v50  ;;  %v5822_v41 = vld [vmem:[%s7905_s5 + $0x30] ss:$8 sps:$4 sm:$0xff]  }
 0x316   : > { %v2508_v4 = vsel %vm2476_vm11, %v2460_v42, %v2492_v39  ;;  %3029 = vmatpush1.bf16.msra.mxu0 %v5813_v52  ;;  %v2540_v23 = vmul.f32 %v7144_v22, %v2506_v55  ;;  %v2541_v27 = vmul.f32 %v7151_v62, %v2507_v10  ;;  %v5827_v44 = vld [vmem:[%s7905_s5 + $0x44] ss:$8 sps:$4 sm:$0xff]   ;;  %v5912_v55 = vld [vmem:[%s7907_s7 + $0x110] ss:$8 sps:$4 sm:$0xff]  }
 0x317   : > { %v2542_v58 = vmul.f32 %v7144_v22, %v2508_v4  ;;  %v2509_v34 = vsel %vm2477_vm12, %v2461_v54, %v2493_v2  ;;  %v2405_v11 = vpop.f32.mrb[12].mxu1  ;;  %3030 = vmatprep.subr.bf16.mxu0 %v5818_v45 }
 0x318   : > { %v2543_v18 = vmul.f32 %v7151_v62, %v2509_v34  ;;  %v2462_v26 = vadd.f32 %v7131_v14, %v2405_v11  ;;  %v2407_v20 = vpop.f32.mrb[13].mxu1  ;;  %v2574_v52 = vadd.f32 %v7148_v16, %v2540_v23  ;;  %v2575_v45 = vadd.f32 %v7160_v24, %v2541_v27  ;;  %v5915_v11 = vld [vmem:[%s7907_s7 + $0x120] ss:$8 sps:$4 sm:$0xff]   ;;  %v5923_v27 = vld [vmem:[%s7907_s7 + $0x144] ss:$8 sps:$4 sm:$0xff]  }
 0x319   : > { %v2463_v30 = vadd.f32 %v7134_v37, %v2407_v20  ;;  %v2409_v31 = vpop.f32.mrb[14].mxu1  ;;  %v7212_v57 = vadd.f32 %v7148_v16, %v2542_v58  ;;  %v5917_v58 = vld [vmem:[%s7907_s7 + $0x124] ss:$8 sps:$4 sm:$0xff]   ;;  %v2583_v34 = vpack.c.bf16 %v7192_v50, %v6116_v8  ;;  %v5918_v20 = vld [vmem:[%s7907_s7 + $0x130] ss:$8 sps:$4 sm:$0xff]  }
 0x31a   : > { %vm2478_vm13 = vcmp.gt.f32.partialorder %v2462_v26, 0.0  ;;  %v2494_v35 = vmul.f32 0.2, %v2462_v26  ;;  %v2464_v49 = vadd.f32 %v7131_v14, %v2409_v31  ;;  %3031 = vmatpush1.bf16.msra.mxu0 %v5816_v6  ;;  %v2411_v7 = vpop.f32.mrb[15].mxu1  ;;  %v7219_v59 = vadd.f32 %v7160_v24, %v2543_v18  ;;  %v5920_v18 = vld [vmem:[%s7907_s7 + $0x134] ss:$8 sps:$4 sm:$0xff]  }
 0x31b   : > { %vm2479_vm14 = vcmp.gt.f32.partialorder %v2463_v30, 0.0  ;;  %v2495_v5 = vmul.f32 0.2, %v2463_v30  ;;  %v2465_v9 = vadd.f32 %v7134_v37, %v2411_v7  ;;  %3032 = vmatprep.subr.bf16.mxu0 %v5821_v13  ;;  %v2584_v14 = vpack.c.bf16 %v7212_v57, %v7178_v32  ;;  %v5909_v37 = vld [vmem:[%s7907_s7 + $0x100] ss:$8 sps:$4 sm:$0xff]  }
 0x31c   : > { %v2510_v40 = vsel %vm2478_vm13, %v2462_v26, %v2494_v35  ;;  %vm2480_vm15 = vcmp.gt.f32.partialorder %v2464_v49, 0.0  ;;  %v2496_v47 = vmul.f32 0.2, %v2464_v49  ;;  %v2585_v43 = vpack.c.bf16 %v7219_v59, %v7189_v63  ;;  %3673 = vmatpush1.bf16.msra.mxu1 %v5909_v37  ;;  %v5828_v13 = vld [vmem:[%s7905_s5 + $0x50] ss:$8 sps:$4 sm:$0xff]  }
 0x31d   : > { %v2544_v1 = vmul.f32 %v7144_v22, %v2510_v40  ;;  %v2511_v3 = vsel %vm2479_vm14, %v2463_v30, %v2495_v5  ;;  %vm2481_vm0 = vcmp.gt.f32.partialorder %v2465_v9, 0.0  ;;  %v2497_v61 = vmul.f32 0.2, %v2465_v9  ;;  %3674 = vmatprep.subr.bf16.mxu1 %v5914_v38  ;;  %v5833_v26 = vld [vmem:[%s7905_s5 + $0x64] ss:$8 sps:$4 sm:$0xff]  }
 0x31e   : > { %v2545_v56 = vmul.f32 %v7151_v62, %v2511_v3  ;;  %v2512_v51 = vsel %vm2480_vm15, %v2464_v49, %v2496_v47  ;;  %3033 = vmatpush1.bf16.msra.mxu0 %v5819_v12  ;;  %v5831_v23 = vld [vmem:[%s7905_s5 + $0x60] ss:$8 sps:$4 sm:$0xff]   ;;  %v5836_v30 = vld [vmem:[%s7905_s5 + $0x74] ss:$8 sps:$4 sm:$0xff]   ;;  %v5834_v35 = vld [vmem:[%s7905_s5 + $0x70] ss:$8 sps:$4 sm:$0xff]  }
 0x31f   : > { %v2546_v42 = vmul.f32 %v7144_v22, %v2512_v51  ;;  %v2513_v33 = vsel %vm2481_vm0, %v2465_v9, %v2497_v61  ;;  %3034 = vmatprep.subr.bf16.mxu0 %v5824_v15  ;;  %v2578_v53 = vadd.f32 %v7148_v16, %v2544_v1  ;;  %v5921_v31 = vld [vmem:[%s7907_s7 + $0x140] ss:$8 sps:$4 sm:$0xff]   ;;  %v5926_v49 = vld [vmem:[%s7907_s7 + $0x154] ss:$8 sps:$4 sm:$0xff]   ;;  %v5839_v7 = vld [vmem:[%s7905_s5 + $0x84] ss:$8 sps:$4 sm:$0xff]  }
 0x320   : > { %v2547_v54 = vmul.f32 %v7151_v62, %v2513_v33  ;;  %v2579_v39 = vadd.f32 %v7160_v24, %v2545_v56  ;;  %v5825_v62 = vld [vmem:[%s7905_s5 + $0x40] ss:$8 sps:$4 sm:$0xff]   ;;  %3675 = vmatpush1.bf16.msra.mxu1 %v5912_v55  ;;  %v5924_v12 = vld [vmem:[%s7907_s7 + $0x150] ss:$8 sps:$4 sm:$0xff]   ;;  %v5929_v9 = vld [vmem:[%s7907_s7 + $0x164] ss:$8 sps:$4 sm:$0xff]  }
 0x321   : > { %v2620_v2 = vpack.c.bf16 %v2578_v53, %v2574_v52  ;;  %v7253_v22 = vadd.f32 %v7148_v16, %v2546_v42  ;;  %v5830_v16 = vld [vmem:[%s7905_s5 + $0x54] ss:$8 sps:$4 sm:$0xff]   ;;  %3676 = vmatprep.subr.bf16.mxu1 %v5917_v58  ;;  %v5837_v5 = vld [vmem:[%s7905_s5 + $0x80] ss:$8 sps:$4 sm:$0xff]   ;;  %v5840_v47 = vld [vmem:[%s7905_s5 + $0x90] ss:$8 sps:$4 sm:$0xff]   ;;  %v2582_v58 = vpack.c.bf16 %v7156_v46, %v6116_v8 }
 0x322   : > { %3035 = vmatpush1.bf16.msra.mxu0 %v5822_v41  ;;  %v2621_v10 = vpack.c.bf16 %v2579_v39, %v2575_v45  ;;  %v7262_v4 = vadd.f32 %v7160_v24, %v2547_v54  ;;  %v5842_v15 = vld [vmem:[%s7905_s5 + $0x94] ss:$8 sps:$4 sm:$0xff]   ;;  %v5927_v40 = vld [vmem:[%s7907_s7 + $0x160] ss:$8 sps:$4 sm:$0xff]   ;;  %v5845_v3 = vld [vmem:[%s7905_s5 + $0xa4] ss:$8 sps:$4 sm:$0xff]  }
 0x323   : > { %3036 = vmatprep.subr.bf16.mxu0 %v5827_v44  ;;  %v3083_v6 = vpack.c.bf16 %v7253_v22, %v7212_v57  ;;  %v5932_v1 = vld [vmem:[%s7907_s7 + $0x174] ss:$8 sps:$4 sm:$0xff]   ;;  %v5930_v61 = vld [vmem:[%s7907_s7 + $0x170] ss:$8 sps:$4 sm:$0xff]   ;;  %v5843_v37 = vld [vmem:[%s7905_s5 + $0xa0] ss:$8 sps:$4 sm:$0xff]  }
 0x324   : > { %2857 = vmatprep.mubr.bf16.mxu0 %v2621_v10  ;;  %v3084_v24 = vpack.c.bf16 %v7262_v4, %v7219_v59  ;;  %3677 = vmatpush1.bf16.msra.mxu1 %v5915_v11  ;;  %v5935_v56 = vld [vmem:[%s7907_s7 + $0x184] ss:$8 sps:$4 sm:$0xff]   ;;  %v5848_v51 = vld [vmem:[%s7905_s5 + $0xb4] ss:$8 sps:$4 sm:$0xff]   ;;  %v5933_v41 = vld [vmem:[%s7907_s7 + $0x180] ss:$8 sps:$4 sm:$0xff]  }
 0x325   : > { %2858 = vmatmul.mubr.bf16.gmra.mrb[36].mxu0 %v2620_v2  ;;  %3678 = vmatprep.subr.bf16.mxu1 %v5920_v18  ;;  %v5938_v38 = vld [vmem:[%s7907_s7 + $0x194] ss:$8 sps:$4 sm:$0xff]   ;;  %v5851_v42 = vld [vmem:[%s7905_s5 + $0xc4] ss:$8 sps:$4 sm:$0xff]   ;;  %v5936_v33 = vld [vmem:[%s7907_s7 + $0x190] ss:$8 sps:$4 sm:$0xff]  }
 0x326   : > { %3037 = vmatpush1.bf16.msra.mxu0 %v5825_v62  ;;  %3060 = vmatprep.mubr.bf16.mxu0 %v2583_v34  ;;  %v5849_v44 = vld [vmem:[%s7905_s5 + $0xc0] ss:$8 sps:$4 sm:$0xff]   ;;  %v5941_v52 = vld [vmem:[%s7907_s7 + $0x1a4] ss:$8 sps:$4 sm:$0xff]   ;;  %v5854_v53 = vld [vmem:[%s7905_s5 + $0xd4] ss:$8 sps:$4 sm:$0xff]  }
 0x327   : > { %3038 = vmatprep.subr.bf16.mxu0 %v5830_v16  ;;  %v5939_v54 = vld [vmem:[%s7907_s7 + $0x1a0] ss:$8 sps:$4 sm:$0xff]   ;;  %v5852_v45 = vld [vmem:[%s7905_s5 + $0xd0] ss:$8 sps:$4 sm:$0xff]   ;;  %v5857_v39 = vld [vmem:[%s7905_s5 + $0xe4] ss:$8 sps:$4 sm:$0xff]  }
 0x328   : > { %3679 = vmatpush1.bf16.msra.mxu1 %v5918_v20  ;;  %v5855_v2 = vld [vmem:[%s7905_s5 + $0xe0] ss:$8 sps:$4 sm:$0xff]   ;;  %v5860_v55 = vld [vmem:[%s7905_s5 + $0xf4] ss:$8 sps:$4 sm:$0xff]   ;;  %v5858_v10 = vld [vmem:[%s7905_s5 + $0xf0] ss:$8 sps:$4 sm:$0xff]  }
 0x329   : > { %3680 = vmatprep.subr.bf16.mxu1 %v5923_v27  ;;  %v5863_v62 = vld [vmem:[%s7905_s5 + $0x204] ss:$8 sps:$4 sm:$0xff]   ;;  %v5861_v16 = vld [vmem:[%s7905_s5 + $0x200] ss:$8 sps:$4 sm:$0xff]   ;;  %v5866_v34 = vld [vmem:[%s7905_s5 + $0x214] ss:$8 sps:$4 sm:$0xff]  }
 0x32a   : > { %3039 = vmatpush1.bf16.msra.mxu0 %v5828_v13  ;;  %v5864_v11 = vld [vmem:[%s7905_s5 + $0x210] ss:$8 sps:$4 sm:$0xff]   ;;  %v5869_v13 = vld [vmem:[%s7905_s5 + $0x224] ss:$8 sps:$4 sm:$0xff]   ;;  %v5867_v18 = vld [vmem:[%s7905_s5 + $0x220] ss:$8 sps:$4 sm:$0xff]  }
 0x32b   : > { %3040 = vmatprep.subr.bf16.mxu0 %v5833_v26  ;;  %v5870_v26 = vld [vmem:[%s7905_s5 + $0x230] ss:$8 sps:$4 sm:$0xff]   ;;  %v5875_v20 = vld [vmem:[%s7905_s5 + $0x244] ss:$8 sps:$4 sm:$0xff]   ;;  %v5878_v63 = vld [vmem:[%s7905_s5 + $0x254] ss:$8 sps:$4 sm:$0xff]  }
 0x32c   : > { %3681 = vmatpush1.bf16.msra.mxu1 %v5921_v31  ;;  %v5876_v50 = vld [vmem:[%s7905_s5 + $0x250] ss:$8 sps:$4 sm:$0xff]   ;;  %v5884_v27 = vld [vmem:[%s7905_s5 + $0x274] ss:$8 sps:$4 sm:$0xff]   ;;  %v5887_v31 = vld [vmem:[%s7905_s5 + $0x284] ss:$8 sps:$4 sm:$0xff]  }
 0x32d   : > { %3682 = vmatprep.subr.bf16.mxu1 %v5926_v49  ;;  %v5890_v49 = vld [vmem:[%s7905_s5 + $0x294] ss:$8 sps:$4 sm:$0xff]   ;;  %v5947_v46 = vld [vmem:[%s7907_s7 + $0x1c4] ss:$8 sps:$4 sm:$0xff]   ;;  %v5945_v32 = vld [vmem:[%s7907_s7 + $0x1c0] ss:$8 sps:$4 sm:$0xff]  }
 0x32e   : > { %3041 = vmatpush1.bf16.msra.mxu0 %v5831_v23  ;;  %v5873_v23 = vld [vmem:[%s7905_s5 + $0x240] ss:$8 sps:$4 sm:$0xff]   ;;  %v5948_v57 = vld [vmem:[%s7907_s7 + $0x1d0] ss:$8 sps:$4 sm:$0xff]   ;;  %v5953_v59 = vld [vmem:[%s7907_s7 + $0x1e4] ss:$8 sps:$4 sm:$0xff]  }
 0x32f   : > { %3042 = vmatprep.subr.bf16.mxu0 %v5836_v30  ;;  %v5882_v30 = vld [vmem:[%s7905_s5 + $0x270] ss:$8 sps:$4 sm:$0xff]   ;;  %v5951_v22 = vld [vmem:[%s7907_s7 + $0x1e0] ss:$8 sps:$4 sm:$0xff]   ;;  %v5956_v4 = vld [vmem:[%s7907_s7 + $0x1f4] ss:$8 sps:$4 sm:$0xff]  }
 0x330   : > { %3683 = vmatpush1.bf16.msra.mxu1 %v5924_v12  ;;  %v5893_v12 = vld [vmem:[%s7905_s5 + $0x2a4] ss:$8 sps:$4 sm:$0xff]  }
 0x331   : > { %3684 = vmatprep.subr.bf16.mxu1 %v5929_v9  ;;  %v5896_v9 = vld [vmem:[%s7905_s5 + $0x2b4] ss:$8 sps:$4 sm:$0xff]  }
 0x332   : > { %3043 = vmatpush1.bf16.msra.mxu0 %v5834_v35  ;;  %v5885_v35 = vld [vmem:[%s7905_s5 + $0x280] ss:$8 sps:$4 sm:$0xff]  }
 0x333   : > { %3044 = vmatprep.subr.bf16.mxu0 %v5839_v7  ;;  %v5888_v7 = vld [vmem:[%s7905_s5 + $0x290] ss:$8 sps:$4 sm:$0xff]  }
 0x334   : > { %3685 = vmatpush1.bf16.msra.mxu1 %v5927_v40  ;;  %v5899_v40 = vld [vmem:[%s7905_s5 + $0x2c4] ss:$8 sps:$4 sm:$0xff]  }
 0x335   : > { %3686 = vmatprep.subr.bf16.mxu1 %v5932_v1  ;;  %v5902_v1 = vld [vmem:[%s7905_s5 + $0x2d4] ss:$8 sps:$4 sm:$0xff]  }
 0x336   : > { %3045 = vmatpush1.bf16.msra.mxu0 %v5837_v5  ;;  %v5891_v5 = vld [vmem:[%s7905_s5 + $0x2a0] ss:$8 sps:$4 sm:$0xff]  }
 0x337   : > { %3046 = vmatprep.subr.bf16.mxu0 %v5842_v15  ;;  %v5894_v15 = vld [vmem:[%s7905_s5 + $0x2b0] ss:$8 sps:$4 sm:$0xff]  }
 0x338   : > { %3687 = vmatpush1.bf16.msra.mxu1 %v5930_v61  ;;  %v5905_v61 = vld [vmem:[%s7905_s5 + $0x2e4] ss:$8 sps:$4 sm:$0xff]  }
 0x339   : > { %3688 = vmatprep.subr.bf16.mxu1 %v5935_v56  ;;  %v5908_v56 = vld [vmem:[%s7905_s5 + $0x2f4] ss:$8 sps:$4 sm:$0xff]  }
 0x33a   : > { %3047 = vmatpush1.bf16.msra.mxu0 %v5840_v47  ;;  %v5897_v47 = vld [vmem:[%s7905_s5 + $0x2c0] ss:$8 sps:$4 sm:$0xff]  }
 0x33b   : > { %3048 = vmatprep.subr.bf16.mxu0 %v5845_v3  ;;  %v5900_v3 = vld [vmem:[%s7905_s5 + $0x2d0] ss:$8 sps:$4 sm:$0xff]  }
 0x33c   : > { %3689 = vmatpush1.bf16.msra.mxu1 %v5933_v41  ;;  %v5944_v41 = vld [vmem:[%s7907_s7 + $0x1b4] ss:$8 sps:$4 sm:$0xff]  }
 0x33d   : > { %3690 = vmatprep.subr.bf16.mxu1 %v5938_v38  ;;  %v3339_v38 = vld [vmem:[%s7906_s6] sm:$0x77] }
 0x33e   : > { %3049 = vmatpush1.bf16.msra.mxu0 %v5843_v37  ;;  %v5903_v37 = vld [vmem:[%s7905_s5 + $0x2e0] ss:$8 sps:$4 sm:$0xff]  }
 0x33f   : > { %3050 = vmatprep.subr.bf16.mxu0 %v5848_v51  ;;  %v5906_v51 = vld [vmem:[%s7905_s5 + $0x2f0] ss:$8 sps:$4 sm:$0xff]  }
 0x340   : > { %3691 = vmatpush1.bf16.msra.mxu1 %v5936_v33  ;;  %v3348_v33 = vrot.slane %v3339_v38, %v6597_v21 }
 0x341   : > { %3692 = vmatprep.subr.bf16.mxu1 %v5941_v52 }
 0x342   : > { %3051 = vmatpush1.bf16.msra.mxu0 %v5846_v60  ;;  %v5942_v60 = vld [vmem:[%s7907_s7 + $0x1b0] ss:$8 sps:$4 sm:$0xff]   ;;  %v3358_v52 = vrot.slane %v3348_v33, %v6592_v19 }
 0x343   : > { %3052 = vmatprep.subr.bf16.mxu0 %v5851_v42  ;;  %v3344_v42 = vrot.slane %v3339_v38, %v6592_v19 }
 0x344   : > { %3693 = vmatpush1.bf16.msra.mxu1 %v5939_v54 }
 0x345   : > { %3694 = vmatprep.subr.bf16.mxu1 %v5944_v41 }
 0x346   : > { %3053 = vmatpush1.bf16.msra.mxu0 %v5849_v44  ;;  %v3354_v44 = vrot.slane %v3344_v42, %v6592_v19 }
 0x347   : > { %3054 = vmatprep.subr.bf16.mxu0 %v5854_v53 }
 0x348   : > { %3695 = vmatpush1.bf16.msra.mxu1 %v5942_v60 }
 0x349   : > { %3696 = vmatprep.subr.bf16.mxu1 %v5947_v46 }
 0x34a   : > { %3055 = vmatpush1.bf16.msra.mxu0 %v5852_v45 }
 0x34b   : > { %3056 = vmatprep.subr.bf16.mxu0 %v5857_v39  ;;  %v3394_v39 = vrot.slane %v3339_v38, %v6604_v25 }
 0x34c   : > { %3697 = vmatpush1.bf16.msra.mxu1 %v5945_v32 }
 0x34e   : > { %3057 = vmatpush1.bf16.msra.mxu0 %v5855_v2 }
 0x34f   : > { %3058 = vmatprep.subr.bf16.mxu0 %v5860_v55 }
 0x352   : > { %3059 = vmatpush1.bf16.msra.mxu0 %v5858_v10 }
 0x353   : > { %3278 = vmatprep.subr.bf16.mxu0 %v5863_v62 }
 0x355   : > { %3061 = vmatmul.mubr.bf16.vlgmr.msra.gmra.mrb[32].mxu0 %v2582_v58  ;;  %v3420_v58 = vrot.slane %v3339_v38, %v6609_v28 }
 0x356   : > { %3070 = vmatprep.mubr.bf16.mxu0 %v2585_v43  ;;  %3279 = vmatpush1.bf16.msra.mxu0 %v5861_v16  ;;  %v5872_v43 = vld [vmem:[%s7905_s5 + $0x234] ss:$8 sps:$4 sm:$0xff]  }
 0x357   : > { %3280 = vmatprep.subr.bf16.mxu0 %v5866_v34  ;;  %v3398_v34 = vrot.slane %v3339_v38, %v6611_v29 }
 0x35a   : > { %3281 = vmatpush1.bf16.msra.mxu0 %v5864_v11 }
 0x35b   : > { %3282 = vmatprep.subr.bf16.mxu0 %v5869_v13 }
 0x35d   : > { %3071 = vmatmul.mubr.bf16.gmra.mrb[36].mxu0 %v2584_v14  ;;  %v5879_v14 = vld [vmem:[%s7905_s5 + $0x260] ss:$8 sps:$4 sm:$0xff]  }
 0x35e   : > { %3283 = vmatpush1.bf16.msra.mxu0 %v5867_v18  ;;  %3310 = vmatprep.mubr.bf16.mxu0 %v3082_v48  ;;  %v5881_v48 = vld [vmem:[%s7905_s5 + $0x264] ss:$8 sps:$4 sm:$0xff]  }
 0x35f   : > { %3284 = vmatprep.subr.bf16.mxu0 %v5872_v43  ;;  %v3404_v43 = vrot.slane %v3394_v39, %v6604_v25  ;;  %v5962_v39 = vld [vmem:[%s7907_s7 + $0x14] ss:$8 sps:$4 sm:$0xff]  }
 0x362   : > { %3285 = vmatpush1.bf16.msra.mxu0 %v5870_v26 }
 0x363   : > { %3286 = vmatprep.subr.bf16.mxu0 %v5875_v20  ;;  %v3424_v20 = vrot.slane %v3339_v38, %v6616_v36 }
 0x366   : > { %3287 = vmatpush1.bf16.msra.mxu0 %v5873_v23 }
 0x367   : > { %3288 = vmatprep.subr.bf16.mxu0 %v5878_v63 }
 0x36a   : > { %3289 = vmatpush1.bf16.msra.mxu0 %v5876_v50  ;;  %v3430_v50 = vrot.slane %v3420_v58, %v6609_v28  ;;  %v6055_v58 = vld [vmem:[%s7909_s9 + $0xc8] sm:$0xff]  }
 0x36b   : > { %3290 = vmatprep.subr.bf16.mxu0 %v5881_v48  ;;  %v3408_v48 = vrot.slane %v3398_v34, %v6604_v25  ;;  %v5960_v34 = vld [vmem:[%s7907_s7 + $0x10] ss:$8 sps:$4 sm:$0xff]  }
 0x36e   : > { %3291 = vmatpush1.bf16.msra.mxu0 %v5879_v14 }
 0x36f   : > { %3292 = vmatprep.subr.bf16.mxu0 %v5884_v27 }
 0x372   : > { %3293 = vmatpush1.bf16.msra.mxu0 %v5882_v30 }
 0x373   : > { %3294 = vmatprep.subr.bf16.mxu0 %v5887_v31 }
 0x376   : > { %3295 = vmatpush1.bf16.msra.mxu0 %v5885_v35 }
 0x377   : > { %3296 = vmatprep.subr.bf16.mxu0 %v5890_v49 }
 0x37a   : > { %3297 = vmatpush1.bf16.msra.mxu0 %v5888_v7 }
 0x37b   : > { %3298 = vmatprep.subr.bf16.mxu0 %v5893_v12 }
 0x37e   : > { %3299 = vmatpush1.bf16.msra.mxu0 %v5891_v5 }
 0x37f   : > { %3300 = vmatprep.subr.bf16.mxu0 %v5896_v9  ;;  %v3434_v9 = vrot.slane %v3424_v20, %v6609_v28  ;;  %v6058_v20 = vld [vmem:[%s7909_s9 + $0x90] sm:$0xff]  }
 0x382   : > { %3301 = vmatpush1.bf16.msra.mxu0 %v5894_v15 }
 0x383   : > { %3302 = vmatprep.subr.bf16.mxu0 %v5899_v40 }
 0x386   : > { %3303 = vmatpush1.bf16.msra.mxu0 %v5897_v47 }
 0x387   : > { %3304 = vmatprep.subr.bf16.mxu0 %v5902_v1 }
 0x38a   : > { %3305 = vmatpush1.bf16.msra.mxu0 %v5900_v3 }
 0x38b   : > { %3306 = vmatprep.subr.bf16.mxu0 %v5905_v61 }
 0x38e   : > { %3307 = vmatpush1.bf16.msra.mxu0 %v5903_v37 }
 0x38f   : > { %3308 = vmatprep.subr.bf16.mxu0 %v5908_v56 }
 0x392   : > { %3309 = vmatpush1.bf16.msra.mxu0 %v5906_v51 }
 0x395   : > { %3311 = vmatmul.mubr.bf16.vlgmr.msra.gmra.mrb[32].mxu0 %v3081_v0  ;;  %v5950_v0 = vld [vmem:[%s7907_s7 + $0x1d4] ss:$8 sps:$4 sm:$0xff]  }
 0x396   : > { %3320 = vmatprep.mubr.bf16.mxu0 %v3084_v24  ;;  %3698 = vmatprep.subr.bf16.mxu1 %v5950_v0  ;;  %v5959_v24 = vld [vmem:[%s7907_s7 + $0x4] ss:$8 sps:$4 sm:$0xff]  }
 0x397   : > { %3699 = vmatpush1.bf16.msra.mxu1 %v5948_v57 }
 0x398   : > { %3700 = vmatprep.subr.bf16.mxu1 %v5953_v59 }
 0x39b   : > { %3701 = vmatpush1.bf16.msra.mxu1 %v5951_v22 }
 0x39c   : > { %3702 = vmatprep.subr.bf16.mxu1 %v5956_v4 }
 0x39d   : > { %3321 = vmatmul.mubr.bf16.gmra.mrb[36].mxu0 %v3083_v6  ;;  %v5954_v6 = vld [vmem:[%s7907_s7 + $0x1f0] ss:$8 sps:$4 sm:$0xff]  }
 0x39f   : > { %3703 = vmatpush1.bf16.msra.mxu1 %v5954_v6 }
 0x3a0   : > { %3875 = vmatprep.subr.bf16.mxu1 %v5959_v24 }
 0x468   : > { %v3312_v53 = vpop.f32.mrb[32].mxu0 }
 0x469   : > { %v3359_v54 = vadd.f32 %v3354_v44, %v3312_v53  ;;  %v3314_v45 = vpop.f32.mrb[33].mxu0 }
 0x46a   : > { %v3360_v2 = vadd.f32 %v3358_v52, %v3314_v45  ;;  %v3316_v55 = vpop.f32.mrb[34].mxu0 }
 0x46b   : > { %v3361_v10 = vadd.f32 %v3354_v44, %v3316_v55  ;;  %v3318_v62 = vpop.f32.mrb[35].mxu0  ;;  %v3375_v16 = vmul.f32 0.2, %v3359_v54  ;;  %vm3367_vm1 = vcmp.gt.f32.partialorder %v3359_v54, 0.0 }
 0x46c   : > { %v3362_v11 = vadd.f32 %v3358_v52, %v3318_v62  ;;  %v3376_v13 = vmul.f32 0.2, %v3360_v2  ;;  %vm3368_vm3 = vcmp.gt.f32.partialorder %v3360_v2, 0.0  ;;  %v6053_v62 = vld [vmem:[%s7909_s9 + $0xc0] sm:$0xff]  }
 0x46d   : > { %vm3369_vm2 = vcmp.gt.f32.partialorder %v3361_v10, 0.0  ;;  %v3377_v18 = vmul.f32 0.2, %v3361_v10  ;;  %v3383_v63 = vsel %vm3367_vm1, %v3359_v54, %v3375_v16  ;;  %v5957_v54 = vld [vmem:[%s7907_s7] ss:$8 sps:$4 sm:$0xff]   ;;  %5352 = vmatprep.subr.bf16.mxu0 %v6053_v62 }
 0x46e   : > { %v3378_v26 = vmul.f32 0.2, %v3362_v11  ;;  %vm3370_vm4 = vcmp.gt.f32.partialorder %v3362_v11, 0.0  ;;  %v3384_v30 = vsel %vm3368_vm3, %v3360_v2, %v3376_v13  ;;  %v3409_v15 = vmul.f32 %v3404_v43, %v3383_v63  ;;  %v6054_v16 = vld [vmem:[%s7909_s9 + $0x80] sm:$0xff]   ;;  %v6056_v13 = vld [vmem:[%s7909_s9 + $0x88] sm:$0xff]  }
 0x46f   : > { %v3385_v23 = vsel %vm3369_vm2, %v3361_v10, %v3377_v18  ;;  %v3410_v3 = vmul.f32 %v3408_v48, %v3384_v30  ;;  %5353 = vmatpush3.bf16.msra.mxu0 %v6054_v16  ;;  %v6057_v18 = vld [vmem:[%s7909_s9 + $0xd0] sm:$0xff]   ;;  %v6031_v16 = vld [vmem:[%s7907_s7 + $0x284] ss:$8 sps:$4 sm:$0xff]  }
 0x470   : > { %v3411_v14 = vmul.f32 %v3404_v43, %v3385_v23  ;;  %v3322_v27 = vpop.f32.mrb[36].mxu0  ;;  %v3386_v7 = vsel %vm3370_vm4, %v3362_v11, %v3378_v26  ;;  %v3435_v59 = vadd.f32 %v3430_v50, %v3409_v15  ;;  %v5965_v11 = vld [vmem:[%s7907_s7 + $0x24] ss:$8 sps:$4 sm:$0xff]   ;;  %5354 = vmatprep.subr.bf16.mxu0 %v6055_v58  ;;  %v5968_v26 = vld [vmem:[%s7907_s7 + $0x34] ss:$8 sps:$4 sm:$0xff]  }
 0x471   : > { %v3363_v31 = vadd.f32 %v3354_v44, %v3322_v27  ;;  %v3324_v35 = vpop.f32.mrb[37].mxu0  ;;  %v3412_v56 = vmul.f32 %v3408_v48, %v3386_v7  ;;  %v3436_v38 = vadd.f32 %v3434_v9, %v3410_v3  ;;  %v6059_v23 = vld [vmem:[%s7909_s9 + $0xd8] sm:$0xff]   ;;  %v5969_v27 = vld [vmem:[%s7907_s7 + $0x40] ss:$8 sps:$4 sm:$0xff]  }
 0x472   : > { %v7553_v49 = vadd.f32 %v3430_v50, %v3411_v14  ;;  %v3364_v12 = vadd.f32 %v3358_v52, %v3324_v35  ;;  %v3326_v5 = vpop.f32.mrb[38].mxu0  ;;  %v5966_v63 = vld [vmem:[%s7907_s7 + $0x30] ss:$8 sps:$4 sm:$0xff]   ;;  %v6061_v14 = vld [vmem:[%s7909_s9 + $0xe0] sm:$0xff]   ;;  %v5974_v30 = vld [vmem:[%s7907_s7 + $0x54] ss:$8 sps:$4 sm:$0xff]  }
 0x473   : > { %vm3371_vm5 = vcmp.gt.f32.partialorder %v3363_v31, 0.0  ;;  %v3379_v40 = vmul.f32 0.2, %v3363_v31  ;;  %v3365_v47 = vadd.f32 %v3354_v44, %v3326_v5  ;;  %v3328_v1 = vpop.f32.mrb[39].mxu0  ;;  %v7556_v33 = vadd.f32 %v3434_v9, %v3412_v56  ;;  %5355 = vmatpush3.bf16.msra.mxu0 %v6056_v13  ;;  %v5977_v35 = vld [vmem:[%s7907_s7 + $0x64] ss:$8 sps:$4 sm:$0xff]  }
 0x474   : > { %vm3372_vm6 = vcmp.gt.f32.partialorder %v3364_v12, 0.0  ;;  %v3380_v61 = vmul.f32 0.2, %v3364_v12  ;;  %v3366_v37 = vadd.f32 %v3358_v52, %v3328_v1  ;;  %5356 = vmatprep.subr.bf16.mxu0 %v6057_v18  ;;  %v5975_v7 = vld [vmem:[%s7907_s7 + $0x60] ss:$8 sps:$4 sm:$0xff]  }
 0x475   : > { %v3387_v51 = vsel %vm3371_vm5, %v3363_v31, %v3379_v40  ;;  %vm3373_vm7 = vcmp.gt.f32.partialorder %v3365_v47, 0.0  ;;  %v3381_v41 = vmul.f32 0.2, %v3365_v47  ;;  %v3444_v55 = vpack.c.bf16 %v7556_v33, %v6116_v8  ;;  %v5972_v31 = vld [vmem:[%s7907_s7 + $0x50] ss:$8 sps:$4 sm:$0xff]  }
 0x476   : > { %v3413_v60 = vmul.f32 %v3404_v43, %v3387_v51  ;;  %v3388_v46 = vsel %vm3372_vm6, %v3364_v12, %v3380_v61  ;;  %vm3374_vm8 = vcmp.gt.f32.partialorder %v3366_v37, 0.0  ;;  %v3382_v32 = vmul.f32 0.2, %v3366_v37  ;;  %v5980_v12 = vld [vmem:[%s7907_s7 + $0x74] ss:$8 sps:$4 sm:$0xff]  }
 0x477   : > { %v3414_v0 = vmul.f32 %v3408_v48, %v3388_v46  ;;  %v3389_v57 = vsel %vm3373_vm7, %v3365_v47, %v3381_v41  ;;  %5357 = vmatpush3.bf16.msra.mxu0 %v6058_v20  ;;  %v5978_v5 = vld [vmem:[%s7907_s7 + $0x70] ss:$8 sps:$4 sm:$0xff]   ;;  %v5981_v15 = vld [vmem:[%s7907_s7 + $0x80] ss:$8 sps:$4 sm:$0xff]   ;;  %v5986_v40 = vld [vmem:[%s7907_s7 + $0x94] ss:$8 sps:$4 sm:$0xff]  }
 0x478   : > { %v3439_v22 = vadd.f32 %v3430_v50, %v3413_v60  ;;  %v3415_v4 = vmul.f32 %v3404_v43, %v3389_v57  ;;  %v3390_v6 = vsel %vm3374_vm8, %v3366_v37, %v3382_v32  ;;  %v5963_v43 = vld [vmem:[%s7907_s7 + $0x20] ss:$8 sps:$4 sm:$0xff]   ;;  %5358 = vmatprep.subr.bf16.mxu0 %v6059_v23  ;;  %v5984_v47 = vld [vmem:[%s7907_s7 + $0x90] ss:$8 sps:$4 sm:$0xff]   ;;  %v5989_v1 = vld [vmem:[%s7907_s7 + $0xa4] ss:$8 sps:$4 sm:$0xff]  }
 0x479   : > { %v3416_v24 = vmul.f32 %v3408_v48, %v3390_v6  ;;  %v3440_v42 = vadd.f32 %v3434_v9, %v3414_v0  ;;  %v6060_v48 = vld [vmem:[%s7909_s9 + $0x98] sm:$0xff]   ;;  %v5987_v3 = vld [vmem:[%s7907_s7 + $0xa0] ss:$8 sps:$4 sm:$0xff]   ;;  %v5995_v56 = vld [vmem:[%s7907_s7 + $0xc4] ss:$8 sps:$4 sm:$0xff]  }
 0x47a   : > { %v3477_v44 = vpack.c.bf16 %v3439_v22, %v3435_v59  ;;  %v7558_v52 = vadd.f32 %v3430_v50, %v3415_v4  ;;  %v5971_v50 = vld [vmem:[%s7907_s7 + $0x44] ss:$8 sps:$4 sm:$0xff]   ;;  %v5992_v61 = vld [vmem:[%s7907_s7 + $0xb4] ss:$8 sps:$4 sm:$0xff]   ;;  %v5990_v37 = vld [vmem:[%s7907_s7 + $0xb0] ss:$8 sps:$4 sm:$0xff]   ;;  %v3443_v4 = vpack.c.bf16 %v7553_v49, %v6116_v8 }
 0x47b   : > { %v3478_v53 = vpack.c.bf16 %v3440_v42, %v3436_v38  ;;  %v7563_v45 = vadd.f32 %v3434_v9, %v3416_v24  ;;  %5359 = vmatpush3.bf16.msra.mxu0 %v6060_v48  ;;  %v5983_v9 = vld [vmem:[%s7907_s7 + $0x84] ss:$8 sps:$4 sm:$0xff]   ;;  %v5993_v51 = vld [vmem:[%s7907_s7 + $0xc0] ss:$8 sps:$4 sm:$0xff]   ;;  %v5998_v41 = vld [vmem:[%s7907_s7 + $0xd4] ss:$8 sps:$4 sm:$0xff]  }
 0x47c   : > { %v3918_v2 = vpack.c.bf16 %v7558_v52, %v7553_v49  ;;  %5360 = vmatprep.subr.bf16.mxu0 %v6061_v14  ;;  %v5996_v60 = vld [vmem:[%s7907_s7 + $0xd0] ss:$8 sps:$4 sm:$0xff]   ;;  %v6001_v46 = vld [vmem:[%s7907_s7 + $0xe4] ss:$8 sps:$4 sm:$0xff]   ;;  %v5999_v32 = vld [vmem:[%s7907_s7 + $0xe0] ss:$8 sps:$4 sm:$0xff]  }
 0x47d   : > { %3704 = vmatprep.mubr.bf16.mxu1 %v3478_v53  ;;  %v3919_v10 = vpack.c.bf16 %v7563_v45, %v7556_v33  ;;  %v6004_v0 = vld [vmem:[%s7907_s7 + $0xf4] ss:$8 sps:$4 sm:$0xff]   ;;  %v6002_v57 = vld [vmem:[%s7907_s7 + $0xf0] ss:$8 sps:$4 sm:$0xff]   ;;  %v6007_v59 = vld [vmem:[%s7907_s7 + $0x204] ss:$8 sps:$4 sm:$0xff]  }
 0x47e   : > { %3705 = vmatmul.mubr.bf16.vlgmr.msra.gmra.mrb[16].mxu1 %v3477_v44  ;;  %v6005_v22 = vld [vmem:[%s7907_s7 + $0x200] ss:$8 sps:$4 sm:$0xff]   ;;  %v6010_v6 = vld [vmem:[%s7907_s7 + $0x214] ss:$8 sps:$4 sm:$0xff]   ;;  %v6008_v24 = vld [vmem:[%s7907_s7 + $0x210] ss:$8 sps:$4 sm:$0xff]  }
 0x47f   : > { %3876 = vmatpush1.bf16.msra.mxu1 %v5957_v54  ;;  %3907 = vmatprep.mubr.bf16.mxu1 %v3444_v55  ;;  %v6013_v8 = vld [vmem:[%s7907_s7 + $0x224] ss:$8 sps:$4 sm:$0xff]   ;;  %v6011_v38 = vld [vmem:[%s7907_s7 + $0x220] ss:$8 sps:$4 sm:$0xff]   ;;  %v6016_v42 = vld [vmem:[%s7907_s7 + $0x234] ss:$8 sps:$4 sm:$0xff]  }
 0x480   : > { %3877 = vmatprep.subr.bf16.mxu1 %v5962_v39  ;;  %v6014_v33 = vld [vmem:[%s7907_s7 + $0x230] ss:$8 sps:$4 sm:$0xff]   ;;  %v6019_v44 = vld [vmem:[%s7907_s7 + $0x244] ss:$8 sps:$4 sm:$0xff]   ;;  %v6017_v53 = vld [vmem:[%s7907_s7 + $0x240] ss:$8 sps:$4 sm:$0xff]  }
 0x481   : > { %v6022_v54 = vld [vmem:[%s7907_s7 + $0x254] ss:$8 sps:$4 sm:$0xff]   ;;  %v6020_v45 = vld [vmem:[%s7907_s7 + $0x250] ss:$8 sps:$4 sm:$0xff]   ;;  %v6025_v39 = vld [vmem:[%s7907_s7 + $0x264] ss:$8 sps:$4 sm:$0xff]  }
 0x482   : > { %v6023_v55 = vld [vmem:[%s7907_s7 + $0x260] ss:$8 sps:$4 sm:$0xff]   ;;  %v6026_v62 = vld [vmem:[%s7907_s7 + $0x270] ss:$8 sps:$4 sm:$0xff]   ;;  %v6037_v13 = vld [vmem:[%s7907_s7 + $0x2a4] ss:$8 sps:$4 sm:$0xff]  }
 0x483   : > { %3878 = vmatpush1.bf16.msra.mxu1 %v5960_v34  ;;  %v6029_v58 = vld [vmem:[%s7907_s7 + $0x280] ss:$8 sps:$4 sm:$0xff]   ;;  %v6034_v34 = vld [vmem:[%s7907_s7 + $0x294] ss:$8 sps:$4 sm:$0xff]   ;;  %v6043_v20 = vld [vmem:[%s7907_s7 + $0x2c4] ss:$8 sps:$4 sm:$0xff]  }
 0x484   : > { %3879 = vmatprep.subr.bf16.mxu1 %v5965_v11  ;;  %v6032_v11 = vld [vmem:[%s7907_s7 + $0x290] ss:$8 sps:$4 sm:$0xff]   ;;  %v6035_v18 = vld [vmem:[%s7907_s7 + $0x2a0] ss:$8 sps:$4 sm:$0xff]   ;;  %v6049_v48 = vld [vmem:[%s7907_s7 + $0x2e4] ss:$8 sps:$4 sm:$0xff]  }
 0x485   : > { %v6041_v23 = vld [vmem:[%s7907_s7 + $0x2c0] ss:$8 sps:$4 sm:$0xff]   ;;  %v6065_v49 = vld [vmem:[%s7909_s9 + $0xf0] sm:$0xff]  }
 0x486   : > { %v6047_v14 = vld [vmem:[%s7907_s7 + $0x2e0] ss:$8 sps:$4 sm:$0xff]   ;;  %v6066_v52 = vld [vmem:[%s7909_s9 + $0xb0] sm:$0xff]  }
 0x487   : > { %3880 = vmatpush1.bf16.msra.mxu1 %v5963_v43  ;;  %v6040_v43 = vld [vmem:[%s7907_s7 + $0x2b4] ss:$8 sps:$4 sm:$0xff]  }
 0x488   : > { %3881 = vmatprep.subr.bf16.mxu1 %v5968_v26  ;;  %v6038_v26 = vld [vmem:[%s7907_s7 + $0x2b0] ss:$8 sps:$4 sm:$0xff]  }
 0x48b   : > { %3882 = vmatpush1.bf16.msra.mxu1 %v5966_v63  ;;  %v6046_v63 = vld [vmem:[%s7907_s7 + $0x2d4] ss:$8 sps:$4 sm:$0xff]  }
 0x48c   : > { %3883 = vmatprep.subr.bf16.mxu1 %v5971_v50  ;;  %v6044_v50 = vld [vmem:[%s7907_s7 + $0x2d0] ss:$8 sps:$4 sm:$0xff]  }
 0x48f   : > { %3884 = vmatpush1.bf16.msra.mxu1 %v5969_v27  ;;  %v6052_v27 = vld [vmem:[%s7907_s7 + $0x2f4] ss:$8 sps:$4 sm:$0xff]  }
 0x490   : > { %3885 = vmatprep.subr.bf16.mxu1 %v5974_v30  ;;  %v6050_v30 = vld [vmem:[%s7907_s7 + $0x2f0] ss:$8 sps:$4 sm:$0xff]  }
 0x493   : > { %3886 = vmatpush1.bf16.msra.mxu1 %v5972_v31  ;;  %v6062_v31 = vld [vmem:[%s7909_s9 + $0xa0] sm:$0xff]  }
 0x494   : > { %3887 = vmatprep.subr.bf16.mxu1 %v5977_v35  ;;  %5361 = vmatpush3.bf16.msra.mxu0 %v6062_v31  ;;  %v6063_v35 = vld [vmem:[%s7909_s9 + $0xe8] sm:$0xff]  }
 0x495   : > { %5362 = vmatprep.subr.bf16.mxu0 %v6063_v35 }
 0x497   : > { %3888 = vmatpush1.bf16.msra.mxu1 %v5975_v7  ;;  %v6064_v7 = vld [vmem:[%s7909_s9 + $0xa8] sm:$0xff]  }
 0x498   : > { %3889 = vmatprep.subr.bf16.mxu1 %v5980_v12  ;;  %5363 = vmatpush3.bf16.msra.mxu0 %v6064_v7  ;;  %v6068_v12 = vld [vmem:[%s7909_s9 + $0xb8] sm:$0xff]  }
 0x499   : > { %5364 = vmatprep.subr.bf16.mxu0 %v6065_v49 }
 0x49b   : > { %3890 = vmatpush1.bf16.msra.mxu1 %v5978_v5  ;;  %v6069_v5 = vld [vmem:[%s7909_s9 + $0x40] sm:$0xff]  }
 0x49c   : > { %3891 = vmatprep.subr.bf16.mxu1 %v5983_v9  ;;  %5365 = vmatpush3.bf16.msra.mxu0 %v6066_v52  ;;  %v4160_v9 = vld [vmem:[%s7908_s8] sm:$0x77] }
 0x49f   : > { %3892 = vmatpush1.bf16.msra.mxu1 %v5981_v15  ;;  %v4169_v15 = vrot.slane %v4160_v9, %v6597_v21  ;;  %v4225_v21 = vrot.slane %v4160_v9, %v6616_v36 }
 0x4a0   : > { %3893 = vmatprep.subr.bf16.mxu1 %v5986_v40  ;;  %v4165_v40 = vrot.slane %v4160_v9, %v6592_v19 }
 0x4a3   : > { %3894 = vmatpush1.bf16.msra.mxu1 %v5984_v47  ;;  %v4179_v47 = vrot.slane %v4169_v15, %v6592_v19 }
 0x4a4   : > { %3895 = vmatprep.subr.bf16.mxu1 %v5989_v1  ;;  %v4203_v1 = vrot.slane %v4160_v9, %v6611_v29 }
 0x4a7   : > { %3896 = vmatpush1.bf16.msra.mxu1 %v5987_v3 }
 0x4a8   : > { %3897 = vmatprep.subr.bf16.mxu1 %v5992_v61  ;;  %v4175_v61 = vrot.slane %v4165_v40, %v6592_v19  ;;  %v5349_v40 = vld [vmem:[%s7910_s10] ss:$0 sm:$0xff] }
 0x4ab   : > { %3898 = vmatpush1.bf16.msra.mxu1 %v5990_v37 }
 0x4ac   : > { %3899 = vmatprep.subr.bf16.mxu1 %v5995_v56  ;;  %v4199_v56 = vrot.slane %v4160_v9, %v6604_v25 }
 0x4ae   : > { %v4209_v19 = vrot.slane %v4199_v56, %v6604_v25 }
 0x4af   : > { %3900 = vmatpush1.bf16.msra.mxu1 %v5993_v51 }
 0x4b0   : > { %3901 = vmatprep.subr.bf16.mxu1 %v5998_v41 }
 0x4b3   : > { %3902 = vmatpush1.bf16.msra.mxu1 %v5996_v60  ;;  %v4213_v60 = vrot.slane %v4203_v1, %v6604_v25  ;;  %v6070_v25 = vld [vmem:[%s7909_s9] sm:$0xff]  }
 0x4b4   : > { %3903 = vmatprep.subr.bf16.mxu1 %v6001_v46 }
 0x4b7   : > { %3904 = vmatpush1.bf16.msra.mxu1 %v5999_v32 }
 0x4b8   : > { %3905 = vmatprep.subr.bf16.mxu1 %v6004_v0 }
 0x4bb   : > { %3906 = vmatpush1.bf16.msra.mxu1 %v6002_v57  ;;  %v4221_v57 = vrot.slane %v4160_v9, %v6609_v28 }
 0x4bc   : > { %4113 = vmatprep.subr.bf16.mxu1 %v6007_v59 }
 0x4be   : > { %3908 = vmatmul.mubr.bf16.vlgmr.msra.gmra.mrb[16].mxu1 %v3443_v4 }
 0x4bf   : > { %4114 = vmatpush1.bf16.msra.mxu1 %v6005_v22  ;;  %4145 = vmatprep.mubr.bf16.mxu1 %v3919_v10  ;;  %v6028_v10 = vld [vmem:[%s7907_s7 + $0x274] ss:$8 sps:$4 sm:$0xff]  }
 0x4c0   : > { %4115 = vmatprep.subr.bf16.mxu1 %v6010_v6 }
 0x4c3   : > { %4116 = vmatpush1.bf16.msra.mxu1 %v6008_v24 }
 0x4c4   : > { %4117 = vmatprep.subr.bf16.mxu1 %v6013_v8  ;;  %v4235_v8 = vrot.slane %v4225_v21, %v6609_v28  ;;  %v4602_v21 = vld [vmem:[%s589_s16] sm:$0xff] }
 0x4c7   : > { %4118 = vmatpush1.bf16.msra.mxu1 %v6011_v38 }
 0x4c8   : > { %4119 = vmatprep.subr.bf16.mxu1 %v6016_v42  ;;  %v4231_v42 = vrot.slane %v4221_v57, %v6609_v28  ;;  %v6072_v28 = vld [vmem:[%s7909_s9 + $0x8] sm:$0xff]  }
 0x4cb   : > { %4120 = vmatpush1.bf16.msra.mxu1 %v6014_v33 }
 0x4cc   : > { %4121 = vmatprep.subr.bf16.mxu1 %v6019_v44 }
 0x4cf   : > { %4122 = vmatpush1.bf16.msra.mxu1 %v6017_v53 }
 0x4d0   : > { %4123 = vmatprep.subr.bf16.mxu1 %v6022_v54 }
 0x4d3   : > { %4124 = vmatpush1.bf16.msra.mxu1 %v6020_v45 }
 0x4d4   : > { %4125 = vmatprep.subr.bf16.mxu1 %v6025_v39 }
 0x4d7   : > { %4126 = vmatpush1.bf16.msra.mxu1 %v6023_v55  ;;  %v6071_v55 = vld [vmem:[%s7909_s9 + $0x48] sm:$0xff]  }
 0x4d8   : > { %4127 = vmatprep.subr.bf16.mxu1 %v6028_v10 }
 0x4db   : > { %4128 = vmatpush1.bf16.msra.mxu1 %v6026_v62  ;;  %v6073_v62 = vld [vmem:[%s7909_s9 + $0x50] sm:$0xff]  }
 0x4dc   : > { %4129 = vmatprep.subr.bf16.mxu1 %v6031_v16  ;;  %v6074_v16 = vld [vmem:[%s7909_s9 + $0x10] sm:$0xff]  }
 0x4df   : > { %4130 = vmatpush1.bf16.msra.mxu1 %v6029_v58  ;;  %v6075_v58 = vld [vmem:[%s7909_s9 + $0x58] sm:$0xff]  }
 0x4e0   : > { %4131 = vmatprep.subr.bf16.mxu1 %v6034_v34  ;;  %v6076_v34 = vld [vmem:[%s7909_s9 + $0x18] sm:$0xff]  }
 0x4e3   : > { %4132 = vmatpush1.bf16.msra.mxu1 %v6032_v11  ;;  %v6077_v11 = vld [vmem:[%s7909_s9 + $0x60] sm:$0xff]  }
 0x4e4   : > { %4133 = vmatprep.subr.bf16.mxu1 %v6037_v13 }
 0x4e7   : > { %4134 = vmatpush1.bf16.msra.mxu1 %v6035_v18  ;;  %v6078_v18 = vld [vmem:[%s7909_s9 + $0x20] sm:$0xff]  }
 0x4e8   : > { %4135 = vmatprep.subr.bf16.mxu1 %v6040_v43  ;;  %v6079_v43 = vld [vmem:[%s7909_s9 + $0x68] sm:$0xff]  }
 0x4eb   : > { %4136 = vmatpush1.bf16.msra.mxu1 %v6038_v26 }
 0x4ec   : > { %4137 = vmatprep.subr.bf16.mxu1 %v6043_v20  ;;  %v6080_v20 = vld [vmem:[%s7909_s9 + $0x28] sm:$0xff]  }
 0x4ef   : > { %4138 = vmatpush1.bf16.msra.mxu1 %v6041_v23  ;;  %v6081_v23 = vld [vmem:[%s7909_s9 + $0x70] sm:$0xff]  }
 0x4f0   : > { %4139 = vmatprep.subr.bf16.mxu1 %v6046_v63 }
 0x4f3   : > { %4140 = vmatpush1.bf16.msra.mxu1 %v6044_v50  ;;  %v6082_v50 = vld [vmem:[%s7909_s9 + $0x30] sm:$0xff]  }
 0x4f4   : > { %4141 = vmatprep.subr.bf16.mxu1 %v6049_v48 }
 0x4f7   : > { %4142 = vmatpush1.bf16.msra.mxu1 %v6047_v14  ;;  %v6083_v14 = vld [vmem:[%s7909_s9 + $0x78] sm:$0xff]  }
 0x4f8   : > { %4143 = vmatprep.subr.bf16.mxu1 %v6052_v27  ;;  %v6084_v27 = vld [vmem:[%s7909_s9 + $0x38] sm:$0xff]  }
 0x4fb   : > { %4144 = vmatpush1.bf16.msra.mxu1 %v6050_v30 }
 0x4fe   : > { %4146 = vmatmul.mubr.bf16.vlgmr.msra.gmra.mrb[16].mxu1 %v3918_v2  ;;  %v6067_v2 = vld [vmem:[%s7909_s9 + $0xf8] sm:$0xff]  }
 0x4ff   : > { %5366 = vmatprep.subr.bf16.mxu0 %v6067_v2 }
 0x500   : > { %5367 = vmatpush3.bf16.msra.mxu0 %v6068_v12 }
 0x501   : > { %5374 = vmatprep.subr.bf16.mxu0 %v6069_v5 }
 0x5d1   : > { %v4147_v3 = vpop.f32.mrb[16].mxu1 }
 0x5d2   : > { %v4149_v37 = vpop.f32.mrb[17].mxu1  ;;  %v4180_v13 = vadd.f32 %v4175_v61, %v4147_v3 }
 0x5d3   : > { %v4181_v51 = vadd.f32 %v4179_v47, %v4149_v37  ;;  %v4151_v41 = vpop.f32.mrb[18].mxu1 }
 0x5d4   : > { %v4182_v46 = vadd.f32 %v4175_v61, %v4151_v41  ;;  %v4153_v32 = vpop.f32.mrb[19].mxu1  ;;  %v4188_v26 = vmul.f32 0.2, %v4180_v13  ;;  %vm4184_vm12 = vcmp.gt.f32.partialorder %v4180_v13, 0.0 }
 0x5d5   : > { %vm4185_vm9 = vcmp.gt.f32.partialorder %v4181_v51, 0.0  ;;  %v4189_v0 = vmul.f32 0.2, %v4181_v51  ;;  %v4183_v59 = vadd.f32 %v4179_v47, %v4153_v32  ;;  %v4609_v32 = vand.u32 127, %v1347_v17 }
 0x5d6   : > { %vm4186_vm10 = vcmp.gt.f32.partialorder %v4182_v46, 0.0  ;;  %v4190_v29 = vmul.f32 0.2, %v4182_v46  ;;  %v4192_v63 = vsel %vm4184_vm12, %v4180_v13, %v4188_v26 }
 0x5d7   : > { %v4193_v22 = vsel %vm4185_vm9, %v4181_v51, %v4189_v0  ;;  %vm4187_vm11 = vcmp.gt.f32.partialorder %v4183_v59, 0.0  ;;  %v4191_v4 = vmul.f32 0.2, %v4183_v59  ;;  %v4214_v48 = vmul.f32 %v4209_v19, %v4192_v63 }
 0x5d8   : > { %v4215_v6 = vmul.f32 %v4213_v60, %v4193_v22  ;;  %v4194_v24 = vsel %vm4186_vm10, %v4182_v46, %v4190_v29  ;;  %vm4612_vm13 = vcmp.ge.s32.totalorder %v4609_v32, 33  ;;  %vm4613_vm14 = vcmp.lt.s32.totalorder %v4609_v32, 49 }
 0x5d9   : > { %v4216_v38 = vmul.f32 %v4209_v19, %v4194_v24  ;;  %v4195_v36 = vsel %vm4187_vm11, %v4183_v59, %v4191_v4  ;;  %v4236_v30 = vadd.f32 %v4231_v42, %v4214_v48  ;;  %vm4610_vm15 = vcmp.eq.s32.totalorder %v4609_v32, 0  ;;  %vm4614_vm0 = vmand %vm4612_vm13, %vm4613_vm14 }
 0x5da   : > { %v4217_v33 = vmul.f32 %v4213_v60, %v4195_v36  ;;  %v4237_v54 = vadd.f32 %v4235_v8, %v4215_v6 }
 0x5db   : > { %v4238_v44 = vadd.f32 %v4231_v42, %v4216_v38  ;;  %v4240_v31 = vpack.c.bf16 %v4236_v30, %v4236_v30 }
 0x5dc   : > { %v4239_v53 = vadd.f32 %v4235_v8, %v4217_v33  ;;  %v4241_v10 = vpack.c.bf16 %v4237_v54, %v4237_v54 }
 0x5dd   : > { %v4274_v39 = vpack.c.bf16 %v4238_v44, %v4238_v44 }
 0x5de   : > { %v4275_v45 = vpack.c.bf16 %v4239_v53, %v4239_v53 }
 0x5e0   : > { %4437 = vmatprep.mubr.bf16.mxu0 %v4275_v45 }
 0x5e1   : > { %4438 = vmatmul.mubr.bf16.vlgmr.msra.gmra.mrb[40].mxu0 %v4274_v39 }
 0x5e2   : > { %5375 = vmatpush3.bf16.msra.mxu0 %v6070_v25  ;;  %4573 = vmatprep.mubr.bf16.mxu0 %v4241_v10 }
 0x5e3   : > { %5376 = vmatprep.subr.bf16.mxu0 %v6071_v55 }
 0x5e6   : > { %5377 = vmatpush3.bf16.msra.mxu0 %v6072_v28 }
 0x5e7   : > { %5378 = vmatprep.subr.bf16.mxu0 %v6073_v62 }
 0x5ea   : > { %5379 = vmatpush3.bf16.msra.mxu0 %v6074_v16 }
 0x5eb   : > { %5380 = vmatprep.subr.bf16.mxu0 %v6075_v58 }
 0x5ee   : > { %5381 = vmatpush3.bf16.msra.mxu0 %v6076_v34 }
 0x5ef   : > { %5382 = vmatprep.subr.bf16.mxu0 %v6077_v11 }
 0x5f2   : > { %5383 = vmatpush3.bf16.msra.mxu0 %v6078_v18 }
 0x5f3   : > { %5384 = vmatprep.subr.bf16.mxu0 %v6079_v43 }
 0x5f6   : > { %5385 = vmatpush3.bf16.msra.mxu0 %v6080_v20 }
 0x5f7   : > { %5386 = vmatprep.subr.bf16.mxu0 %v6081_v23 }
 0x5fa   : > { %5387 = vmatpush3.bf16.msra.mxu0 %v6082_v50 }
 0x5fb   : > { %5388 = vmatprep.subr.bf16.mxu0 %v6083_v14 }
 0x5fe   : > { %5389 = vmatpush3.bf16.msra.mxu0 %v6084_v27 }
 0x601   : > { %4574 = vmatmul.mubr.bf16.vlgmr.msra.gmra.mrb[44].mxu0 %v4240_v31 }
 0x6b4   : > { %v5368_v35 = vpop.f32.mrb[40].mxu0 }
 0x6b5   : > { %v5369_v7 = vpop.f32.mrb[41].mxu0 }
 0x6b6   : > { %v5370_v49 = vadd.f32 %v5369_v7, %v5368_v35  ;;  %v5371_v52 = vpop.f32.mrb[42].mxu0 }
 0x6b7   : > { %v5372_v2 = vpop.f32.mrb[43].mxu0 }
 0x6d4   : > { %v5390_v12 = vpop.f32.mrb[44].mxu0 }
 0x6d5   : > { %v5391_v5 = vpop.f32.mrb[45].mxu0 }
 0x6d6   : > { %v5392_v9 = vadd.f32 %v5391_v5, %v5390_v12  ;;  %v5393_v15 = vpop.f32.mrb[46].mxu0 }
 0x6d7   : > { %v5394_v47 = vpop.f32.mrb[47].mxu0 }
 0x6d8   : > { %v4576_v1 = vadd.f32 %v5392_v9, %v5370_v49 }
 0x6da   : > { %v4588_v3 = vadd.f32 %v5349_v40, %v4576_v1 }
 0x6dc   : > { %4599 = vrot.lane.b32.xlu0 %v4588_v3, %s6117_s26  ;;  %v4589_v61 = vsub.f32 0.0, %v4588_v3 }
 0x6de   : > { %v4590_v37 = vmul.f32 1.442695, %v4589_v61 }
 0x6e0   : > { %4596 = vrot.lane.b32.xlu0 %v4588_v3, %s6118_s27  ;;  %6085 = vpow2.f32 %v4590_v37 }
 0x6ea   : > { %v6086_v56 = vpop.eup %6085 }
 0x6eb   : > { %v4592_v60 = vadd.f32 1.0, %v6086_v56 }
 0x74e   : > { %v4600_v51 = vpop.permute.xlu0 %4599 }
 0x74f   : > { %v4603_v41 = vmul.f32 0.5, %v4600_v51 }
 0x751   : > { %v4604_v46 = vmul.f32 1.442695, %v4603_v41 }
 0x752   : > { %v4597_v29 = vpop.permute.xlu0 %4596 }
 0x753   : > { %6087 = vpow2.f32 %v4604_v46 }
 0x754   : > { %6089 = vrcp.f32 %v4592_v60 }
 0x75d   : > { %v6088_v0 = vpop.eup %6087 }
 0x75e   : > { %v6090_v57 = vpop.eup %6089  ;;  %v4606_v59 = vmul.f32 %v6088_v0, %v4602_v21 }
 0x75f   : > { %v4611_v22 = vsel %vm4610_vm15, %v6090_v57, %v4588_v3 }
 0x760   : > { %v4607_v19 = vadd.f32 %v4606_v59, %v4597_v29 }
 0x762   : > { %v4615_v4 = vsel %vm4614_vm0, %v4607_v19, %v4611_v22 }
 0x763   : > { %4616 = vst [vmem:[%s593_s18] sm:$0xff] %v4615_v4 }
 0x764 PF: > { %p19_p9 = scmp.ge.s32.totalorder %s6201_s25, 4   ;;  %s7913_s21 = smov %s6109_s22 }
 0x765   : > { %s7914_s22 = smov %s6210_s28  ;;  %s7915_s23 = smov %s6201_s25 }
 0x766   :  { %21 = sbr.rel (!%p19_p9) target bundleno = 2 (0x2), region = 156 }

</bundles_post_ra>
